<compile_context>
chip_gen: v6e
topology: v6e:2x2x1
jax: 0.10.0
libtpu: 0.0.40
codegen_flags: <defaults>
</compile_context>

<pallas_src>
import jax
import jax.numpy as jnp
from jax.experimental import pallas as pl
from jax.experimental.pallas import tpu as pltpu

_EPS = 1e-5
_NEG_SLOPE = 0.1


# --------------------------------------------------------------------------
# Wrapper-side helper: fold kw taps / W padding / W stride of a conv weight
# into `ks` band matrices of shape (W*Cin, Wo*Cout).
# --------------------------------------------------------------------------
def _band_weights(w, W, Wo, stride):
    Cout, Cin, ks, _ = w.shape
    pad = (ks - 1) // 2
    wi = jnp.arange(W)[:, None]                 # input column
    j = jnp.arange(Wo)[None, :]                 # output column
    kw = wi - stride * j + pad                  # which tap links (wi -> j)
    valid = (kw >= 0) & (kw < ks)
    kw_c = jnp.clip(kw, 0, ks - 1)
    w_t = jnp.transpose(w, (2, 3, 1, 0))        # (kh, kw, Cin, Cout)
    t = w_t[:, kw_c]                            # (ks, W, Wo, Cin, Cout)
    t = jnp.where(valid[None, :, :, None, None], t, 0.0)
    b = jnp.transpose(t, (0, 1, 3, 2, 4)).reshape(ks, W * Cin, Wo * Cout)
    return b.astype(jnp.bfloat16)


# --------------------------------------------------------------------------
# Conv stage kernel: (prev-stage BN + LeakyReLU) -> conv -> partial BN stats.
# One grid step == one batch element; everything stays lane-packed (W*C).
# --------------------------------------------------------------------------
def _make_conv_stage_kernel(*, ks, stride, H, Ho, Wo, Cout, apply_input_bn):
    pad = (ks - 1) // 2

    def kernel(x_ref, scale_ref, shift_ref, wb_ref, y_ref, stats_ref):
        # x_ref:     (1, H, W*Cin)   raw conv output of the previous stage (or input)
        # scale/shift: (1, W*Cin) f32 previous stage's folded BN (channel tiled over W)
        # wb_ref:    (ks, W*Cin, Wo*Cout) bf16 band weight matrices
        # y_ref:     (1, Ho, Wo*Cout) bf16 raw conv output of THIS stage (pre-BN)
        # stats_ref: (1, 2, Wo*Cout) f32 [sum, sum of squares] over the Ho rows
        x = x_ref[0].astype(jnp.float32)
        if apply_input_bn:                                   # fuse prev BN + LeakyReLU
            z = x * scale_ref[...] + shift_ref[...]
            x = jnp.where(z >= 0.0, z, _NEG_SLOPE * z)
        xb = x.astype(jnp.bfloat16)

        acc = jnp.zeros((Ho, Wo * Cout), jnp.float32)
        for kh in range(ks):                                 # unrolled (ks <= 3)
            if ks == 1 and stride == 1:
                xs = xb                                      # 1x1 conv: no row shift
            else:
                # 0/1 selection matrix implements the kh shift, the H stride and
                # the zero padding along H (out-of-range rows select nothing).
                r = jax.lax.broadcasted_iota(jnp.int32, (Ho, H), 0)
                c = jax.lax.broadcasted_iota(jnp.int32, (Ho, H), 1)
                rsel = (c == stride * r + (kh - pad)).astype(jnp.bfloat16)
                xs = jnp.dot(rsel, xb, preferred_element_type=jnp.float32)
                xs = xs.astype(jnp.bfloat16)                 # exact: entries are bf16 / 0
            acc = acc + jnp.dot(xs, wb_ref[kh],
                                preferred_element_type=jnp.float32)

        y_ref[0] = acc.astype(y_ref.dtype)                   # pre-BN conv output

        # Per-(w, cout) partial batch-norm statistics from the f32 accumulator.
        ssum = jnp.sum(acc, axis=0, keepdims=True)
        ssq = jnp.sum(acc * acc, axis=0, keepdims=True)
        rr = jax.lax.broadcasted_iota(jnp.int32, (2, Wo * Cout), 0)
        stats_ref[0] = jnp.where(rr == 0, ssum, ssq)

    return kernel


def _conv_bn_lrelu_stage(x, scale_t, shift_t, w, *, stride, apply_input_bn):
    N, H, WCin = x.shape
    Cout, Cin, ks, _ = w.shape
    W = WCin // Cin
    pad = (ks - 1) // 2
    Ho = (H + 2 * pad - ks) // stride + 1
    Wo = (W + 2 * pad - ks) // stride + 1

    wb = _band_weights(w, W, Wo, stride)                     # (ks, W*Cin, Wo*Cout)
    kernel = _make_conv_stage_kernel(ks=ks, stride=stride, H=H, Ho=Ho, Wo=Wo,
                                     Cout=Cout, apply_input_bn=apply_input_bn)

    flops = 2 * N * ks * (Ho * H * WCin + Ho * WCin * Wo * Cout)
    bytes_accessed = (x.size * x.dtype.itemsize + wb.size * 2
                      + N * Ho * Wo * Cout * 2 + N * 2 * Wo * Cout * 4 + 2 * WCin * 4)

    y_raw, stats = pl.pallas_call(
        kernel,
        out_shape=(jax.ShapeDtypeStruct((N, Ho, Wo * Cout), jnp.bfloat16),
                   jax.ShapeDtypeStruct((N, 2, Wo * Cout), jnp.float32)),
        grid=(N,),
        in_specs=[
            pl.BlockSpec((1, H, WCin), lambda n: (n, 0, 0)),
            pl.BlockSpec((1, WCin), lambda n: (0, 0)),
            pl.BlockSpec((1, WCin), lambda n: (0, 0)),
            pl.BlockSpec((ks, WCin, Wo * Cout), lambda n: (0, 0, 0)),
        ],
        out_specs=(
            pl.BlockSpec((1, Ho, Wo * Cout), lambda n: (n, 0, 0)),
            pl.BlockSpec((1, 2, Wo * Cout), lambda n: (n, 0, 0)),
        ),
        compiler_params=pltpu.CompilerParams(
            dimension_semantics=("parallel",),               # batch axis -> both v7x TCs
            vmem_limit_bytes=32 * 1024 * 1024),
        cost_estimate=pl.CostEstimate(flops=flops, transcendentals=0,
                                      bytes_accessed=bytes_accessed),
    )(x, scale_t, shift_t, wb)
    return y_raw, stats, Ho, Wo, Cout


# --------------------------------------------------------------------------
# Final standalone BN + LeakyReLU (only the last stage has no next conv to fuse into)
# --------------------------------------------------------------------------
def _bn_lrelu_kernel(y_ref, scale_ref, shift_ref, o_ref):
    z = y_ref[0].astype(jnp.float32) * scale_ref[...] + shift_ref[...]
    o_ref[0] = jnp.where(z >= 0.0, z, _NEG_SLOPE * z).astype(o_ref.dtype)


# --------------------------------------------------------------------------
# Tiny per-stage glue: combine stats, fold train-mode BN into one FMA per channel.
# --------------------------------------------------------------------------
def _fold_bn(stats, gamma, beta, wo, cout, m):
    tot = stats.reshape(stats.shape[0], 2, wo, cout).sum(axis=(0, 2))      # (2, Cout)
    mean = tot[0] / m
    var = jnp.maximum(tot[1] / m - mean * mean, 0.0)    # biased var (PyTorch train BN)
    scale = gamma * jax.lax.rsqrt(var + _EPS)
    shift = beta - mean * scale
    return scale, shift


def _tile_over_w(v, w):
    return jnp.tile(v, w).reshape(1, -1)                # (C,) -> (1, W*C), C fastest


# --------------------------------------------------------------------------
# ConvBlock4 = 8 conv -> BN(train) -> LeakyReLU stages
# --------------------------------------------------------------------------
def _stage_defs(in_ch, int_ch, out_ch):
    # (cin, cout, ks, stride)
    return (
        (in_ch,  int_ch, 1, 1),   # ReductConvBlock 1: reduct 1x1
        (int_ch, out_ch, 3, 1),   # ReductConvBlock 1: conv 3x3
        (out_ch, int_ch, 1, 1),   # ReductConvBlock 2: reduct 1x1
        (int_ch, out_ch, 3, 1),   # ReductConvBlock 2: conv 3x3
        (out_ch, out_ch, 3, 1),   # SimpleConvBlock strd=1
        (out_ch, out_ch, 3, 2),   # SimpleConvBlock strd=2
        (out_ch, out_ch, 3, 1),   # SimpleConvBlock strd=1
        (out_ch, out_ch, 3, 1),   # SimpleConvBlock strd=1
    )


def make_forward(in_ch, int_ch, out_ch):
    defs = _stage_defs(in_ch, int_ch, out_ch)

    @jax.jit
    def forward(x_nchw, params):
        N, _, H, W = x_nchw.shape
        # NCHW -> lane-packed (N, H, W*C) once at the module boundary.
        x = jnp.transpose(x_nchw, (0, 2, 3, 1)).reshape(N, H, W * in_ch)
        h, w_sp, c = H, W, in_ch
        scale_t = jnp.ones((1, w_sp * c), jnp.float32)
        shift_t = jnp.zeros((1, w_sp * c), jnp.float32)
        apply_bn = False                                     # stage 0 eats the raw input

        for (wgt, gamma, beta), (cin, cout, ks, strd) in zip(params, defs):
            assert wgt.shape == (cout, cin, ks, ks)
            x, stats, h, w_sp, c = _conv_bn_lrelu_stage(
                x, scale_t, shift_t, wgt, stride=strd, apply_input_bn=apply_bn)
            scale, shift = _fold_bn(stats, gamma, beta, w_sp, c, N * h * w_sp)
            scale_t = _tile_over_w(scale, w_sp)
            shift_t = _tile_over_w(shift, w_sp)
            apply_bn = True

        out_flat = pl.pallas_call(
            _bn_lrelu_kernel,
            out_shape=jax.ShapeDtypeStruct((N, h, w_sp * c), jnp.float32),
            grid=(N,),
            in_specs=[pl.BlockSpec((1, h, w_sp * c), lambda n: (n, 0, 0)),
                      pl.BlockSpec((1, w_sp * c), lambda n: (0, 0)),
                      pl.BlockSpec((1, w_sp * c), lambda n: (0, 0))],
            out_specs=pl.BlockSpec((1, h, w_sp * c), lambda n: (n, 0, 0)),
            compiler_params=pltpu.CompilerParams(
                dimension_semantics=("parallel",),
                vmem_limit_bytes=32 * 1024 * 1024),
        )(x, scale_t, shift_t)

        out = out_flat.reshape(N, h, w_sp, c)
        return jnp.transpose(out, (0, 3, 1, 2))              # NHWC -> NCHW once

    return defs, forward


def init_params(key, defs):
    params = []
    for (cin, cout, ks, _strd) in defs:
        key, kw = jax.random.split(key)
        fan_in = cin * ks * ks
        w = jax.random.normal(kw, (cout, cin, ks, ks), jnp.float32) / (fan_in ** 0.5)
        gamma = jnp.ones((cout,), jnp.float32)               # BatchNorm2d default init
        beta = jnp.zeros((cout,), jnp.float32)
        # NOTE: the Conv2d bias of the Reduct blocks is omitted on purpose —
        # training-mode BatchNorm subtracts the batch mean, so a constant
        # per-channel bias cancels exactly in the block output.
        params.append((w, gamma, beta))
    return tuple(params)


if __name__ == "__main__":
    key = jax.random.PRNGKey(0)
    k_x, k_p = jax.random.split(key)

    # ConvBlock4 conf: in_ch=4, int_ch=8, out_ch=16 (small deterministic example)
    in_ch, int_ch, out_ch = 4, 8, 16
    N, H, W = 2, 16, 16

    x = jax.random.normal(k_x, (N, in_ch, H, W), dtype=jnp.float32)
    defs, forward = make_forward(in_ch, int_ch, out_ch)
    params = init_params(k_p, defs)

    out = forward(x, params)
    jax.block_until_ready(out)

    # one stride-2 stage => spatial /2 ; channels = out_ch
    assert out.shape == (N, out_ch, H // 2, W // 2), out.shape
    assert bool(jnp.all(jnp.isfinite(out)))
    print("KERNEL_OK")
</pallas_src>

<mosaic_0001>
module attributes {stable_mosaic.version = 11 : i64} {
  func.func @kernel(%arg0: i32, %arg1: memref<1x16x64xf32, #tpu.memory_space<vmem>>, %arg2: memref<1x64xf32, #tpu.memory_space<vmem>>, %arg3: memref<1x64xf32, #tpu.memory_space<vmem>>, %arg4: memref<1x64x128xbf16, #tpu.memory_space<vmem>>, %arg5: memref<1x16x128xbf16, #tpu.memory_space<vmem>>, %arg6: memref<1x2x128xf32, #tpu.memory_space<vmem>>) attributes {dimension_semantics = [#tpu.dimension_semantics<parallel>], iteration_bounds = array<i64: 2>, scalar_prefetch = 0 : i64, scratch_operands = 0 : i64, tpu.core_type = #tpu.core_type<tc>, window_params = [{transform_indices = @transform_0, window_bounds = array<i64: 1, 16, 64>}, {pipeline_mode = #tpu.pipeline_mode<synchronous>, transform_indices = @transform_1, window_bounds = array<i64: 1, 64>}, {pipeline_mode = #tpu.pipeline_mode<synchronous>, transform_indices = @transform_2, window_bounds = array<i64: 1, 64>}, {pipeline_mode = #tpu.pipeline_mode<synchronous>, transform_indices = @transform_3, window_bounds = array<i64: 1, 64, 128>}, {transform_indices = @transform_4, window_bounds = array<i64: 1, 16, 128>}, {transform_indices = @transform_5, window_bounds = array<i64: 1, 2, 128>}]} {
    %c0 = arith.constant 0 : index
    %c0_0 = arith.constant 0 : index
    %c0_1 = arith.constant 0 : index
    %0 = vector.load %arg1[%c0, %c0_0, %c0_1] : memref<1x16x64xf32, #tpu.memory_space<vmem>>, vector<1x16x64xf32>
    %1 = vector.shape_cast %0 : vector<1x16x64xf32> to vector<16x64xf32>
    %2 = arith.truncf %1 : vector<16x64xf32> to vector<16x64xbf16>
    %cst = arith.constant 0.000000e+00 : f32
    %3 = vector.broadcast %cst : f32 to vector<16x128xf32>
    %c0_2 = arith.constant 0 : index
    %c0_3 = arith.constant 0 : index
    %c0_4 = arith.constant 0 : index
    %4 = vector.load %arg4[%c0_2, %c0_3, %c0_4] : memref<1x64x128xbf16, #tpu.memory_space<vmem>>, vector<1x64x128xbf16>
    %5 = vector.shape_cast %4 : vector<1x64x128xbf16> to vector<64x128xbf16>
    %cst_5 = arith.constant dense<0.000000e+00> : vector<16x128xf32>
    %6 = tpu.matmul %2, %5, %cst_5 {dimension_numbers = #tpu.dot_dimension_numbers<[1], [0], [0], [1], [0, 0, 1, 1], [], []>} : vector<16x64xbf16>, vector<64x128xbf16>, vector<16x128xf32> -> vector<16x128xf32>
    %7 = arith.addf %3, %6 : vector<16x128xf32>
    %8 = arith.truncf %7 : vector<16x128xf32> to vector<16x128xbf16>
    %c0_6 = arith.constant 0 : index
    %c0_7 = arith.constant 0 : index
    %c0_8 = arith.constant 0 : index
    %9 = vector.load %arg5[%c0_6, %c0_7, %c0_8] : memref<1x16x128xbf16, #tpu.memory_space<vmem>>, vector<1x16x128xbf16>
    %10 = vector.shape_cast %9 : vector<1x16x128xbf16> to vector<16x128xbf16>
    %11 = vector.shape_cast %8 : vector<16x128xbf16> to vector<1x16x128xbf16>
    tpu.vector_store %arg5[%c0_6, %c0_7, %c0_8], %11 {strides = array<i32>} : memref<1x16x128xbf16, #tpu.memory_space<vmem>>, vector<1x16x128xbf16>,
    %cst_9 = arith.constant dense<0.000000e+00> : vector<128xf32>
    %12 = vector.multi_reduction <add>, %7, %cst_9 [0] : vector<16x128xf32> to vector<128xf32>
    %13 = vector.shape_cast %12 : vector<128xf32> to vector<1x128xf32>
    %14 = arith.mulf %7, %7 : vector<16x128xf32>
    %cst_10 = arith.constant dense<0.000000e+00> : vector<128xf32>
    %15 = vector.multi_reduction <add>, %14, %cst_10 [0] : vector<16x128xf32> to vector<128xf32>
    %16 = vector.shape_cast %15 : vector<128xf32> to vector<1x128xf32>
    %17 = tpu.iota {dimensions = array<i32: 0>} : vector<2x128xi32>
    %c0_i32 = arith.constant 0 : i32
    %18 = vector.broadcast %c0_i32 : i32 to vector<2x128xi32>
    %19 = arith.cmpi eq, %17, %18 : vector<2x128xi32>
    %20 = vector.shape_cast %13 : vector<1x128xf32> to vector<1x128xf32>
    %21 = vector.broadcast %20 : vector<1x128xf32> to vector<2x128xf32>
    %22 = vector.shape_cast %16 : vector<1x128xf32> to vector<1x128xf32>
    %23 = vector.broadcast %22 : vector<1x128xf32> to vector<2x128xf32>
    %24 = arith.select %19, %21, %23 : vector<2x128xi1>, vector<2x128xf32>
    %c0_11 = arith.constant 0 : index
    %c0_12 = arith.constant 0 : index
    %c0_13 = arith.constant 0 : index
    %25 = vector.load %arg6[%c0_11, %c0_12, %c0_13] : memref<1x2x128xf32, #tpu.memory_space<vmem>>, vector<1x2x128xf32>
    %26 = vector.shape_cast %25 : vector<1x2x128xf32> to vector<2x128xf32>
    %27 = vector.shape_cast %24 : vector<2x128xf32> to vector<1x2x128xf32>
    tpu.vector_store %arg6[%c0_11, %c0_12, %c0_13], %27 {strides = array<i32>} : memref<1x2x128xf32, #tpu.memory_space<vmem>>, vector<1x2x128xf32>,
    return
  }
  func.func @transform_0(%arg0: i32) -> (i32, i32, i32) {
    %c0_i32 = arith.constant 0 : i32
    %c0_i32_0 = arith.constant 0 : i32
    %c0_i32_1 = arith.constant 0 : i32
    return %arg0, %c0_i32, %c0_i32_0 : i32, i32, i32
  }
  func.func @transform_1(%arg0: i32) -> (i32, i32) {
    %c0_i32 = arith.constant 0 : i32
    %c0_i32_0 = arith.constant 0 : i32
    %c0_i32_1 = arith.constant 0 : i32
    return %c0_i32, %c0_i32_0 : i32, i32
  }
  func.func @transform_2(%arg0: i32) -> (i32, i32) {
    %c0_i32 = arith.constant 0 : i32
    %c0_i32_0 = arith.constant 0 : i32
    %c0_i32_1 = arith.constant 0 : i32
    return %c0_i32, %c0_i32_0 : i32, i32
  }
  func.func @transform_3(%arg0: i32) -> (i32, i32, i32) {
    %c0_i32 = arith.constant 0 : i32
    %c0_i32_0 = arith.constant 0 : i32
    %c0_i32_1 = arith.constant 0 : i32
    %c0_i32_2 = arith.constant 0 : i32
    return %c0_i32, %c0_i32_0, %c0_i32_1 : i32, i32, i32
  }
  func.func @transform_4(%arg0: i32) -> (i32, i32, i32) {
    %c0_i32 = arith.constant 0 : i32
    %c0_i32_0 = arith.constant 0 : i32
    %c0_i32_1 = arith.constant 0 : i32
    return %arg0, %c0_i32, %c0_i32_0 : i32, i32, i32
  }
  func.func @transform_5(%arg0: i32) -> (i32, i32, i32) {
    %c0_i32 = arith.constant 0 : i32
    %c0_i32_0 = arith.constant 0 : i32
    %c0_i32_1 = arith.constant 0 : i32
    return %arg0, %c0_i32, %c0_i32_0 : i32, i32, i32
  }
}

module attributes {stable_mosaic.version = 11 : i64} {
  func.func @kernel(%arg0: i32, %arg1: memref<1x16x128xbf16, #tpu.memory_space<vmem>>, %arg2: memref<1x128xf32, #tpu.memory_space<vmem>>, %arg3: memref<1x128xf32, #tpu.memory_space<vmem>>, %arg4: memref<3x128x256xbf16, #tpu.memory_space<vmem>>, %arg5: memref<1x16x256xbf16, #tpu.memory_space<vmem>>, %arg6: memref<1x2x256xf32, #tpu.memory_space<vmem>>) attributes {dimension_semantics = [#tpu.dimension_semantics<parallel>], iteration_bounds = array<i64: 2>, scalar_prefetch = 0 : i64, scratch_operands = 0 : i64, tpu.core_type = #tpu.core_type<tc>, window_params = [{transform_indices = @transform_0, window_bounds = array<i64: 1, 16, 128>}, {pipeline_mode = #tpu.pipeline_mode<synchronous>, transform_indices = @transform_1, window_bounds = array<i64: 1, 128>}, {pipeline_mode = #tpu.pipeline_mode<synchronous>, transform_indices = @transform_2, window_bounds = array<i64: 1, 128>}, {pipeline_mode = #tpu.pipeline_mode<synchronous>, transform_indices = @transform_3, window_bounds = array<i64: 3, 128, 256>}, {transform_indices = @transform_4, window_bounds = array<i64: 1, 16, 256>}, {transform_indices = @transform_5, window_bounds = array<i64: 1, 2, 256>}]} {
    %c0 = arith.constant 0 : index
    %c0_0 = arith.constant 0 : index
    %c0_1 = arith.constant 0 : index
    %0 = vector.load %arg1[%c0, %c0_0, %c0_1] : memref<1x16x128xbf16, #tpu.memory_space<vmem>>, vector<1x16x128xbf16>
    %1 = vector.shape_cast %0 : vector<1x16x128xbf16> to vector<16x128xbf16>
    %2 = arith.extf %1 : vector<16x128xbf16> to vector<16x128xf32>
    %c0_2 = arith.constant 0 : index
    %c0_3 = arith.constant 0 : index
    %3 = vector.load %arg2[%c0_2, %c0_3] : memref<1x128xf32, #tpu.memory_space<vmem>>, vector<1x128xf32>
    %4 = vector.broadcast %3 : vector<1x128xf32> to vector<16x128xf32>
    %5 = arith.mulf %2, %4 : vector<16x128xf32>
    %c0_4 = arith.constant 0 : index
    %c0_5 = arith.constant 0 : index
    %6 = vector.load %arg3[%c0_4, %c0_5] : memref<1x128xf32, #tpu.memory_space<vmem>>, vector<1x128xf32>
    %7 = vector.broadcast %6 : vector<1x128xf32> to vector<16x128xf32>
    %8 = arith.addf %5, %7 : vector<16x128xf32>
    %cst = arith.constant 0.000000e+00 : f32
    %9 = vector.broadcast %cst : f32 to vector<16x128xf32>
    %10 = arith.cmpf oge, %8, %9 : vector<16x128xf32>
    %cst_6 = arith.constant 1.000000e-01 : f32
    %11 = vector.broadcast %cst_6 : f32 to vector<16x128xf32>
    %12 = arith.mulf %11, %8 : vector<16x128xf32>
    %13 = arith.select %10, %8, %12 : vector<16x128xi1>, vector<16x128xf32>
    %14 = arith.truncf %13 : vector<16x128xf32> to vector<16x128xbf16>
    %cst_7 = arith.constant 0.000000e+00 : f32
    %15 = vector.broadcast %cst_7 : f32 to vector<16x256xf32>
    %16 = tpu.iota {dimensions = array<i32: 0>} : vector<16x16xi32>
    %17 = tpu.iota {dimensions = array<i32: 1>} : vector<16x16xi32>
    %c1_i32 = arith.constant 1 : i32
    %18 = vector.broadcast %c1_i32 : i32 to vector<16x16xi32>
    %19 = arith.muli %18, %16 : vector<16x16xi32>
    %c-1_i32 = arith.constant -1 : i32
    %20 = vector.broadcast %c-1_i32 : i32 to vector<16x16xi32>
    %21 = arith.addi %19, %20 : vector<16x16xi32>
    %22 = arith.cmpi eq, %17, %21 : vector<16x16xi32>
    %23 = arith.extui %22 : vector<16x16xi1> to vector<16x16xi32>
    %24 = arith.sitofp %23 : vector<16x16xi32> to vector<16x16xf32>
    %25 = arith.truncf %24 : vector<16x16xf32> to vector<16x16xbf16>
    %cst_8 = arith.constant dense<0.000000e+00> : vector<16x128xf32>
    %26 = tpu.matmul %25, %14, %cst_8 {dimension_numbers = #tpu.dot_dimension_numbers<[1], [0], [0], [1], [0, 0, 1, 1], [], []>} : vector<16x16xbf16>, vector<16x128xbf16>, vector<16x128xf32> -> vector<16x128xf32>
    %27 = arith.truncf %26 : vector<16x128xf32> to vector<16x128xbf16>
    %c0_9 = arith.constant 0 : index
    %c0_10 = arith.constant 0 : index
    %c0_11 = arith.constant 0 : index
    %28 = vector.load %arg4[%c0_9, %c0_10, %c0_11] : memref<3x128x256xbf16, #tpu.memory_space<vmem>>, vector<1x128x256xbf16>
    %29 = vector.shape_cast %28 : vector<1x128x256xbf16> to vector<128x256xbf16>
    %cst_12 = arith.constant dense<0.000000e+00> : vector<16x256xf32>
    %30 = tpu.matmul %27, %29, %cst_12 {dimension_numbers = #tpu.dot_dimension_numbers<[1], [0], [0], [1], [0, 0, 1, 1], [], []>} : vector<16x128xbf16>, vector<128x256xbf16>, vector<16x256xf32> -> vector<16x256xf32>
    %31 = arith.addf %15, %30 : vector<16x256xf32>
    %32 = tpu.iota {dimensions = array<i32: 0>} : vector<16x16xi32>
    %33 = tpu.iota {dimensions = array<i32: 1>} : vector<16x16xi32>
    %c1_i32_13 = arith.constant 1 : i32
    %34 = vector.broadcast %c1_i32_13 : i32 to vector<16x16xi32>
    %35 = arith.muli %34, %32 : vector<16x16xi32>
    %c0_i32 = arith.constant 0 : i32
    %36 = vector.broadcast %c0_i32 : i32 to vector<16x16xi32>
    %37 = arith.addi %35, %36 : vector<16x16xi32>
    %38 = arith.cmpi eq, %33, %37 : vector<16x16xi32>
    %39 = arith.extui %38 : vector<16x16xi1> to vector<16x16xi32>
    %40 = arith.sitofp %39 : vector<16x16xi32> to vector<16x16xf32>
    %41 = arith.truncf %40 : vector<16x16xf32> to vector<16x16xbf16>
    %cst_14 = arith.constant dense<0.000000e+00> : vector<16x128xf32>
    %42 = tpu.matmul %41, %14, %cst_14 {dimension_numbers = #tpu.dot_dimension_numbers<[1], [0], [0], [1], [0, 0, 1, 1], [], []>} : vector<16x16xbf16>, vector<16x128xbf16>, vector<16x128xf32> -> vector<16x128xf32>
    %43 = arith.truncf %42 : vector<16x128xf32> to vector<16x128xbf16>
    %c1 = arith.constant 1 : index
    %c0_15 = arith.constant 0 : index
    %c0_16 = arith.constant 0 : index
    %44 = vector.load %arg4[%c1, %c0_15, %c0_16] : memref<3x128x256xbf16, #tpu.memory_space<vmem>>, vector<1x128x256xbf16>
    %45 = vector.shape_cast %44 : vector<1x128x256xbf16> to vector<128x256xbf16>
    %cst_17 = arith.constant dense<0.000000e+00> : vector<16x256xf32>
    %46 = tpu.matmul %43, %45, %cst_17 {dimension_numbers = #tpu.dot_dimension_numbers<[1], [0], [0], [1], [0, 0, 1, 1], [], []>} : vector<16x128xbf16>, vector<128x256xbf16>, vector<16x256xf32> -> vector<16x256xf32>
    %47 = arith.addf %31, %46 : vector<16x256xf32>
    %48 = tpu.iota {dimensions = array<i32: 0>} : vector<16x16xi32>
    %49 = tpu.iota {dimensions = array<i32: 1>} : vector<16x16xi32>
    %c1_i32_18 = arith.constant 1 : i32
    %50 = vector.broadcast %c1_i32_18 : i32 to vector<16x16xi32>
    %51 = arith.muli %50, %48 : vector<16x16xi32>
    %c1_i32_19 = arith.constant 1 : i32
    %52 = vector.broadcast %c1_i32_19 : i32 to vector<16x16xi32>
    %53 = arith.addi %51, %52 : vector<16x16xi32>
    %54 = arith.cmpi eq, %49, %53 : vector<16x16xi32>
    %55 = arith.extui %54 : vector<16x16xi1> to vector<16x16xi32>
    %56 = arith.sitofp %55 : vector<16x16xi32> to vector<16x16xf32>
    %57 = arith.truncf %56 : vector<16x16xf32> to vector<16x16xbf16>
    %cst_20 = arith.constant dense<0.000000e+00> : vector<16x128xf32>
    %58 = tpu.matmul %57, %14, %cst_20 {dimension_numbers = #tpu.dot_dimension_numbers<[1], [0], [0], [1], [0, 0, 1, 1], [], []>} : vector<16x16xbf16>, vector<16x128xbf16>, vector<16x128xf32> -> vector<16x128xf32>
    %59 = arith.truncf %58 : vector<16x128xf32> to vector<16x128xbf16>
    %c2 = arith.constant 2 : index
    %c0_21 = arith.constant 0 : index
    %c0_22 = arith.constant 0 : index
    %60 = vector.load %arg4[%c2, %c0_21, %c0_22] : memref<3x128x256xbf16, #tpu.memory_space<vmem>>, vector<1x128x256xbf16>
    %61 = vector.shape_cast %60 : vector<1x128x256xbf16> to vector<128x256xbf16>
    %cst_23 = arith.constant dense<0.000000e+00> : vector<16x256xf32>
    %62 = tpu.matmul %59, %61, %cst_23 {dimension_numbers = #tpu.dot_dimension_numbers<[1], [0], [0], [1], [0, 0, 1, 1], [], []>} : vector<16x128xbf16>, vector<128x256xbf16>, vector<16x256xf32> -> vector<16x256xf32>
    %63 = arith.addf %47, %62 : vector<16x256xf32>
    %64 = arith.truncf %63 : vector<16x256xf32> to vector<16x256xbf16>
    %c0_24 = arith.constant 0 : index
    %c0_25 = arith.constant 0 : index
    %c0_26 = arith.constant 0 : index
    %65 = vector.load %arg5[%c0_24, %c0_25, %c0_26] : memref<1x16x256xbf16, #tpu.memory_space<vmem>>, vector<1x16x256xbf16>
    %66 = vector.shape_cast %65 : vector<1x16x256xbf16> to vector<16x256xbf16>
    %67 = vector.shape_cast %64 : vector<16x256xbf16> to vector<1x16x256xbf16>
    tpu.vector_store %arg5[%c0_24, %c0_25, %c0_26], %67 {strides = array<i32>} : memref<1x16x256xbf16, #tpu.memory_space<vmem>>, vector<1x16x256xbf16>,
    %cst_27 = arith.constant dense<0.000000e+00> : vector<256xf32>
    %68 = vector.multi_reduction <add>, %63, %cst_27 [0] : vector<16x256xf32> to vector<256xf32>
    %69 = vector.shape_cast %68 : vector<256xf32> to vector<1x256xf32>
    %70 = arith.mulf %63, %63 : vector<16x256xf32>
    %cst_28 = arith.constant dense<0.000000e+00> : vector<256xf32>
    %71 = vector.multi_reduction <add>, %70, %cst_28 [0] : vector<16x256xf32> to vector<256xf32>
    %72 = vector.shape_cast %71 : vector<256xf32> to vector<1x256xf32>
    %73 = tpu.iota {dimensions = array<i32: 0>} : vector<2x256xi32>
    %c0_i32_29 = arith.constant 0 : i32
    %74 = vector.broadcast %c0_i32_29 : i32 to vector<2x256xi32>
    %75 = arith.cmpi eq, %73, %74 : vector<2x256xi32>
    %76 = vector.shape_cast %69 : vector<1x256xf32> to vector<1x256xf32>
    %77 = vector.broadcast %76 : vector<1x256xf32> to vector<2x256xf32>
    %78 = vector.shape_cast %72 : vector<1x256xf32> to vector<1x256xf32>
    %79 = vector.broadcast %78 : vector<1x256xf32> to vector<2x256xf32>
    %80 = arith.select %75, %77, %79 : vector<2x256xi1>, vector<2x256xf32>
    %c0_30 = arith.constant 0 : index
    %c0_31 = arith.constant 0 : index
    %c0_32 = arith.constant 0 : index
    %81 = vector.load %arg6[%c0_30, %c0_31, %c0_32] : memref<1x2x256xf32, #tpu.memory_space<vmem>>, vector<1x2x256xf32>
    %82 = vector.shape_cast %81 : vector<1x2x256xf32> to vector<2x256xf32>
    %83 = vector.shape_cast %80 : vector<2x256xf32> to vector<1x2x256xf32>
    tpu.vector_store %arg6[%c0_30, %c0_31, %c0_32], %83 {strides = array<i32>} : memref<1x2x256xf32, #tpu.memory_space<vmem>>, vector<1x2x256xf32>,
    return
  }
  func.func @transform_0(%arg0: i32) -> (i32, i32, i32) {
    %c0_i32 = arith.constant 0 : i32
    %c0_i32_0 = arith.constant 0 : i32
    %c0_i32_1 = arith.constant 0 : i32
    return %arg0, %c0_i32, %c0_i32_0 : i32, i32, i32
  }
  func.func @transform_1(%arg0: i32) -> (i32, i32) {
    %c0_i32 = arith.constant 0 : i32
    %c0_i32_0 = arith.constant 0 : i32
    %c0_i32_1 = arith.constant 0 : i32
    return %c0_i32, %c0_i32_0 : i32, i32
  }
  func.func @transform_2(%arg0: i32) -> (i32, i32) {
    %c0_i32 = arith.constant 0 : i32
    %c0_i32_0 = arith.constant 0 : i32
    %c0_i32_1 = arith.constant 0 : i32
    return %c0_i32, %c0_i32_0 : i32, i32
  }
  func.func @transform_3(%arg0: i32) -> (i32, i32, i32) {
    %c0_i32 = arith.constant 0 : i32
    %c0_i32_0 = arith.constant 0 : i32
    %c0_i32_1 = arith.constant 0 : i32
    %c0_i32_2 = arith.constant 0 : i32
    return %c0_i32, %c0_i32_0, %c0_i32_1 : i32, i32, i32
  }
  func.func @transform_4(%arg0: i32) -> (i32, i32, i32) {
    %c0_i32 = arith.constant 0 : i32
    %c0_i32_0 = arith.constant 0 : i32
    %c0_i32_1 = arith.constant 0 : i32
    return %arg0, %c0_i32, %c0_i32_0 : i32, i32, i32
  }
  func.func @transform_5(%arg0: i32) -> (i32, i32, i32) {
    %c0_i32 = arith.constant 0 : i32
    %c0_i32_0 = arith.constant 0 : i32
    %c0_i32_1 = arith.constant 0 : i32
    return %arg0, %c0_i32, %c0_i32_0 : i32, i32, i32
  }
}

module attributes {stable_mosaic.version = 11 : i64} {
  func.func @kernel(%arg0: i32, %arg1: memref<1x16x256xbf16, #tpu.memory_space<vmem>>, %arg2: memref<1x256xf32, #tpu.memory_space<vmem>>, %arg3: memref<1x256xf32, #tpu.memory_space<vmem>>, %arg4: memref<1x256x128xbf16, #tpu.memory_space<vmem>>, %arg5: memref<1x16x128xbf16, #tpu.memory_space<vmem>>, %arg6: memref<1x2x128xf32, #tpu.memory_space<vmem>>) attributes {dimension_semantics = [#tpu.dimension_semantics<parallel>], iteration_bounds = array<i64: 2>, scalar_prefetch = 0 : i64, scratch_operands = 0 : i64, tpu.core_type = #tpu.core_type<tc>, window_params = [{transform_indices = @transform_0, window_bounds = array<i64: 1, 16, 256>}, {pipeline_mode = #tpu.pipeline_mode<synchronous>, transform_indices = @transform_1, window_bounds = array<i64: 1, 256>}, {pipeline_mode = #tpu.pipeline_mode<synchronous>, transform_indices = @transform_2, window_bounds = array<i64: 1, 256>}, {pipeline_mode = #tpu.pipeline_mode<synchronous>, transform_indices = @transform_3, window_bounds = array<i64: 1, 256, 128>}, {transform_indices = @transform_4, window_bounds = array<i64: 1, 16, 128>}, {transform_indices = @transform_5, window_bounds = array<i64: 1, 2, 128>}]} {
    %c0 = arith.constant 0 : index
    %c0_0 = arith.constant 0 : index
    %c0_1 = arith.constant 0 : index
    %0 = vector.load %arg1[%c0, %c0_0, %c0_1] : memref<1x16x256xbf16, #tpu.memory_space<vmem>>, vector<1x16x256xbf16>
    %1 = vector.shape_cast %0 : vector<1x16x256xbf16> to vector<16x256xbf16>
    %2 = arith.extf %1 : vector<16x256xbf16> to vector<16x256xf32>
    %c0_2 = arith.constant 0 : index
    %c0_3 = arith.constant 0 : index
    %3 = vector.load %arg2[%c0_2, %c0_3] : memref<1x256xf32, #tpu.memory_space<vmem>>, vector<1x256xf32>
    %4 = vector.broadcast %3 : vector<1x256xf32> to vector<16x256xf32>
    %5 = arith.mulf %2, %4 : vector<16x256xf32>
    %c0_4 = arith.constant 0 : index
    %c0_5 = arith.constant 0 : index
    %6 = vector.load %arg3[%c0_4, %c0_5] : memref<1x256xf32, #tpu.memory_space<vmem>>, vector<1x256xf32>
    %7 = vector.broadcast %6 : vector<1x256xf32> to vector<16x256xf32>
    %8 = arith.addf %5, %7 : vector<16x256xf32>
    %cst = arith.constant 0.000000e+00 : f32
    %9 = vector.broadcast %cst : f32 to vector<16x256xf32>
    %10 = arith.cmpf oge, %8, %9 : vector<16x256xf32>
    %cst_6 = arith.constant 1.000000e-01 : f32
    %11 = vector.broadcast %cst_6 : f32 to vector<16x256xf32>
    %12 = arith.mulf %11, %8 : vector<16x256xf32>
    %13 = arith.select %10, %8, %12 : vector<16x256xi1>, vector<16x256xf32>
    %14 = arith.truncf %13 : vector<16x256xf32> to vector<16x256xbf16>
    %cst_7 = arith.constant 0.000000e+00 : f32
    %15 = vector.broadcast %cst_7 : f32 to vector<16x128xf32>
    %c0_8 = arith.constant 0 : index
    %c0_9 = arith.constant 0 : index
    %c0_10 = arith.constant 0 : index
    %16 = vector.load %arg4[%c0_8, %c0_9, %c0_10] : memref<1x256x128xbf16, #tpu.memory_space<vmem>>, vector<1x256x128xbf16>
    %17 = vector.shape_cast %16 : vector<1x256x128xbf16> to vector<256x128xbf16>
    %cst_11 = arith.constant dense<0.000000e+00> : vector<16x128xf32>
    %18 = tpu.matmul %14, %17, %cst_11 {dimension_numbers = #tpu.dot_dimension_numbers<[1], [0], [0], [1], [0, 0, 1, 1], [], []>} : vector<16x256xbf16>, vector<256x128xbf16>, vector<16x128xf32> -> vector<16x128xf32>
    %19 = arith.addf %15, %18 : vector<16x128xf32>
    %20 = arith.truncf %19 : vector<16x128xf32> to vector<16x128xbf16>
    %c0_12 = arith.constant 0 : index
    %c0_13 = arith.constant 0 : index
    %c0_14 = arith.constant 0 : index
    %21 = vector.load %arg5[%c0_12, %c0_13, %c0_14] : memref<1x16x128xbf16, #tpu.memory_space<vmem>>, vector<1x16x128xbf16>
    %22 = vector.shape_cast %21 : vector<1x16x128xbf16> to vector<16x128xbf16>
    %23 = vector.shape_cast %20 : vector<16x128xbf16> to vector<1x16x128xbf16>
    tpu.vector_store %arg5[%c0_12, %c0_13, %c0_14], %23 {strides = array<i32>} : memref<1x16x128xbf16, #tpu.memory_space<vmem>>, vector<1x16x128xbf16>,
    %cst_15 = arith.constant dense<0.000000e+00> : vector<128xf32>
    %24 = vector.multi_reduction <add>, %19, %cst_15 [0] : vector<16x128xf32> to vector<128xf32>
    %25 = vector.shape_cast %24 : vector<128xf32> to vector<1x128xf32>
    %26 = arith.mulf %19, %19 : vector<16x128xf32>
    %cst_16 = arith.constant dense<0.000000e+00> : vector<128xf32>
    %27 = vector.multi_reduction <add>, %26, %cst_16 [0] : vector<16x128xf32> to vector<128xf32>
    %28 = vector.shape_cast %27 : vector<128xf32> to vector<1x128xf32>
    %29 = tpu.iota {dimensions = array<i32: 0>} : vector<2x128xi32>
    %c0_i32 = arith.constant 0 : i32
    %30 = vector.broadcast %c0_i32 : i32 to vector<2x128xi32>
    %31 = arith.cmpi eq, %29, %30 : vector<2x128xi32>
    %32 = vector.shape_cast %25 : vector<1x128xf32> to vector<1x128xf32>
    %33 = vector.broadcast %32 : vector<1x128xf32> to vector<2x128xf32>
    %34 = vector.shape_cast %28 : vector<1x128xf32> to vector<1x128xf32>
    %35 = vector.broadcast %34 : vector<1x128xf32> to vector<2x128xf32>
    %36 = arith.select %31, %33, %35 : vector<2x128xi1>, vector<2x128xf32>
    %c0_17 = arith.constant 0 : index
    %c0_18 = arith.constant 0 : index
    %c0_19 = arith.constant 0 : index
    %37 = vector.load %arg6[%c0_17, %c0_18, %c0_19] : memref<1x2x128xf32, #tpu.memory_space<vmem>>, vector<1x2x128xf32>
    %38 = vector.shape_cast %37 : vector<1x2x128xf32> to vector<2x128xf32>
    %39 = vector.shape_cast %36 : vector<2x128xf32> to vector<1x2x128xf32>
    tpu.vector_store %arg6[%c0_17, %c0_18, %c0_19], %39 {strides = array<i32>} : memref<1x2x128xf32, #tpu.memory_space<vmem>>, vector<1x2x128xf32>,
    return
  }
  func.func @transform_0(%arg0: i32) -> (i32, i32, i32) {
    %c0_i32 = arith.constant 0 : i32
    %c0_i32_0 = arith.constant 0 : i32
    %c0_i32_1 = arith.constant 0 : i32
    return %arg0, %c0_i32, %c0_i32_0 : i32, i32, i32
  }
  func.func @transform_1(%arg0: i32) -> (i32, i32) {
    %c0_i32 = arith.constant 0 : i32
    %c0_i32_0 = arith.constant 0 : i32
    %c0_i32_1 = arith.constant 0 : i32
    return %c0_i32, %c0_i32_0 : i32, i32
  }
  func.func @transform_2(%arg0: i32) -> (i32, i32) {
    %c0_i32 = arith.constant 0 : i32
    %c0_i32_0 = arith.constant 0 : i32
    %c0_i32_1 = arith.constant 0 : i32
    return %c0_i32, %c0_i32_0 : i32, i32
  }
  func.func @transform_3(%arg0: i32) -> (i32, i32, i32) {
    %c0_i32 = arith.constant 0 : i32
    %c0_i32_0 = arith.constant 0 : i32
    %c0_i32_1 = arith.constant 0 : i32
    %c0_i32_2 = arith.constant 0 : i32
    return %c0_i32, %c0_i32_0, %c0_i32_1 : i32, i32, i32
  }
  func.func @transform_4(%arg0: i32) -> (i32, i32, i32) {
    %c0_i32 = arith.constant 0 : i32
    %c0_i32_0 = arith.constant 0 : i32
    %c0_i32_1 = arith.constant 0 : i32
    return %arg0, %c0_i32, %c0_i32_0 : i32, i32, i32
  }
  func.func @transform_5(%arg0: i32) -> (i32, i32, i32) {
    %c0_i32 = arith.constant 0 : i32
    %c0_i32_0 = arith.constant 0 : i32
    %c0_i32_1 = arith.constant 0 : i32
    return %arg0, %c0_i32, %c0_i32_0 : i32, i32, i32
  }
}

module attributes {stable_mosaic.version = 11 : i64} {
  func.func @kernel(%arg0: i32, %arg1: memref<1x16x256xbf16, #tpu.memory_space<vmem>>, %arg2: memref<1x256xf32, #tpu.memory_space<vmem>>, %arg3: memref<1x256xf32, #tpu.memory_space<vmem>>, %arg4: memref<3x256x256xbf16, #tpu.memory_space<vmem>>, %arg5: memref<1x16x256xbf16, #tpu.memory_space<vmem>>, %arg6: memref<1x2x256xf32, #tpu.memory_space<vmem>>) attributes {dimension_semantics = [#tpu.dimension_semantics<parallel>], iteration_bounds = array<i64: 2>, scalar_prefetch = 0 : i64, scratch_operands = 0 : i64, tpu.core_type = #tpu.core_type<tc>, window_params = [{transform_indices = @transform_0, window_bounds = array<i64: 1, 16, 256>}, {pipeline_mode = #tpu.pipeline_mode<synchronous>, transform_indices = @transform_1, window_bounds = array<i64: 1, 256>}, {pipeline_mode = #tpu.pipeline_mode<synchronous>, transform_indices = @transform_2, window_bounds = array<i64: 1, 256>}, {pipeline_mode = #tpu.pipeline_mode<synchronous>, transform_indices = @transform_3, window_bounds = array<i64: 3, 256, 256>}, {transform_indices = @transform_4, window_bounds = array<i64: 1, 16, 256>}, {transform_indices = @transform_5, window_bounds = array<i64: 1, 2, 256>}]} {
    %c0 = arith.constant 0 : index
    %c0_0 = arith.constant 0 : index
    %c0_1 = arith.constant 0 : index
    %0 = vector.load %arg1[%c0, %c0_0, %c0_1] : memref<1x16x256xbf16, #tpu.memory_space<vmem>>, vector<1x16x256xbf16>
    %1 = vector.shape_cast %0 : vector<1x16x256xbf16> to vector<16x256xbf16>
    %2 = arith.extf %1 : vector<16x256xbf16> to vector<16x256xf32>
    %c0_2 = arith.constant 0 : index
    %c0_3 = arith.constant 0 : index
    %3 = vector.load %arg2[%c0_2, %c0_3] : memref<1x256xf32, #tpu.memory_space<vmem>>, vector<1x256xf32>
    %4 = vector.broadcast %3 : vector<1x256xf32> to vector<16x256xf32>
    %5 = arith.mulf %2, %4 : vector<16x256xf32>
    %c0_4 = arith.constant 0 : index
    %c0_5 = arith.constant 0 : index
    %6 = vector.load %arg3[%c0_4, %c0_5] : memref<1x256xf32, #tpu.memory_space<vmem>>, vector<1x256xf32>
    %7 = vector.broadcast %6 : vector<1x256xf32> to vector<16x256xf32>
    %8 = arith.addf %5, %7 : vector<16x256xf32>
    %cst = arith.constant 0.000000e+00 : f32
    %9 = vector.broadcast %cst : f32 to vector<16x256xf32>
    %10 = arith.cmpf oge, %8, %9 : vector<16x256xf32>
    %cst_6 = arith.constant 1.000000e-01 : f32
    %11 = vector.broadcast %cst_6 : f32 to vector<16x256xf32>
    %12 = arith.mulf %11, %8 : vector<16x256xf32>
    %13 = arith.select %10, %8, %12 : vector<16x256xi1>, vector<16x256xf32>
    %14 = arith.truncf %13 : vector<16x256xf32> to vector<16x256xbf16>
    %cst_7 = arith.constant 0.000000e+00 : f32
    %15 = vector.broadcast %cst_7 : f32 to vector<16x256xf32>
    %16 = tpu.iota {dimensions = array<i32: 0>} : vector<16x16xi32>
    %17 = tpu.iota {dimensions = array<i32: 1>} : vector<16x16xi32>
    %c1_i32 = arith.constant 1 : i32
    %18 = vector.broadcast %c1_i32 : i32 to vector<16x16xi32>
    %19 = arith.muli %18, %16 : vector<16x16xi32>
    %c-1_i32 = arith.constant -1 : i32
    %20 = vector.broadcast %c-1_i32 : i32 to vector<16x16xi32>
    %21 = arith.addi %19, %20 : vector<16x16xi32>
    %22 = arith.cmpi eq, %17, %21 : vector<16x16xi32>
    %23 = arith.extui %22 : vector<16x16xi1> to vector<16x16xi32>
    %24 = arith.sitofp %23 : vector<16x16xi32> to vector<16x16xf32>
    %25 = arith.truncf %24 : vector<16x16xf32> to vector<16x16xbf16>
    %cst_8 = arith.constant dense<0.000000e+00> : vector<16x256xf32>
    %26 = tpu.matmul %25, %14, %cst_8 {dimension_numbers = #tpu.dot_dimension_numbers<[1], [0], [0], [1], [0, 0, 1, 1], [], []>} : vector<16x16xbf16>, vector<16x256xbf16>, vector<16x256xf32> -> vector<16x256xf32>
    %27 = arith.truncf %26 : vector<16x256xf32> to vector<16x256xbf16>
    %c0_9 = arith.constant 0 : index
    %c0_10 = arith.constant 0 : index
    %c0_11 = arith.constant 0 : index
    %28 = vector.load %arg4[%c0_9, %c0_10, %c0_11] : memref<3x256x256xbf16, #tpu.memory_space<vmem>>, vector<1x256x256xbf16>
    %29 = vector.shape_cast %28 : vector<1x256x256xbf16> to vector<256x256xbf16>
    %cst_12 = arith.constant dense<0.000000e+00> : vector<16x256xf32>
    %30 = tpu.matmul %27, %29, %cst_12 {dimension_numbers = #tpu.dot_dimension_numbers<[1], [0], [0], [1], [0, 0, 1, 1], [], []>} : vector<16x256xbf16>, vector<256x256xbf16>, vector<16x256xf32> -> vector<16x256xf32>
    %31 = arith.addf %15, %30 : vector<16x256xf32>
    %32 = tpu.iota {dimensions = array<i32: 0>} : vector<16x16xi32>
    %33 = tpu.iota {dimensions = array<i32: 1>} : vector<16x16xi32>
    %c1_i32_13 = arith.constant 1 : i32
    %34 = vector.broadcast %c1_i32_13 : i32 to vector<16x16xi32>
    %35 = arith.muli %34, %32 : vector<16x16xi32>
    %c0_i32 = arith.constant 0 : i32
    %36 = vector.broadcast %c0_i32 : i32 to vector<16x16xi32>
    %37 = arith.addi %35, %36 : vector<16x16xi32>
    %38 = arith.cmpi eq, %33, %37 : vector<16x16xi32>
    %39 = arith.extui %38 : vector<16x16xi1> to vector<16x16xi32>
    %40 = arith.sitofp %39 : vector<16x16xi32> to vector<16x16xf32>
    %41 = arith.truncf %40 : vector<16x16xf32> to vector<16x16xbf16>
    %cst_14 = arith.constant dense<0.000000e+00> : vector<16x256xf32>
    %42 = tpu.matmul %41, %14, %cst_14 {dimension_numbers = #tpu.dot_dimension_numbers<[1], [0], [0], [1], [0, 0, 1, 1], [], []>} : vector<16x16xbf16>, vector<16x256xbf16>, vector<16x256xf32> -> vector<16x256xf32>
    %43 = arith.truncf %42 : vector<16x256xf32> to vector<16x256xbf16>
    %c1 = arith.constant 1 : index
    %c0_15 = arith.constant 0 : index
    %c0_16 = arith.constant 0 : index
    %44 = vector.load %arg4[%c1, %c0_15, %c0_16] : memref<3x256x256xbf16, #tpu.memory_space<vmem>>, vector<1x256x256xbf16>
    %45 = vector.shape_cast %44 : vector<1x256x256xbf16> to vector<256x256xbf16>
    %cst_17 = arith.constant dense<0.000000e+00> : vector<16x256xf32>
    %46 = tpu.matmul %43, %45, %cst_17 {dimension_numbers = #tpu.dot_dimension_numbers<[1], [0], [0], [1], [0, 0, 1, 1], [], []>} : vector<16x256xbf16>, vector<256x256xbf16>, vector<16x256xf32> -> vector<16x256xf32>
    %47 = arith.addf %31, %46 : vector<16x256xf32>
    %48 = tpu.iota {dimensions = array<i32: 0>} : vector<16x16xi32>
    %49 = tpu.iota {dimensions = array<i32: 1>} : vector<16x16xi32>
    %c1_i32_18 = arith.constant 1 : i32
    %50 = vector.broadcast %c1_i32_18 : i32 to vector<16x16xi32>
    %51 = arith.muli %50, %48 : vector<16x16xi32>
    %c1_i32_19 = arith.constant 1 : i32
    %52 = vector.broadcast %c1_i32_19 : i32 to vector<16x16xi32>
    %53 = arith.addi %51, %52 : vector<16x16xi32>
    %54 = arith.cmpi eq, %49, %53 : vector<16x16xi32>
    %55 = arith.extui %54 : vector<16x16xi1> to vector<16x16xi32>
    %56 = arith.sitofp %55 : vector<16x16xi32> to vector<16x16xf32>
    %57 = arith.truncf %56 : vector<16x16xf32> to vector<16x16xbf16>
    %cst_20 = arith.constant dense<0.000000e+00> : vector<16x256xf32>
    %58 = tpu.matmul %57, %14, %cst_20 {dimension_numbers = #tpu.dot_dimension_numbers<[1], [0], [0], [1], [0, 0, 1, 1], [], []>} : vector<16x16xbf16>, vector<16x256xbf16>, vector<16x256xf32> -> vector<16x256xf32>
    %59 = arith.truncf %58 : vector<16x256xf32> to vector<16x256xbf16>
    %c2 = arith.constant 2 : index
    %c0_21 = arith.constant 0 : index
    %c0_22 = arith.constant 0 : index
    %60 = vector.load %arg4[%c2, %c0_21, %c0_22] : memref<3x256x256xbf16, #tpu.memory_space<vmem>>, vector<1x256x256xbf16>
    %61 = vector.shape_cast %60 : vector<1x256x256xbf16> to vector<256x256xbf16>
    %cst_23 = arith.constant dense<0.000000e+00> : vector<16x256xf32>
    %62 = tpu.matmul %59, %61, %cst_23 {dimension_numbers = #tpu.dot_dimension_numbers<[1], [0], [0], [1], [0, 0, 1, 1], [], []>} : vector<16x256xbf16>, vector<256x256xbf16>, vector<16x256xf32> -> vector<16x256xf32>
    %63 = arith.addf %47, %62 : vector<16x256xf32>
    %64 = arith.truncf %63 : vector<16x256xf32> to vector<16x256xbf16>
    %c0_24 = arith.constant 0 : index
    %c0_25 = arith.constant 0 : index
    %c0_26 = arith.constant 0 : index
    %65 = vector.load %arg5[%c0_24, %c0_25, %c0_26] : memref<1x16x256xbf16, #tpu.memory_space<vmem>>, vector<1x16x256xbf16>
    %66 = vector.shape_cast %65 : vector<1x16x256xbf16> to vector<16x256xbf16>
    %67 = vector.shape_cast %64 : vector<16x256xbf16> to vector<1x16x256xbf16>
    tpu.vector_store %arg5[%c0_24, %c0_25, %c0_26], %67 {strides = array<i32>} : memref<1x16x256xbf16, #tpu.memory_space<vmem>>, vector<1x16x256xbf16>,
    %cst_27 = arith.constant dense<0.000000e+00> : vector<256xf32>
    %68 = vector.multi_reduction <add>, %63, %cst_27 [0] : vector<16x256xf32> to vector<256xf32>
    %69 = vector.shape_cast %68 : vector<256xf32> to vector<1x256xf32>
    %70 = arith.mulf %63, %63 : vector<16x256xf32>
    %cst_28 = arith.constant dense<0.000000e+00> : vector<256xf32>
    %71 = vector.multi_reduction <add>, %70, %cst_28 [0] : vector<16x256xf32> to vector<256xf32>
    %72 = vector.shape_cast %71 : vector<256xf32> to vector<1x256xf32>
    %73 = tpu.iota {dimensions = array<i32: 0>} : vector<2x256xi32>
    %c0_i32_29 = arith.constant 0 : i32
    %74 = vector.broadcast %c0_i32_29 : i32 to vector<2x256xi32>
    %75 = arith.cmpi eq, %73, %74 : vector<2x256xi32>
    %76 = vector.shape_cast %69 : vector<1x256xf32> to vector<1x256xf32>
    %77 = vector.broadcast %76 : vector<1x256xf32> to vector<2x256xf32>
    %78 = vector.shape_cast %72 : vector<1x256xf32> to vector<1x256xf32>
    %79 = vector.broadcast %78 : vector<1x256xf32> to vector<2x256xf32>
    %80 = arith.select %75, %77, %79 : vector<2x256xi1>, vector<2x256xf32>
    %c0_30 = arith.constant 0 : index
    %c0_31 = arith.constant 0 : index
    %c0_32 = arith.constant 0 : index
    %81 = vector.load %arg6[%c0_30, %c0_31, %c0_32] : memref<1x2x256xf32, #tpu.memory_space<vmem>>, vector<1x2x256xf32>
    %82 = vector.shape_cast %81 : vector<1x2x256xf32> to vector<2x256xf32>
    %83 = vector.shape_cast %80 : vector<2x256xf32> to vector<1x2x256xf32>
    tpu.vector_store %arg6[%c0_30, %c0_31, %c0_32], %83 {strides = array<i32>} : memref<1x2x256xf32, #tpu.memory_space<vmem>>, vector<1x2x256xf32>,
    return
  }
  func.func @transform_0(%arg0: i32) -> (i32, i32, i32) {
    %c0_i32 = arith.constant 0 : i32
    %c0_i32_0 = arith.constant 0 : i32
    %c0_i32_1 = arith.constant 0 : i32
    return %arg0, %c0_i32, %c0_i32_0 : i32, i32, i32
  }
  func.func @transform_1(%arg0: i32) -> (i32, i32) {
    %c0_i32 = arith.constant 0 : i32
    %c0_i32_0 = arith.constant 0 : i32
    %c0_i32_1 = arith.constant 0 : i32
    return %c0_i32, %c0_i32_0 : i32, i32
  }
  func.func @transform_2(%arg0: i32) -> (i32, i32) {
    %c0_i32 = arith.constant 0 : i32
    %c0_i32_0 = arith.constant 0 : i32
    %c0_i32_1 = arith.constant 0 : i32
    return %c0_i32, %c0_i32_0 : i32, i32
  }
  func.func @transform_3(%arg0: i32) -> (i32, i32, i32) {
    %c0_i32 = arith.constant 0 : i32
    %c0_i32_0 = arith.constant 0 : i32
    %c0_i32_1 = arith.constant 0 : i32
    %c0_i32_2 = arith.constant 0 : i32
    return %c0_i32, %c0_i32_0, %c0_i32_1 : i32, i32, i32
  }
  func.func @transform_4(%arg0: i32) -> (i32, i32, i32) {
    %c0_i32 = arith.constant 0 : i32
    %c0_i32_0 = arith.constant 0 : i32
    %c0_i32_1 = arith.constant 0 : i32
    return %arg0, %c0_i32, %c0_i32_0 : i32, i32, i32
  }
  func.func @transform_5(%arg0: i32) -> (i32, i32, i32) {
    %c0_i32 = arith.constant 0 : i32
    %c0_i32_0 = arith.constant 0 : i32
    %c0_i32_1 = arith.constant 0 : i32
    return %arg0, %c0_i32, %c0_i32_0 : i32, i32, i32
  }
}

module attributes {stable_mosaic.version = 11 : i64} {
  func.func @kernel(%arg0: i32, %arg1: memref<1x16x256xbf16, #tpu.memory_space<vmem>>, %arg2: memref<1x256xf32, #tpu.memory_space<vmem>>, %arg3: memref<1x256xf32, #tpu.memory_space<vmem>>, %arg4: memref<3x256x128xbf16, #tpu.memory_space<vmem>>, %arg5: memref<1x8x128xbf16, #tpu.memory_space<vmem>>, %arg6: memref<1x2x128xf32, #tpu.memory_space<vmem>>) attributes {dimension_semantics = [#tpu.dimension_semantics<parallel>], iteration_bounds = array<i64: 2>, scalar_prefetch = 0 : i64, scratch_operands = 0 : i64, tpu.core_type = #tpu.core_type<tc>, window_params = [{transform_indices = @transform_0, window_bounds = array<i64: 1, 16, 256>}, {pipeline_mode = #tpu.pipeline_mode<synchronous>, transform_indices = @transform_1, window_bounds = array<i64: 1, 256>}, {pipeline_mode = #tpu.pipeline_mode<synchronous>, transform_indices = @transform_2, window_bounds = array<i64: 1, 256>}, {pipeline_mode = #tpu.pipeline_mode<synchronous>, transform_indices = @transform_3, window_bounds = array<i64: 3, 256, 128>}, {transform_indices = @transform_4, window_bounds = array<i64: 1, 8, 128>}, {transform_indices = @transform_5, window_bounds = array<i64: 1, 2, 128>}]} {
    %c0 = arith.constant 0 : index
    %c0_0 = arith.constant 0 : index
    %c0_1 = arith.constant 0 : index
    %0 = vector.load %arg1[%c0, %c0_0, %c0_1] : memref<1x16x256xbf16, #tpu.memory_space<vmem>>, vector<1x16x256xbf16>
    %1 = vector.shape_cast %0 : vector<1x16x256xbf16> to vector<16x256xbf16>
    %2 = arith.extf %1 : vector<16x256xbf16> to vector<16x256xf32>
    %c0_2 = arith.constant 0 : index
    %c0_3 = arith.constant 0 : index
    %3 = vector.load %arg2[%c0_2, %c0_3] : memref<1x256xf32, #tpu.memory_space<vmem>>, vector<1x256xf32>
    %4 = vector.broadcast %3 : vector<1x256xf32> to vector<16x256xf32>
    %5 = arith.mulf %2, %4 : vector<16x256xf32>
    %c0_4 = arith.constant 0 : index
    %c0_5 = arith.constant 0 : index
    %6 = vector.load %arg3[%c0_4, %c0_5] : memref<1x256xf32, #tpu.memory_space<vmem>>, vector<1x256xf32>
    %7 = vector.broadcast %6 : vector<1x256xf32> to vector<16x256xf32>
    %8 = arith.addf %5, %7 : vector<16x256xf32>
    %cst = arith.constant 0.000000e+00 : f32
    %9 = vector.broadcast %cst : f32 to vector<16x256xf32>
    %10 = arith.cmpf oge, %8, %9 : vector<16x256xf32>
    %cst_6 = arith.constant 1.000000e-01 : f32
    %11 = vector.broadcast %cst_6 : f32 to vector<16x256xf32>
    %12 = arith.mulf %11, %8 : vector<16x256xf32>
    %13 = arith.select %10, %8, %12 : vector<16x256xi1>, vector<16x256xf32>
    %14 = arith.truncf %13 : vector<16x256xf32> to vector<16x256xbf16>
    %cst_7 = arith.constant 0.000000e+00 : f32
    %15 = vector.broadcast %cst_7 : f32 to vector<8x128xf32>
    %16 = tpu.iota {dimensions = array<i32: 0>} : vector<8x16xi32>
    %17 = tpu.iota {dimensions = array<i32: 1>} : vector<8x16xi32>
    %c2_i32 = arith.constant 2 : i32
    %18 = vector.broadcast %c2_i32 : i32 to vector<8x16xi32>
    %19 = arith.muli %18, %16 : vector<8x16xi32>
    %c-1_i32 = arith.constant -1 : i32
    %20 = vector.broadcast %c-1_i32 : i32 to vector<8x16xi32>
    %21 = arith.addi %19, %20 : vector<8x16xi32>
    %22 = arith.cmpi eq, %17, %21 : vector<8x16xi32>
    %23 = arith.extui %22 : vector<8x16xi1> to vector<8x16xi32>
    %24 = arith.sitofp %23 : vector<8x16xi32> to vector<8x16xf32>
    %25 = arith.truncf %24 : vector<8x16xf32> to vector<8x16xbf16>
    %cst_8 = arith.constant dense<0.000000e+00> : vector<8x256xf32>
    %26 = tpu.matmul %25, %14, %cst_8 {dimension_numbers = #tpu.dot_dimension_numbers<[1], [0], [0], [1], [0, 0, 1, 1], [], []>} : vector<8x16xbf16>, vector<16x256xbf16>, vector<8x256xf32> -> vector<8x256xf32>
    %27 = arith.truncf %26 : vector<8x256xf32> to vector<8x256xbf16>
    %c0_9 = arith.constant 0 : index
    %c0_10 = arith.constant 0 : index
    %c0_11 = arith.constant 0 : index
    %28 = vector.load %arg4[%c0_9, %c0_10, %c0_11] : memref<3x256x128xbf16, #tpu.memory_space<vmem>>, vector<1x256x128xbf16>
    %29 = vector.shape_cast %28 : vector<1x256x128xbf16> to vector<256x128xbf16>
    %cst_12 = arith.constant dense<0.000000e+00> : vector<8x128xf32>
    %30 = tpu.matmul %27, %29, %cst_12 {dimension_numbers = #tpu.dot_dimension_numbers<[1], [0], [0], [1], [0, 0, 1, 1], [], []>} : vector<8x256xbf16>, vector<256x128xbf16>, vector<8x128xf32> -> vector<8x128xf32>
    %31 = arith.addf %15, %30 : vector<8x128xf32>
    %32 = tpu.iota {dimensions = array<i32: 0>} : vector<8x16xi32>
    %33 = tpu.iota {dimensions = array<i32: 1>} : vector<8x16xi32>
    %c2_i32_13 = arith.constant 2 : i32
    %34 = vector.broadcast %c2_i32_13 : i32 to vector<8x16xi32>
    %35 = arith.muli %34, %32 : vector<8x16xi32>
    %c0_i32 = arith.constant 0 : i32
    %36 = vector.broadcast %c0_i32 : i32 to vector<8x16xi32>
    %37 = arith.addi %35, %36 : vector<8x16xi32>
    %38 = arith.cmpi eq, %33, %37 : vector<8x16xi32>
    %39 = arith.extui %38 : vector<8x16xi1> to vector<8x16xi32>
    %40 = arith.sitofp %39 : vector<8x16xi32> to vector<8x16xf32>
    %41 = arith.truncf %40 : vector<8x16xf32> to vector<8x16xbf16>
    %cst_14 = arith.constant dense<0.000000e+00> : vector<8x256xf32>
    %42 = tpu.matmul %41, %14, %cst_14 {dimension_numbers = #tpu.dot_dimension_numbers<[1], [0], [0], [1], [0, 0, 1, 1], [], []>} : vector<8x16xbf16>, vector<16x256xbf16>, vector<8x256xf32> -> vector<8x256xf32>
    %43 = arith.truncf %42 : vector<8x256xf32> to vector<8x256xbf16>
    %c1 = arith.constant 1 : index
    %c0_15 = arith.constant 0 : index
    %c0_16 = arith.constant 0 : index
    %44 = vector.load %arg4[%c1, %c0_15, %c0_16] : memref<3x256x128xbf16, #tpu.memory_space<vmem>>, vector<1x256x128xbf16>
    %45 = vector.shape_cast %44 : vector<1x256x128xbf16> to vector<256x128xbf16>
    %cst_17 = arith.constant dense<0.000000e+00> : vector<8x128xf32>
    %46 = tpu.matmul %43, %45, %cst_17 {dimension_numbers = #tpu.dot_dimension_numbers<[1], [0], [0], [1], [0, 0, 1, 1], [], []>} : vector<8x256xbf16>, vector<256x128xbf16>, vector<8x128xf32> -> vector<8x128xf32>
    %47 = arith.addf %31, %46 : vector<8x128xf32>
    %48 = tpu.iota {dimensions = array<i32: 0>} : vector<8x16xi32>
    %49 = tpu.iota {dimensions = array<i32: 1>} : vector<8x16xi32>
    %c2_i32_18 = arith.constant 2 : i32
    %50 = vector.broadcast %c2_i32_18 : i32 to vector<8x16xi32>
    %51 = arith.muli %50, %48 : vector<8x16xi32>
    %c1_i32 = arith.constant 1 : i32
    %52 = vector.broadcast %c1_i32 : i32 to vector<8x16xi32>
    %53 = arith.addi %51, %52 : vector<8x16xi32>
    %54 = arith.cmpi eq, %49, %53 : vector<8x16xi32>
    %55 = arith.extui %54 : vector<8x16xi1> to vector<8x16xi32>
    %56 = arith.sitofp %55 : vector<8x16xi32> to vector<8x16xf32>
    %57 = arith.truncf %56 : vector<8x16xf32> to vector<8x16xbf16>
    %cst_19 = arith.constant dense<0.000000e+00> : vector<8x256xf32>
    %58 = tpu.matmul %57, %14, %cst_19 {dimension_numbers = #tpu.dot_dimension_numbers<[1], [0], [0], [1], [0, 0, 1, 1], [], []>} : vector<8x16xbf16>, vector<16x256xbf16>, vector<8x256xf32> -> vector<8x256xf32>
    %59 = arith.truncf %58 : vector<8x256xf32> to vector<8x256xbf16>
    %c2 = arith.constant 2 : index
    %c0_20 = arith.constant 0 : index
    %c0_21 = arith.constant 0 : index
    %60 = vector.load %arg4[%c2, %c0_20, %c0_21] : memref<3x256x128xbf16, #tpu.memory_space<vmem>>, vector<1x256x128xbf16>
    %61 = vector.shape_cast %60 : vector<1x256x128xbf16> to vector<256x128xbf16>
    %cst_22 = arith.constant dense<0.000000e+00> : vector<8x128xf32>
    %62 = tpu.matmul %59, %61, %cst_22 {dimension_numbers = #tpu.dot_dimension_numbers<[1], [0], [0], [1], [0, 0, 1, 1], [], []>} : vector<8x256xbf16>, vector<256x128xbf16>, vector<8x128xf32> -> vector<8x128xf32>
    %63 = arith.addf %47, %62 : vector<8x128xf32>
    %64 = arith.truncf %63 : vector<8x128xf32> to vector<8x128xbf16>
    %c0_23 = arith.constant 0 : index
    %c0_24 = arith.constant 0 : index
    %c0_25 = arith.constant 0 : index
    %65 = vector.load %arg5[%c0_23, %c0_24, %c0_25] : memref<1x8x128xbf16, #tpu.memory_space<vmem>>, vector<1x8x128xbf16>
    %66 = vector.shape_cast %65 : vector<1x8x128xbf16> to vector<8x128xbf16>
    %67 = vector.shape_cast %64 : vector<8x128xbf16> to vector<1x8x128xbf16>
    tpu.vector_store %arg5[%c0_23, %c0_24, %c0_25], %67 {strides = array<i32>} : memref<1x8x128xbf16, #tpu.memory_space<vmem>>, vector<1x8x128xbf16>,
    %cst_26 = arith.constant dense<0.000000e+00> : vector<128xf32>
    %68 = vector.multi_reduction <add>, %63, %cst_26 [0] : vector<8x128xf32> to vector<128xf32>
    %69 = vector.shape_cast %68 : vector<128xf32> to vector<1x128xf32>
    %70 = arith.mulf %63, %63 : vector<8x128xf32>
    %cst_27 = arith.constant dense<0.000000e+00> : vector<128xf32>
    %71 = vector.multi_reduction <add>, %70, %cst_27 [0] : vector<8x128xf32> to vector<128xf32>
    %72 = vector.shape_cast %71 : vector<128xf32> to vector<1x128xf32>
    %73 = tpu.iota {dimensions = array<i32: 0>} : vector<2x128xi32>
    %c0_i32_28 = arith.constant 0 : i32
    %74 = vector.broadcast %c0_i32_28 : i32 to vector<2x128xi32>
    %75 = arith.cmpi eq, %73, %74 : vector<2x128xi32>
    %76 = vector.shape_cast %69 : vector<1x128xf32> to vector<1x128xf32>
    %77 = vector.broadcast %76 : vector<1x128xf32> to vector<2x128xf32>
    %78 = vector.shape_cast %72 : vector<1x128xf32> to vector<1x128xf32>
    %79 = vector.broadcast %78 : vector<1x128xf32> to vector<2x128xf32>
    %80 = arith.select %75, %77, %79 : vector<2x128xi1>, vector<2x128xf32>
    %c0_29 = arith.constant 0 : index
    %c0_30 = arith.constant 0 : index
    %c0_31 = arith.constant 0 : index
    %81 = vector.load %arg6[%c0_29, %c0_30, %c0_31] : memref<1x2x128xf32, #tpu.memory_space<vmem>>, vector<1x2x128xf32>
    %82 = vector.shape_cast %81 : vector<1x2x128xf32> to vector<2x128xf32>
    %83 = vector.shape_cast %80 : vector<2x128xf32> to vector<1x2x128xf32>
    tpu.vector_store %arg6[%c0_29, %c0_30, %c0_31], %83 {strides = array<i32>} : memref<1x2x128xf32, #tpu.memory_space<vmem>>, vector<1x2x128xf32>,
    return
  }
  func.func @transform_0(%arg0: i32) -> (i32, i32, i32) {
    %c0_i32 = arith.constant 0 : i32
    %c0_i32_0 = arith.constant 0 : i32
    %c0_i32_1 = arith.constant 0 : i32
    return %arg0, %c0_i32, %c0_i32_0 : i32, i32, i32
  }
  func.func @transform_1(%arg0: i32) -> (i32, i32) {
    %c0_i32 = arith.constant 0 : i32
    %c0_i32_0 = arith.constant 0 : i32
    %c0_i32_1 = arith.constant 0 : i32
    return %c0_i32, %c0_i32_0 : i32, i32
  }
  func.func @transform_2(%arg0: i32) -> (i32, i32) {
    %c0_i32 = arith.constant 0 : i32
    %c0_i32_0 = arith.constant 0 : i32
    %c0_i32_1 = arith.constant 0 : i32
    return %c0_i32, %c0_i32_0 : i32, i32
  }
  func.func @transform_3(%arg0: i32) -> (i32, i32, i32) {
    %c0_i32 = arith.constant 0 : i32
    %c0_i32_0 = arith.constant 0 : i32
    %c0_i32_1 = arith.constant 0 : i32
    %c0_i32_2 = arith.constant 0 : i32
    return %c0_i32, %c0_i32_0, %c0_i32_1 : i32, i32, i32
  }
  func.func @transform_4(%arg0: i32) -> (i32, i32, i32) {
    %c0_i32 = arith.constant 0 : i32
    %c0_i32_0 = arith.constant 0 : i32
    %c0_i32_1 = arith.constant 0 : i32
    return %arg0, %c0_i32, %c0_i32_0 : i32, i32, i32
  }
  func.func @transform_5(%arg0: i32) -> (i32, i32, i32) {
    %c0_i32 = arith.constant 0 : i32
    %c0_i32_0 = arith.constant 0 : i32
    %c0_i32_1 = arith.constant 0 : i32
    return %arg0, %c0_i32, %c0_i32_0 : i32, i32, i32
  }
}

module attributes {stable_mosaic.version = 11 : i64} {
  func.func @kernel(%arg0: i32, %arg1: memref<1x8x128xbf16, #tpu.memory_space<vmem>>, %arg2: memref<1x128xf32, #tpu.memory_space<vmem>>, %arg3: memref<1x128xf32, #tpu.memory_space<vmem>>, %arg4: memref<3x128x128xbf16, #tpu.memory_space<vmem>>, %arg5: memref<1x8x128xbf16, #tpu.memory_space<vmem>>, %arg6: memref<1x2x128xf32, #tpu.memory_space<vmem>>) attributes {dimension_semantics = [#tpu.dimension_semantics<parallel>], iteration_bounds = array<i64: 2>, scalar_prefetch = 0 : i64, scratch_operands = 0 : i64, tpu.core_type = #tpu.core_type<tc>, window_params = [{transform_indices = @transform_0, window_bounds = array<i64: 1, 8, 128>}, {pipeline_mode = #tpu.pipeline_mode<synchronous>, transform_indices = @transform_1, window_bounds = array<i64: 1, 128>}, {pipeline_mode = #tpu.pipeline_mode<synchronous>, transform_indices = @transform_2, window_bounds = array<i64: 1, 128>}, {pipeline_mode = #tpu.pipeline_mode<synchronous>, transform_indices = @transform_3, window_bounds = array<i64: 3, 128, 128>}, {transform_indices = @transform_4, window_bounds = array<i64: 1, 8, 128>}, {transform_indices = @transform_5, window_bounds = array<i64: 1, 2, 128>}]} {
    %c0 = arith.constant 0 : index
    %c0_0 = arith.constant 0 : index
    %c0_1 = arith.constant 0 : index
    %0 = vector.load %arg1[%c0, %c0_0, %c0_1] : memref<1x8x128xbf16, #tpu.memory_space<vmem>>, vector<1x8x128xbf16>
    %1 = vector.shape_cast %0 : vector<1x8x128xbf16> to vector<8x128xbf16>
    %2 = arith.extf %1 : vector<8x128xbf16> to vector<8x128xf32>
    %c0_2 = arith.constant 0 : index
    %c0_3 = arith.constant 0 : index
    %3 = vector.load %arg2[%c0_2, %c0_3] : memref<1x128xf32, #tpu.memory_space<vmem>>, vector<1x128xf32>
    %4 = vector.broadcast %3 : vector<1x128xf32> to vector<8x128xf32>
    %5 = arith.mulf %2, %4 : vector<8x128xf32>
    %c0_4 = arith.constant 0 : index
    %c0_5 = arith.constant 0 : index
    %6 = vector.load %arg3[%c0_4, %c0_5] : memref<1x128xf32, #tpu.memory_space<vmem>>, vector<1x128xf32>
    %7 = vector.broadcast %6 : vector<1x128xf32> to vector<8x128xf32>
    %8 = arith.addf %5, %7 : vector<8x128xf32>
    %cst = arith.constant 0.000000e+00 : f32
    %9 = vector.broadcast %cst : f32 to vector<8x128xf32>
    %10 = arith.cmpf oge, %8, %9 : vector<8x128xf32>
    %cst_6 = arith.constant 1.000000e-01 : f32
    %11 = vector.broadcast %cst_6 : f32 to vector<8x128xf32>
    %12 = arith.mulf %11, %8 : vector<8x128xf32>
    %13 = arith.select %10, %8, %12 : vector<8x128xi1>, vector<8x128xf32>
    %14 = arith.truncf %13 : vector<8x128xf32> to vector<8x128xbf16>
    %cst_7 = arith.constant 0.000000e+00 : f32
    %15 = vector.broadcast %cst_7 : f32 to vector<8x128xf32>
    %16 = tpu.iota {dimensions = array<i32: 0>} : vector<8x8xi32>
    %17 = tpu.iota {dimensions = array<i32: 1>} : vector<8x8xi32>
    %c1_i32 = arith.constant 1 : i32
    %18 = vector.broadcast %c1_i32 : i32 to vector<8x8xi32>
    %19 = arith.muli %18, %16 : vector<8x8xi32>
    %c-1_i32 = arith.constant -1 : i32
    %20 = vector.broadcast %c-1_i32 : i32 to vector<8x8xi32>
    %21 = arith.addi %19, %20 : vector<8x8xi32>
    %22 = arith.cmpi eq, %17, %21 : vector<8x8xi32>
    %23 = arith.extui %22 : vector<8x8xi1> to vector<8x8xi32>
    %24 = arith.sitofp %23 : vector<8x8xi32> to vector<8x8xf32>
    %25 = arith.truncf %24 : vector<8x8xf32> to vector<8x8xbf16>
    %cst_8 = arith.constant dense<0.000000e+00> : vector<8x128xf32>
    %26 = tpu.matmul %25, %14, %cst_8 {dimension_numbers = #tpu.dot_dimension_numbers<[1], [0], [0], [1], [0, 0, 1, 1], [], []>} : vector<8x8xbf16>, vector<8x128xbf16>, vector<8x128xf32> -> vector<8x128xf32>
    %27 = arith.truncf %26 : vector<8x128xf32> to vector<8x128xbf16>
    %c0_9 = arith.constant 0 : index
    %c0_10 = arith.constant 0 : index
    %c0_11 = arith.constant 0 : index
    %28 = vector.load %arg4[%c0_9, %c0_10, %c0_11] : memref<3x128x128xbf16, #tpu.memory_space<vmem>>, vector<1x128x128xbf16>
    %29 = vector.shape_cast %28 : vector<1x128x128xbf16> to vector<128x128xbf16>
    %cst_12 = arith.constant dense<0.000000e+00> : vector<8x128xf32>
    %30 = tpu.matmul %27, %29, %cst_12 {dimension_numbers = #tpu.dot_dimension_numbers<[1], [0], [0], [1], [0, 0, 1, 1], [], []>} : vector<8x128xbf16>, vector<128x128xbf16>, vector<8x128xf32> -> vector<8x128xf32>
    %31 = arith.addf %15, %30 : vector<8x128xf32>
    %32 = tpu.iota {dimensions = array<i32: 0>} : vector<8x8xi32>
    %33 = tpu.iota {dimensions = array<i32: 1>} : vector<8x8xi32>
    %c1_i32_13 = arith.constant 1 : i32
    %34 = vector.broadcast %c1_i32_13 : i32 to vector<8x8xi32>
    %35 = arith.muli %34, %32 : vector<8x8xi32>
    %c0_i32 = arith.constant 0 : i32
    %36 = vector.broadcast %c0_i32 : i32 to vector<8x8xi32>
    %37 = arith.addi %35, %36 : vector<8x8xi32>
    %38 = arith.cmpi eq, %33, %37 : vector<8x8xi32>
    %39 = arith.extui %38 : vector<8x8xi1> to vector<8x8xi32>
    %40 = arith.sitofp %39 : vector<8x8xi32> to vector<8x8xf32>
    %41 = arith.truncf %40 : vector<8x8xf32> to vector<8x8xbf16>
    %cst_14 = arith.constant dense<0.000000e+00> : vector<8x128xf32>
    %42 = tpu.matmul %41, %14, %cst_14 {dimension_numbers = #tpu.dot_dimension_numbers<[1], [0], [0], [1], [0, 0, 1, 1], [], []>} : vector<8x8xbf16>, vector<8x128xbf16>, vector<8x128xf32> -> vector<8x128xf32>
    %43 = arith.truncf %42 : vector<8x128xf32> to vector<8x128xbf16>
    %c1 = arith.constant 1 : index
    %c0_15 = arith.constant 0 : index
    %c0_16 = arith.constant 0 : index
    %44 = vector.load %arg4[%c1, %c0_15, %c0_16] : memref<3x128x128xbf16, #tpu.memory_space<vmem>>, vector<1x128x128xbf16>
    %45 = vector.shape_cast %44 : vector<1x128x128xbf16> to vector<128x128xbf16>
    %cst_17 = arith.constant dense<0.000000e+00> : vector<8x128xf32>
    %46 = tpu.matmul %43, %45, %cst_17 {dimension_numbers = #tpu.dot_dimension_numbers<[1], [0], [0], [1], [0, 0, 1, 1], [], []>} : vector<8x128xbf16>, vector<128x128xbf16>, vector<8x128xf32> -> vector<8x128xf32>
    %47 = arith.addf %31, %46 : vector<8x128xf32>
    %48 = tpu.iota {dimensions = array<i32: 0>} : vector<8x8xi32>
    %49 = tpu.iota {dimensions = array<i32: 1>} : vector<8x8xi32>
    %c1_i32_18 = arith.constant 1 : i32
    %50 = vector.broadcast %c1_i32_18 : i32 to vector<8x8xi32>
    %51 = arith.muli %50, %48 : vector<8x8xi32>
    %c1_i32_19 = arith.constant 1 : i32
    %52 = vector.broadcast %c1_i32_19 : i32 to vector<8x8xi32>
    %53 = arith.addi %51, %52 : vector<8x8xi32>
    %54 = arith.cmpi eq, %49, %53 : vector<8x8xi32>
    %55 = arith.extui %54 : vector<8x8xi1> to vector<8x8xi32>
    %56 = arith.sitofp %55 : vector<8x8xi32> to vector<8x8xf32>
    %57 = arith.truncf %56 : vector<8x8xf32> to vector<8x8xbf16>
    %cst_20 = arith.constant dense<0.000000e+00> : vector<8x128xf32>
    %58 = tpu.matmul %57, %14, %cst_20 {dimension_numbers = #tpu.dot_dimension_numbers<[1], [0], [0], [1], [0, 0, 1, 1], [], []>} : vector<8x8xbf16>, vector<8x128xbf16>, vector<8x128xf32> -> vector<8x128xf32>
    %59 = arith.truncf %58 : vector<8x128xf32> to vector<8x128xbf16>
    %c2 = arith.constant 2 : index
    %c0_21 = arith.constant 0 : index
    %c0_22 = arith.constant 0 : index
    %60 = vector.load %arg4[%c2, %c0_21, %c0_22] : memref<3x128x128xbf16, #tpu.memory_space<vmem>>, vector<1x128x128xbf16>
    %61 = vector.shape_cast %60 : vector<1x128x128xbf16> to vector<128x128xbf16>
    %cst_23 = arith.constant dense<0.000000e+00> : vector<8x128xf32>
    %62 = tpu.matmul %59, %61, %cst_23 {dimension_numbers = #tpu.dot_dimension_numbers<[1], [0], [0], [1], [0, 0, 1, 1], [], []>} : vector<8x128xbf16>, vector<128x128xbf16>, vector<8x128xf32> -> vector<8x128xf32>
    %63 = arith.addf %47, %62 : vector<8x128xf32>
    %64 = arith.truncf %63 : vector<8x128xf32> to vector<8x128xbf16>
    %c0_24 = arith.constant 0 : index
    %c0_25 = arith.constant 0 : index
    %c0_26 = arith.constant 0 : index
    %65 = vector.load %arg5[%c0_24, %c0_25, %c0_26] : memref<1x8x128xbf16, #tpu.memory_space<vmem>>, vector<1x8x128xbf16>
    %66 = vector.shape_cast %65 : vector<1x8x128xbf16> to vector<8x128xbf16>
    %67 = vector.shape_cast %64 : vector<8x128xbf16> to vector<1x8x128xbf16>
    tpu.vector_store %arg5[%c0_24, %c0_25, %c0_26], %67 {strides = array<i32>} : memref<1x8x128xbf16, #tpu.memory_space<vmem>>, vector<1x8x128xbf16>,
    %cst_27 = arith.constant dense<0.000000e+00> : vector<128xf32>
    %68 = vector.multi_reduction <add>, %63, %cst_27 [0] : vector<8x128xf32> to vector<128xf32>
    %69 = vector.shape_cast %68 : vector<128xf32> to vector<1x128xf32>
    %70 = arith.mulf %63, %63 : vector<8x128xf32>
    %cst_28 = arith.constant dense<0.000000e+00> : vector<128xf32>
    %71 = vector.multi_reduction <add>, %70, %cst_28 [0] : vector<8x128xf32> to vector<128xf32>
    %72 = vector.shape_cast %71 : vector<128xf32> to vector<1x128xf32>
    %73 = tpu.iota {dimensions = array<i32: 0>} : vector<2x128xi32>
    %c0_i32_29 = arith.constant 0 : i32
    %74 = vector.broadcast %c0_i32_29 : i32 to vector<2x128xi32>
    %75 = arith.cmpi eq, %73, %74 : vector<2x128xi32>
    %76 = vector.shape_cast %69 : vector<1x128xf32> to vector<1x128xf32>
    %77 = vector.broadcast %76 : vector<1x128xf32> to vector<2x128xf32>
    %78 = vector.shape_cast %72 : vector<1x128xf32> to vector<1x128xf32>
    %79 = vector.broadcast %78 : vector<1x128xf32> to vector<2x128xf32>
    %80 = arith.select %75, %77, %79 : vector<2x128xi1>, vector<2x128xf32>
    %c0_30 = arith.constant 0 : index
    %c0_31 = arith.constant 0 : index
    %c0_32 = arith.constant 0 : index
    %81 = vector.load %arg6[%c0_30, %c0_31, %c0_32] : memref<1x2x128xf32, #tpu.memory_space<vmem>>, vector<1x2x128xf32>
    %82 = vector.shape_cast %81 : vector<1x2x128xf32> to vector<2x128xf32>
    %83 = vector.shape_cast %80 : vector<2x128xf32> to vector<1x2x128xf32>
    tpu.vector_store %arg6[%c0_30, %c0_31, %c0_32], %83 {strides = array<i32>} : memref<1x2x128xf32, #tpu.memory_space<vmem>>, vector<1x2x128xf32>,
    return
  }
  func.func @transform_0(%arg0: i32) -> (i32, i32, i32) {
    %c0_i32 = arith.constant 0 : i32
    %c0_i32_0 = arith.constant 0 : i32
    %c0_i32_1 = arith.constant 0 : i32
    return %arg0, %c0_i32, %c0_i32_0 : i32, i32, i32
  }
  func.func @transform_1(%arg0: i32) -> (i32, i32) {
    %c0_i32 = arith.constant 0 : i32
    %c0_i32_0 = arith.constant 0 : i32
    %c0_i32_1 = arith.constant 0 : i32
    return %c0_i32, %c0_i32_0 : i32, i32
  }
  func.func @transform_2(%arg0: i32) -> (i32, i32) {
    %c0_i32 = arith.constant 0 : i32
    %c0_i32_0 = arith.constant 0 : i32
    %c0_i32_1 = arith.constant 0 : i32
    return %c0_i32, %c0_i32_0 : i32, i32
  }
  func.func @transform_3(%arg0: i32) -> (i32, i32, i32) {
    %c0_i32 = arith.constant 0 : i32
    %c0_i32_0 = arith.constant 0 : i32
    %c0_i32_1 = arith.constant 0 : i32
    %c0_i32_2 = arith.constant 0 : i32
    return %c0_i32, %c0_i32_0, %c0_i32_1 : i32, i32, i32
  }
  func.func @transform_4(%arg0: i32) -> (i32, i32, i32) {
    %c0_i32 = arith.constant 0 : i32
    %c0_i32_0 = arith.constant 0 : i32
    %c0_i32_1 = arith.constant 0 : i32
    return %arg0, %c0_i32, %c0_i32_0 : i32, i32, i32
  }
  func.func @transform_5(%arg0: i32) -> (i32, i32, i32) {
    %c0_i32 = arith.constant 0 : i32
    %c0_i32_0 = arith.constant 0 : i32
    %c0_i32_1 = arith.constant 0 : i32
    return %arg0, %c0_i32, %c0_i32_0 : i32, i32, i32
  }
}

module attributes {stable_mosaic.version = 11 : i64} {
  func.func @_bn_lrelu_kernel(%arg0: i32, %arg1: memref<1x8x128xbf16, #tpu.memory_space<vmem>>, %arg2: memref<1x128xf32, #tpu.memory_space<vmem>>, %arg3: memref<1x128xf32, #tpu.memory_space<vmem>>, %arg4: memref<1x8x128xf32, #tpu.memory_space<vmem>>) attributes {dimension_semantics = [#tpu.dimension_semantics<parallel>], iteration_bounds = array<i64: 2>, scalar_prefetch = 0 : i64, scratch_operands = 0 : i64, tpu.core_type = #tpu.core_type<tc>, window_params = [{transform_indices = @transform_0, window_bounds = array<i64: 1, 8, 128>}, {pipeline_mode = #tpu.pipeline_mode<synchronous>, transform_indices = @transform_1, window_bounds = array<i64: 1, 128>}, {pipeline_mode = #tpu.pipeline_mode<synchronous>, transform_indices = @transform_2, window_bounds = array<i64: 1, 128>}, {transform_indices = @transform_3, window_bounds = array<i64: 1, 8, 128>}]} {
    %c0 = arith.constant 0 : index
    %c0_0 = arith.constant 0 : index
    %c0_1 = arith.constant 0 : index
    %0 = vector.load %arg1[%c0, %c0_0, %c0_1] : memref<1x8x128xbf16, #tpu.memory_space<vmem>>, vector<1x8x128xbf16>
    %1 = vector.shape_cast %0 : vector<1x8x128xbf16> to vector<8x128xbf16>
    %2 = arith.extf %1 : vector<8x128xbf16> to vector<8x128xf32>
    %c0_2 = arith.constant 0 : index
    %c0_3 = arith.constant 0 : index
    %3 = vector.load %arg2[%c0_2, %c0_3] : memref<1x128xf32, #tpu.memory_space<vmem>>, vector<1x128xf32>
    %4 = vector.broadcast %3 : vector<1x128xf32> to vector<8x128xf32>
    %5 = arith.mulf %2, %4 : vector<8x128xf32>
    %c0_4 = arith.constant 0 : index
    %c0_5 = arith.constant 0 : index
    %6 = vector.load %arg3[%c0_4, %c0_5] : memref<1x128xf32, #tpu.memory_space<vmem>>, vector<1x128xf32>
    %7 = vector.broadcast %6 : vector<1x128xf32> to vector<8x128xf32>
    %8 = arith.addf %5, %7 : vector<8x128xf32>
    %cst = arith.constant 0.000000e+00 : f32
    %9 = vector.broadcast %cst : f32 to vector<8x128xf32>
    %10 = arith.cmpf oge, %8, %9 : vector<8x128xf32>
    %cst_6 = arith.constant 1.000000e-01 : f32
    %11 = vector.broadcast %cst_6 : f32 to vector<8x128xf32>
    %12 = arith.mulf %11, %8 : vector<8x128xf32>
    %13 = arith.select %10, %8, %12 : vector<8x128xi1>, vector<8x128xf32>
    %c0_7 = arith.constant 0 : index
    %c0_8 = arith.constant 0 : index
    %c0_9 = arith.constant 0 : index
    %14 = vector.load %arg4[%c0_7, %c0_8, %c0_9] : memref<1x8x128xf32, #tpu.memory_space<vmem>>, vector<1x8x128xf32>
    %15 = vector.shape_cast %14 : vector<1x8x128xf32> to vector<8x128xf32>
    %16 = vector.shape_cast %13 : vector<8x128xf32> to vector<1x8x128xf32>
    tpu.vector_store %arg4[%c0_7, %c0_8, %c0_9], %16 {strides = array<i32>} : memref<1x8x128xf32, #tpu.memory_space<vmem>>, vector<1x8x128xf32>,
    return
  }
  func.func @transform_0(%arg0: i32) -> (i32, i32, i32) {
    %c0_i32 = arith.constant 0 : i32
    %c0_i32_0 = arith.constant 0 : i32
    %c0_i32_1 = arith.constant 0 : i32
    return %arg0, %c0_i32, %c0_i32_0 : i32, i32, i32
  }
  func.func @transform_1(%arg0: i32) -> (i32, i32) {
    %c0_i32 = arith.constant 0 : i32
    %c0_i32_0 = arith.constant 0 : i32
    %c0_i32_1 = arith.constant 0 : i32
    return %c0_i32, %c0_i32_0 : i32, i32
  }
  func.func @transform_2(%arg0: i32) -> (i32, i32) {
    %c0_i32 = arith.constant 0 : i32
    %c0_i32_0 = arith.constant 0 : i32
    %c0_i32_1 = arith.constant 0 : i32
    return %c0_i32, %c0_i32_0 : i32, i32
  }
  func.func @transform_3(%arg0: i32) -> (i32, i32, i32) {
    %c0_i32 = arith.constant 0 : i32
    %c0_i32_0 = arith.constant 0 : i32
    %c0_i32_1 = arith.constant 0 : i32
    return %arg0, %c0_i32, %c0_i32_0 : i32, i32, i32
  }
}

</mosaic_0001>

<bundles_post_ra>
// kernel: forward.9
= control target key start
LH: loop header
LB: loop body
LE: loop exit
PB: predicated region body
PF: predicated region fallthrough
CT: control target
= control target key end

     0   :  { %s533_s18 = smov 0   ;;  %s570_s0 = inlined_call_operand.vmem [shape: f32[2,16,64], index: 0, kind: input, shape index: {}]   ;;  %s571_s1 = inlined_call_operand.vmem [shape: f32[1,64], index: 1, kind: input, shape index: {}]   ;;  %s572_s2 = inlined_call_operand.vmem [shape: f32[1,64], index: 2, kind: input, shape index: {}]   ;;  %s573_s3 = inlined_call_operand.vmem [shape: bf16[1,64,128], index: 3, kind: input, shape index: {}]   ;;  %s574_s4 = inlined_call_operand.vmem [shape: bf16[2,16,128], index: 4, kind: output, shape index: {0}]   ;;  %s575_s5 = inlined_call_operand.vmem [shape: f32[2,2,128], index: 5, kind: output, shape index: {1}]  }
   0x1 LB: > { %s434_s1 = sadd.s32 4294967295, %s499_s18   ;;  %p438_p0 = scmp.ge.s32.totalorder %s499_s18, 1  ;;  %s499_s18 = sphi %s533_s18, %s16_s18  }
   0x2   : > { %p190_p1 = scmp.lt.s32.totalorder %s499_s18, 3 }
   0x4   : > { %p191_p2 = pnand %p438_p0, %p190_p1 }
   0x5   : > { %p222_p3 = scmp.lt.s32.totalorder (!%p191_p2), %s434_s1, 1 }
   0x6   : > { %194 = sbr.rel (%p191_p2) target bundleno = 243 (0xf3), region = 36 }
   0xb   : > { %v489_v0 = vld [vmem:[%s573_s3 + $0x18] sm:$0xff]   ;;  %v501_v1 = vmov 0.0   ;;  %v490_v2 = vld [vmem:[%s573_s3 + $0x10] sm:$0xff]   ;;  %vm502_vm0 = vmmov 0   ;;  %s577_s1 = smov (!%p222_p3, %s434_s1), 1  ;;  %v491_v3 = vld [vmem:[%s573_s3 + $0x8] sm:$0xff]   ;;  %v343_v20 = vlaneseq }
   0xc   : > { %467 = vmatprep.subr.bf16.mxu0 %v501_v1  ;;  %475 = vmatprep.mubr.msk.bf16.mxu0 %vm502_vm0, %v501_v1  ;;  %s453_s24 = sshll.u32 %s577_s1, 4  ;;  %v492_v4 = vld [vmem:[%s573_s3] sm:$0xff]   ;;  %vm272_vm1 = vcmask 523264   ;;  %s454_s30 = sshll.u32 %s577_s1, 3 }
   0xd   : > { %468 = vmatpush3.bf16.msra.mxu0 %v489_v0  ;;  %s226_s27 = scalar_lea.vmem %s570_s0, %s453_s24  ;;  %s231_s8 = scalar_lea.vmem %s574_s4, %s454_s30  ;;  %v344_v25 = vshrl.u32 %v343_v20, 7 }
   0xe   : > { %469 = vmatprep.subr.bf16.mxu0 %v501_v1  ;;  %v237_v5 = vld [vmem:[%s226_s27] sm:$0xff]  ;;  %v238_v6 = vld [vmem:[%s226_s27 + $0x8] sm:$0xff]  ;;  %s443_s9 = sshll.u32 %s577_s1, 1 }
   0xf   : > { %v239_v7 = vpack.c.bf16 %v238_v6, %v237_v5  ;;  %vm345_vm2 = vcmp.eq.s32.totalorder %v344_v25, 0  ;;  %s235_s12 = scalar_lea.vmem %s575_s5, %s443_s9 }
  0x11   : > { %470 = vmatpush3.bf16.msra.mxu0 %v490_v2 }
  0x12   : > { %471 = vmatprep.subr.bf16.mxu0 %v501_v1 }
  0x15   : > { %472 = vmatpush3.bf16.msra.mxu0 %v491_v3 }
  0x16   : > { %473 = vmatprep.subr.bf16.mxu0 %v501_v1 }
  0x19   : > { %474 = vmatpush3.bf16.msra.mxu0 %v492_v4 }
  0x1c   : > { %476 = vmatmul.mubr.msk.bf16.vlgmr.msra.gmra.mxu0 %vm272_vm1, %v239_v7 }
  0xdc   : > { %v310_v8 = vpop.f32.mrf.mxu0 }
  0xdd   : > { %v334_v11 = vmul.f32 %v310_v8, %v310_v8 }
  0xde   : > { %v477_v9 = vpop.f32.mrf.mxu0 }
  0xe0   : > { %v313_v10 = vpop.f32.mrf.mxu0 }
  0xe1   : > { %v460_v12 = vpack.c.bf16 %v313_v10, %v310_v8  ;;  %v327_v13 = vadd.f32 %v313_v10, %v310_v8  ;;  %v335_v14 = vmul.f32 %v313_v10, %v313_v10 }
  0xe2   : > { %v478_v15 = vpop.f32.mrf.mxu0 }
  0xe3   : > { %461 = vst [vmem:[%s231_s8] sm:$0xff] %v460_v12   ;;  %v328_v16 = vrot.slane %v327_v13, 4  ;;  %v336_v17 = vadd.f32 %v335_v14, %v334_v11 }
  0xe5   : > { %v329_v18 = vadd.f32 %v328_v16, %v327_v13  ;;  %v337_v19 = vrot.slane %v336_v17, 4 }
  0xe7   : > { %v330_v21 = vrot.slane %v329_v18, 2  ;;  %v338_v22 = vadd.f32 %v337_v19, %v336_v17 }
  0xe9   : > { %v331_v23 = vadd.f32 %v330_v21, %v329_v18  ;;  %v339_v24 = vrot.slane %v338_v22, 2 }
  0xeb   : > { %v332_v26 = vrot.slane %v331_v23, 1  ;;  %v340_v27 = vadd.f32 %v339_v24, %v338_v22 }
  0xed   : > { %v341_v28 = vrot.slane %v340_v27, 1  ;;  %v333_v29 = vadd.f32 %v332_v26, %v331_v23 }
  0xef   : > { %v342_v30 = vadd.f32 %v341_v28, %v340_v27 }
  0xf1   : > { %v346_v31 = vsel %vm345_vm2, %v333_v29, %v342_v30 }
  0xf2   : > { %347 = vst [vmem:[%s235_s12] sm:$0x3] %v346_v31 }
  0xf3 PF: > { %s16_s18 = sadd.s32 1, %s499_s18  }
  0xf4   : > { %p13_p4 = scmp.ge.s32.totalorder %s16_s18, 4  }
  0xf6   :  { %15 = sbr.rel (!%p13_p4) target bundleno = 1 (0x1), region = 78 }

// kernel: tile.83
= control target key start
LH: loop header
LB: loop body
LE: loop exit
PB: predicated region body
PF: predicated region fallthrough
CT: control target
= control target key end

     0   :  { %s28_s0 = inlined_call_operand.vmem [shape: f32[8], index: 0, kind: input, shape index: {}]   ;;  %s29_s1 = inlined_call_operand.vmem [shape: f32[16,8], index: 1, kind: output, shape index: {}]  }
   0x1   :  { %v4_v0 = vld [vmem:[%s28_s0] ss:$0 sm:$0xff] }
   0x2   :  { %5 = vst [vmem:[%s29_s1] sm:$0xff] %v4_v0  ;;  %8 = vst [vmem:[%s29_s1 + $0x8] sm:$0xff] %v4_v0 }

// kernel: tile.84
= control target key start
LH: loop header
LB: loop body
LE: loop exit
PB: predicated region body
PF: predicated region fallthrough
CT: control target
= control target key end

     0   :  { %s133_s10 = smov 120   ;;  %s134_s11 = smov 104   ;;  %vm3_vm0 = vcmask 64512   ;;  %vm9_vm1 = vcmask 1048512   ;;  %vm15_vm2 = vcmask 982912   ;;  %vm21_vm3 = vcmask 917312   ;;  %s209_s0 = inlined_call_operand.vmem [shape: f32[16,8], index: 0, kind: input, shape index: {}]   ;;  %s210_s1 = inlined_call_operand.vmem [shape: f32[1,128], index: 1, kind: output, shape index: {}]  }
   0x1   :  { %v103_v0 = vld [vmem:[%s209_s0 + $0xf] sm:$0x1]   ;;  %v105_v1 = vld [vmem:[%s209_s0 + $0xd] sm:$0x1]   ;;  %v104_v2 = vld [vmem:[%s209_s0 + $0xe] sm:$0x1]  }
   0x2   :  { %7 = vrot.lane.b32.xlu0 %v103_v0, %s133_s10  ;;  %19 = vrot.lane.b32.xlu1 %v105_v1, %s134_s11  ;;  %v106_v3 = vld [vmem:[%s209_s0 + $0xc] sm:$0x1]   ;;  %s135_s16 = smov 112   ;;  %s136_s17 = smov 96   ;;  %v107_v4 = vld [vmem:[%s209_s0 + $0xb] sm:$0x1]  }
   0x3   :  { %v108_v5 = vld [vmem:[%s209_s0 + $0xa] sm:$0x1]   ;;  %v2_v6 = vld [vmem:[%s209_s0] sm:$0x1]   ;;  %s137_s24 = smov 88   ;;  %s138_s25 = smov 80  }
   0x4   :  { %4 = vst.msk [vmem:[#allocation0] sm:$0x1] %vm3_vm0, %v2_v6   ;;  %v109_v7 = vld [vmem:[%s209_s0 + $0x9] sm:$0x1]   ;;  %v110_v8 = vld [vmem:[%s209_s0 + $0x8] sm:$0x1]  }
   0x5   :  { %s139_s30 = smov 72   ;;  %s140_s2 = smov 64   ;;  %v111_v9 = vld [vmem:[%s209_s0 + $0x7] sm:$0x1]   ;;  %v112_v10 = vld [vmem:[%s209_s0 + $0x6] sm:$0x1]  }
   0x6   :  { %13 = vrot.lane.b32.xlu0 %v104_v2, %s135_s16  ;;  %25 = vrot.lane.b32.xlu1 %v106_v3, %s136_s17  ;;  %s141_s7 = smov 56   ;;  %s142_s8 = smov 48   ;;  %v113_v11 = vld [vmem:[%s209_s0 + $0x5] sm:$0x1]   ;;  %v114_v12 = vld [vmem:[%s209_s0 + $0x4] sm:$0x1]  }
   0x7   :  { %s143_s13 = smov 40   ;;  %s144_s14 = smov 32   ;;  %v115_v13 = vld [vmem:[%s209_s0 + $0x3] sm:$0x1]   ;;  %v116_v14 = vld [vmem:[%s209_s0 + $0x2] sm:$0x1]  }
   0x8   :  { %s145_s19 = smov 24   ;;  %s146_s20 = smov 16   ;;  %v117_v15 = vld [vmem:[%s209_s0 + $0x1] sm:$0x1]   ;;  %vm27_vm4 = vcmask 851712   ;;  %vm33_vm5 = vcmask 786112  }
   0x9   :  { %s147_s0 = smov 8   ;;  %vm39_vm6 = vcmask 720512   ;;  %vm45_vm7 = vcmask 654912   ;;  %vm51_vm8 = vcmask 589312   ;;  %vm57_vm9 = vcmask 523712  }
   0xa   :  { %31 = vrot.lane.b32.xlu0 %v107_v4, %s137_s24  ;;  %37 = vrot.lane.b32.xlu1 %v108_v5, %s138_s25  ;;  %vm63_vm10 = vcmask 458112   ;;  %vm69_vm11 = vcmask 392512   ;;  %vm75_vm12 = vcmask 326912   ;;  %vm81_vm13 = vcmask 261312  }
   0xb   :  { %vm87_vm14 = vcmask 195712   ;;  %vm93_vm15 = vcmask 130112  }
   0xe   :  { %43 = vrot.lane.b32.xlu0 %v109_v7, %s139_s30  ;;  %49 = vrot.lane.b32.xlu1 %v110_v8, %s140_s2 }
  0x12   :  { %55 = vrot.lane.b32.xlu0 %v111_v9, %s141_s7  ;;  %61 = vrot.lane.b32.xlu1 %v112_v10, %s142_s8 }
  0x16   :  { %67 = vrot.lane.b32.xlu0 %v113_v11, %s143_s13  ;;  %73 = vrot.lane.b32.xlu1 %v114_v12, %s144_s14 }
  0x1a   :  { %79 = vrot.lane.b32.xlu0 %v115_v13, %s145_s19  ;;  %85 = vrot.lane.b32.xlu1 %v116_v14, %s146_s20 }
  0x1e   :  { %91 = vrot.lane.b32.xlu0 %v117_v15, %s147_s0 }
  0x74   :  { %v8_v16 = vpop.permute.xlu0 %7   ;;  %v20_v17 = vpop.permute.xlu1 %19  }
  0x75   :  { %10 = vst.msk [vmem:[#allocation0] sm:$0x1] %vm9_vm1, %v8_v16  }
  0x78   :  { %v14_v18 = vpop.permute.xlu0 %13   ;;  %v26_v19 = vpop.permute.xlu1 %25  }
  0x79   :  { %16 = vst.msk [vmem:[#allocation0] sm:$0x1] %vm15_vm2, %v14_v18  }
  0x7a   :  { %22 = vst.msk [vmem:[#allocation0] sm:$0x1] %vm21_vm3, %v20_v17  }
  0x7b   :  { %28 = vst.msk [vmem:[#allocation0] sm:$0x1] %vm27_vm4, %v26_v19  }
  0x7c   :  { %v32_v20 = vpop.permute.xlu0 %31   ;;  %v38_v21 = vpop.permute.xlu1 %37  }
  0x7d   :  { %34 = vst.msk [vmem:[#allocation0] sm:$0x1] %vm33_vm5, %v32_v20  }
  0x7e   :  { %40 = vst.msk [vmem:[#allocation0] sm:$0x1] %vm39_vm6, %v38_v21  }
  0x80   :  { %v44_v22 = vpop.permute.xlu0 %43   ;;  %v50_v23 = vpop.permute.xlu1 %49  }
  0x81   :  { %46 = vst.msk [vmem:[#allocation0] sm:$0x1] %vm45_vm7, %v44_v22  }
  0x82   :  { %52 = vst.msk [vmem:[#allocation0] sm:$0x1] %vm51_vm8, %v50_v23  }
  0x84   :  { %v56_v24 = vpop.permute.xlu0 %55   ;;  %v62_v25 = vpop.permute.xlu1 %61  }
  0x85   :  { %58 = vst.msk [vmem:[#allocation0] sm:$0x1] %vm57_vm9, %v56_v24  }
  0x86   :  { %64 = vst.msk [vmem:[#allocation0] sm:$0x1] %vm63_vm10, %v62_v25  }
  0x88   :  { %v68_v26 = vpop.permute.xlu0 %67   ;;  %v74_v27 = vpop.permute.xlu1 %73  }
  0x89   :  { %70 = vst.msk [vmem:[#allocation0] sm:$0x1] %vm69_vm11, %v68_v26  }
  0x8a   :  { %76 = vst.msk [vmem:[#allocation0] sm:$0x1] %vm75_vm12, %v74_v27  }
  0x8c   :  { %v80_v28 = vpop.permute.xlu0 %79   ;;  %v86_v29 = vpop.permute.xlu1 %85  }
  0x8d   :  { %82 = vst.msk [vmem:[#allocation0] sm:$0x1] %vm81_vm13, %v80_v28  }
  0x8e   :  { %88 = vst.msk [vmem:[#allocation0] sm:$0x1] %vm87_vm14, %v86_v29  }
  0x90   :  { %v92_v30 = vpop.permute.xlu0 %91  }
  0x91   :  { %94 = vst.msk [vmem:[#allocation0] sm:$0x1] %vm93_vm15, %v92_v30  }
  0x98   :  { %v99_v31 = vld [vmem:[#allocation0] sm:$0x1] }
  0x99   :  { %102 = vst [vmem:[%s210_s1] sm:$0x1] %v99_v31 }

// kernel: tile.93
= control target key start
LH: loop header
LB: loop body
LE: loop exit
PB: predicated region body
PF: predicated region fallthrough
CT: control target
= control target key end

     0   :  { %s28_s0 = inlined_call_operand.vmem [shape: f32[16], index: 0, kind: input, shape index: {}]   ;;  %s29_s1 = inlined_call_operand.vmem [shape: f32[16,16], index: 1, kind: output, shape index: {}]  }
   0x1   :  { %v4_v0 = vld [vmem:[%s28_s0] ss:$0 sm:$0xff] }
   0x2   :  { %5 = vst [vmem:[%s29_s1] sm:$0xff] %v4_v0  ;;  %8 = vst [vmem:[%s29_s1 + $0x8] sm:$0xff] %v4_v0 }

// kernel: tile.94
= control target key start
LH: loop header
LB: loop body
LE: loop exit
PB: predicated region body
PF: predicated region fallthrough
CT: control target
= control target key end

     0   :  { %s7_s6 = smov 3  ;;  %s21_s9 = smov 3  ;;  %vm4_vm0 = vcmask 130048   ;;  %vm11_vm1 = vcmask 1048448   ;;  %vm18_vm2 = vcmask 917248   ;;  %vm25_vm3 = vcmask 786048   ;;  %s131_s0 = inlined_call_operand.vmem [shape: f32[16,16], index: 0, kind: input, shape index: {}]   ;;  %s132_s1 = inlined_call_operand.vmem [shape: f32[1,256], index: 1, kind: output, shape index: {}]  }
   0x1   :  { %v69_v0 = vld [vmem:[%s131_s0 + $0x7] ss:$8 sm:%s7_s6]   ;;  %s84_s10 = smov 112   ;;  %v71_v1 = vld [vmem:[%s131_s0 + $0x5] ss:$8 sm:%s21_s9]   ;;  %s14_s13 = smov 3 }
   0x2   :  { %9 = vrot.lane.b32.xlu0 %v69_v0, %s84_s10  ;;  %s85_s14 = smov 80   ;;  %v70_v2 = vld [vmem:[%s131_s0 + $0x6] ss:$8 sm:%s14_s13]   ;;  %s28_s17 = smov 3  ;;  %vm32_vm4 = vcmask 654848   ;;  %vm39_vm5 = vcmask 523648  }
   0x3   :  { %23 = vrot.lane.b32.xlu1 %v71_v1, %s85_s14  ;;  %v72_v3 = vld [vmem:[%s131_s0 + $0x4] ss:$8 sm:%s28_s17]   ;;  %s35_s20 = smov 3  ;;  %s42_s21 = smov 3  ;;  %vm46_vm6 = vcmask 392448   ;;  %vm53_vm7 = vcmask 261248  }
   0x4   :  { %s86_s22 = smov 96   ;;  %s87_s23 = smov 64   ;;  %v73_v4 = vld [vmem:[%s131_s0 + $0x3] ss:$8 sm:%s35_s20]   ;;  %v74_v5 = vld [vmem:[%s131_s0 + $0x2] ss:$8 sm:%s42_s21]  }
   0x5   :  { %s2_s26 = smov 3  ;;  %s49_s29 = smov 3 }
   0x6   :  { %16 = vrot.lane.b32.xlu0 %v70_v2, %s86_s22  ;;  %v3_v6 = vld [vmem:[%s131_s0] ss:$8 sm:%s2_s26]   ;;  %s88_s3 = smov 48   ;;  %s89_s4 = smov 32  }
   0x7   :  { %30 = vrot.lane.b32.xlu1 %v72_v3, %s87_s23  ;;  %5 = vst.msk [vmem:[#allocation0] ss:$8 sm:$0x3] %vm4_vm0, %v3_v6   ;;  %v75_v7 = vld [vmem:[%s131_s0 + $0x1] ss:$8 sm:%s49_s29]   ;;  %s90_s0 = smov 16  }
   0xa   :  { %37 = vrot.lane.b32.xlu0 %v73_v4, %s88_s3 }
   0xb   :  { %44 = vrot.lane.b32.xlu1 %v74_v5, %s89_s4 }
   0xe   :  { %51 = vrot.lane.b32.xlu0 %v75_v7, %s90_s0 }
  0x74   :  { %v10_v8 = vpop.permute.xlu0 %9  }
  0x75   :  { %12 = vst.msk [vmem:[#allocation0] ss:$8 sm:$0x3] %vm11_vm1, %v10_v8   ;;  %v24_v9 = vpop.permute.xlu1 %23  }
  0x78   :  { %v17_v10 = vpop.permute.xlu0 %16  }
  0x79   :  { %19 = vst.msk [vmem:[#allocation0] ss:$8 sm:$0x3] %vm18_vm2, %v17_v10   ;;  %v31_v11 = vpop.permute.xlu1 %30  }
  0x7a   :  { %26 = vst.msk [vmem:[#allocation0] ss:$8 sm:$0x3] %vm25_vm3, %v24_v9  }
  0x7b   :  { %33 = vst.msk [vmem:[#allocation0] ss:$8 sm:$0x3] %vm32_vm4, %v31_v11  }
  0x7c   :  { %v38_v12 = vpop.permute.xlu0 %37  }
  0x7d   :  { %40 = vst.msk [vmem:[#allocation0] ss:$8 sm:$0x3] %vm39_vm5, %v38_v12   ;;  %v45_v13 = vpop.permute.xlu1 %44  }
  0x7e   :  { %47 = vst.msk [vmem:[#allocation0] ss:$8 sm:$0x3] %vm46_vm6, %v45_v13  }
  0x80   :  { %v52_v14 = vpop.permute.xlu0 %51  }
  0x81   :  { %54 = vst.msk [vmem:[#allocation0] ss:$8 sm:$0x3] %vm53_vm7, %v52_v14  }
  0x88   :  { %v59_v15 = vld [vmem:[#allocation0] sm:$0x1]  ;;  %v64_v16 = vld [vmem:[#allocation0 + $0x8] sm:$0x1] }
  0x89   :  { %62 = vst [vmem:[%s132_s1] sm:$0x1] %v59_v15  ;;  %76 = vst [vmem:[%s132_s1 + $0x1] sm:$0x1] %v64_v16 }

// kernel: forward.10
= control target key start
LH: loop header
LB: loop body
LE: loop exit
PB: predicated region body
PF: predicated region fallthrough
CT: control target
= control target key end

     0   :  { %s1270_s18 = smov 0   ;;  %s1488_s0 = inlined_call_operand.vmem [shape: bf16[2,16,128], index: 0, kind: input, shape index: {}]   ;;  %s1489_s1 = inlined_call_operand.vmem [shape: f32[1,128], index: 1, kind: input, shape index: {}]   ;;  %s1490_s2 = inlined_call_operand.vmem [shape: f32[1,128], index: 2, kind: input, shape index: {}]   ;;  %s1491_s3 = inlined_call_operand.vmem [shape: bf16[3,128,256], index: 3, kind: input, shape index: {}]   ;;  %s1492_s4 = inlined_call_operand.vmem [shape: bf16[2,16,256], index: 4, kind: output, shape index: {0}]   ;;  %s1493_s5 = inlined_call_operand.vmem [shape: f32[2,2,256], index: 5, kind: output, shape index: {1}]  }
   0x1 LB: > { %s1006_s19 = sadd.s32 4294967295, %s1235_s18   ;;  %p1010_p0 = scmp.ge.s32.totalorder %s1235_s18, 1  ;;  %s1235_s18 = sphi %s1270_s18, %s16_s18  }
   0x2   : > { %p190_p1 = scmp.lt.s32.totalorder %s1235_s18, 3 }
   0x4   : > { %p191_p2 = pnand %p1010_p0, %p190_p1 }
   0x5   : > { %p223_p3 = scmp.lt.s32.totalorder (!%p191_p2), %s1006_s19, 1 }
   0x6   : > { %194 = sbr.rel (%p191_p2) target bundleno = 666 (0x29a), region = 36 }
   0xb   : > { %v268_v0 = vlaneseq  ;;  %v1237_v1 = vmov 0.0   ;;  %v1157_v2 = vld [vmem:[%s1491_s3 + $0x74] ss:$8 sps:$4 sm:$0xff]   ;;  %s1495_s19 = smov (!%p223_p3, %s1006_s19), 1  ;;  %vm1238_vm0 = vmmov 0   ;;  %vm282_vm5 = vcmask 130048  }
   0xc   : > { %1128 = vmatprep.subr.bf16.mxu0 %v1237_v1  ;;  %1130 = vmatprep.mubr.msk.bf16.mxu0 %vm1238_vm0, %v1237_v1  ;;  %v1159_v4 = vld [vmem:[%s1491_s3 + $0x70] ss:$8 sps:$4 sm:$0xff]   ;;  %v1160_v5 = vld [vmem:[%s1491_s3 + $0x64] ss:$8 sps:$4 sm:$0xff]   ;;  %v1162_v6 = vld [vmem:[%s1491_s3 + $0x60] ss:$8 sps:$4 sm:$0xff]  }
   0xd   : > { %v1286_v3 = vshrl.u32 %v268_v0, 7  ;;  %616 = vmatprep.subr.bf16.mxu1 %v1157_v2  ;;  %s1113_s28 = sshll.u32 %s1495_s19, 3  ;;  %v1017_v9 = vld [vmem:[%s1489_s1] ss:$0 sm:$0xff]  ;;  %v1307_v10 = vand.u32 127, %v268_v0  ;;  %v1239_v56 = vmov 0  }
   0xe   : > { %617 = vmatpush1.bf16.msra.mxu1 %v1159_v4  ;;  %s227_s6 = scalar_lea.vmem %s1488_s0, %s1113_s28  ;;  %v1166_v11 = vld [vmem:[%s1491_s3 + $0x54] ss:$8 sps:$4 sm:$0xff]   ;;  %v1018_v14 = vld [vmem:[%s1490_s2] ss:$0 sm:$0xff]  ;;  %v1168_v17 = vld [vmem:[%s1491_s3 + $0x50] ss:$8 sps:$4 sm:$0xff]   ;;  %648 = vmatprep.mubr.bf16.mxu1 %v1239_v56 }
   0xf   : > { %v1299_v7 = vadd.s32 8, %v1286_v3  ;;  %618 = vmatprep.subr.bf16.mxu1 %v1160_v5  ;;  %v1119_v8 = vld [vmem:[%s227_s6] sm:$0xff]   ;;  %v273_v15 = vadd.s32 4294967295, %v1286_v3  ;;  %v1178_v24 = vld [vmem:[%s1491_s3 + $0x34] ss:$8 sps:$4 sm:$0xff]   ;;  %vm344_vm6 = vcmp.eq.s32.totalorder %v1307_v10, %v1286_v3  ;;  %s1114_s7 = sshll.u32 %s1495_s19, 4 }
  0x10   : > { %v1120_v12 = vunpack.c.l.bf16 %v1119_v8  ;;  %v1121_v13 = vunpack.c.h.bf16 %v1119_v8  ;;  %v1172_v20 = vld [vmem:[%s1491_s3 + $0x44] ss:$8 sps:$4 sm:$0xff]   ;;  %v1174_v23 = vld [vmem:[%s1491_s3 + $0x40] ss:$8 sps:$4 sm:$0xff]   ;;  %v1180_v32 = vld [vmem:[%s1491_s3 + $0x30] ss:$8 sps:$4 sm:$0xff]   ;;  %s232_s10 = scalar_lea.vmem %s1492_s4, %s1114_s7 }
  0x11   : > { %v274_v16 = vadd.s32 4294967295, %v1299_v7  ;;  %vm275_vm1 = vcmp.eq.s32.totalorder %v1307_v10, %v273_v15  ;;  %v1165_v34 = vld [vmem:[%s1491_s3 + $0xf4] ss:$8 sps:$4 sm:$0xff]   ;;  %v1184_v35 = vld [vmem:[%s1491_s3 + $0x24] ss:$8 sps:$4 sm:$0xff]   ;;  %vm345_vm7 = vcmp.eq.s32.totalorder %v1307_v10, %v1299_v7  ;;  %v1022_v38 = vsel %vm344_vm6, 1.0, %v1237_v1 }
  0x12   : > { %619 = vmatpush1.bf16.msra.mxu1 %v1162_v6  ;;  %v250_v18 = vmul.f32 %v1120_v12, %v1017_v9  ;;  %v251_v19 = vmul.f32 %v1121_v13, %v1017_v9  ;;  %v1019_v27 = vsel %vm275_vm1, 1.0, %v1237_v1  ;;  %v1186_v36 = vld [vmem:[%s1491_s3 + $0x20] ss:$8 sps:$4 sm:$0xff]   ;;  %v1190_v37 = vld [vmem:[%s1491_s3 + $0x14] ss:$8 sps:$4 sm:$0xff]   ;;  %v1023_v39 = vsel %vm345_vm7, 1.0, %v1237_v1 }
  0x13   : > { %620 = vmatprep.subr.bf16.mxu1 %v1166_v11  ;;  %vm276_vm2 = vcmp.eq.s32.totalorder %v1307_v10, %v274_v16  ;;  %v350_v40 = vpack.c.bf16 %v1023_v39, %v1022_v38  ;;  %v1163_v41 = vld [vmem:[%s1491_s3 + $0xf0] ss:$8 sps:$4 sm:$0xff]   ;;  %v1171_v42 = vld [vmem:[%s1491_s3 + $0xe4] ss:$8 sps:$4 sm:$0xff]   ;;  %v1169_v43 = vld [vmem:[%s1491_s3 + $0xe0] ss:$8 sps:$4 sm:$0xff]  }
  0x14   : > { %v259_v21 = vadd.f32 %v1018_v14, %v250_v18  ;;  %v260_v22 = vadd.f32 %v1018_v14, %v251_v19  ;;  %v1020_v28 = vsel %vm276_vm2, 1.0, %v1237_v1  ;;  %v1177_v44 = vld [vmem:[%s1491_s3 + $0xd4] ss:$8 sps:$4 sm:$0xff]   ;;  %v1175_v45 = vld [vmem:[%s1491_s3 + $0xd0] ss:$8 sps:$4 sm:$0xff]   ;;  %v659_v9 = vadd.s32 1, %v1286_v3 }
  0x15   : > { %v281_v33 = vpack.c.bf16 %v1020_v28, %v1019_v27  ;;  %v1183_v46 = vld [vmem:[%s1491_s3 + $0xc4] ss:$8 sps:$4 sm:$0xff]   ;;  %v1181_v47 = vld [vmem:[%s1491_s3 + $0xc0] ss:$8 sps:$4 sm:$0xff]   ;;  %v1189_v48 = vld [vmem:[%s1491_s3 + $0xb4] ss:$8 sps:$4 sm:$0xff]  }
  0x16   : > { %621 = vmatpush1.bf16.msra.mxu1 %v1168_v17  ;;  %vm261_vm3 = vcmp.ge.f32.partialorder %v259_v21, 0.0  ;;  %vm262_vm4 = vcmp.ge.f32.partialorder %v260_v22, 0.0  ;;  %v263_v25 = vmul.f32 0.1, %v259_v21  ;;  %v264_v26 = vmul.f32 0.1, %v260_v22 }
  0x17   : > { %622 = vmatprep.subr.bf16.mxu1 %v1172_v20  ;;  %v1187_v49 = vld [vmem:[%s1491_s3 + $0xb0] ss:$8 sps:$4 sm:$0xff]   ;;  %v1195_v51 = vld [vmem:[%s1491_s3 + $0xa4] ss:$8 sps:$4 sm:$0xff]   ;;  %v1193_v53 = vld [vmem:[%s1491_s3 + $0xa0] ss:$8 sps:$4 sm:$0xff]   ;;  %vm661_vm8 = vcmp.eq.s32.totalorder %v1307_v10, %v659_v9 }
  0x18   : > { %v265_v29 = vsel %vm261_vm3, %v259_v21, %v263_v25  ;;  %v266_v30 = vsel %vm262_vm4, %v260_v22, %v264_v26  ;;  %v1192_v50 = vld [vmem:[%s1491_s3 + $0x10] ss:$8 sps:$4 sm:$0xff]   ;;  %v1196_v52 = vld [vmem:[%s1491_s3 + $0x4] ss:$8 sps:$4 sm:$0xff]   ;;  %v1198_v54 = vld [vmem:[%s1491_s3] ss:$8 sps:$4 sm:$0xff]  }
  0x19   : > { %v1333_v31 = vpack.c.bf16 %v266_v30, %v265_v29  ;;  %v1201_v55 = vld [vmem:[%s1491_s3 + $0x94] ss:$8 sps:$4 sm:$0xff]   ;;  %v1199_v57 = vld [vmem:[%s1491_s3 + $0x90] ss:$8 sps:$4 sm:$0xff]   ;;  %v1204_v58 = vld [vmem:[%s1491_s3 + $0x84] ss:$8 sps:$4 sm:$0xff]  }
  0x1a   : > { %623 = vmatpush1.bf16.msra.mxu1 %v1174_v23  ;;  %v1202_v59 = vld [vmem:[%s1491_s3 + $0x80] ss:$8 sps:$4 sm:$0xff]   ;;  %v1207_v60 = vld [vmem:[%s1491_s3 + $0x174] ss:$8 sps:$4 sm:$0xff]   ;;  %v1205_v0 = vld [vmem:[%s1491_s3 + $0x170] ss:$8 sps:$4 sm:$0xff]  }
  0x1b   : > { %624 = vmatprep.subr.bf16.mxu1 %v1178_v24  ;;  %1129 = vmatpush3.bf16.msra.mxu0 %v1333_v31  ;;  %v1210_v4 = vld [vmem:[%s1491_s3 + $0x164] ss:$8 sps:$4 sm:$0xff]   ;;  %v1208_v8 = vld [vmem:[%s1491_s3 + $0x160] ss:$8 sps:$4 sm:$0xff]   ;;  %v660_v11 = vadd.s32 1, %v1299_v7  ;;  %v1073_v7 = vsel %vm661_vm8, 1.0, %v1237_v1 }
  0x1c   : > { %1134 = vmatprep.subr.bf16.mxu0 %v1237_v1  ;;  %v1213_v12 = vld [vmem:[%s1491_s3 + $0x154] ss:$8 sps:$4 sm:$0xff]   ;;  %v1211_v16 = vld [vmem:[%s1491_s3 + $0x150] ss:$8 sps:$4 sm:$0xff]   ;;  %v1214_v20 = vld [vmem:[%s1491_s3 + $0x140] ss:$8 sps:$4 sm:$0xff]  }
  0x1d   : > { %vm662_vm9 = vcmp.eq.s32.totalorder %v1307_v10, %v660_v11  ;;  %v1216_v10 = vld [vmem:[%s1491_s3 + $0x144] ss:$8 sps:$4 sm:$0xff]   ;;  %v1219_v21 = vld [vmem:[%s1491_s3 + $0x134] ss:$8 sps:$4 sm:$0xff]   ;;  %v1220_v23 = vld [vmem:[%s1491_s3 + $0x120] ss:$8 sps:$4 sm:$0xff]  }
  0x1e   : > { %625 = vmatpush1.bf16.msra.mxu1 %v1180_v32  ;;  %1131 = vmatmul.mubr.msk.bf16.vlgmr.msra.gmra.mxu0 %vm282_vm5, %v281_v33  ;;  %v1074_v18 = vsel %vm662_vm9, 1.0, %v1237_v1  ;;  %v1222_v22 = vld [vmem:[%s1491_s3 + $0x124] ss:$8 sps:$4 sm:$0xff]   ;;  %v1225_v24 = vld [vmem:[%s1491_s3 + $0x114] ss:$8 sps:$4 sm:$0xff]   ;;  %vm903_vm10 = vcmp.eq.s32.totalorder %v1286_v3, 0 }
  0x1f   : > { %626 = vmatprep.subr.bf16.mxu1 %v1184_v35  ;;  %1135 = vmatpush3.bf16.msra.mxu0 %v1333_v31  ;;  %v667_v19 = vpack.c.bf16 %v1074_v18, %v1073_v7  ;;  %v1223_v25 = vld [vmem:[%s1491_s3 + $0x110] ss:$8 sps:$4 sm:$0xff]   ;;  %v1228_v26 = vld [vmem:[%s1491_s3 + $0x104] ss:$8 sps:$4 sm:$0xff]   ;;  %v1226_v27 = vld [vmem:[%s1491_s3 + $0x100] ss:$8 sps:$4 sm:$0xff]  }
  0x20   : > { %1136 = vmatprep.mubr.msk.bf16.mxu0 %vm1238_vm0, %v1237_v1  ;;  %493 = vmatprep.subr.bf16.mxu0 %v1165_v34  ;;  %s1115_s11 = sshll.u32 %s1495_s19, 2 }
  0x21   : > { %s237_s14 = scalar_lea.vmem %s1493_s5, %s1115_s11 }
  0x22   : > { %627 = vmatpush1.bf16.msra.mxu1 %v1186_v36 }
  0x23   : > { %628 = vmatprep.subr.bf16.mxu1 %v1190_v37 }
  0x26   : > { %1137 = vmatmul.mubr.msk.bf16.vlgmr.msra.gmra.mxu0 %vm282_vm5, %v350_v40  ;;  %629 = vmatpush1.bf16.msra.mxu1 %v1192_v50 }
  0x27   : > { %494 = vmatpush1.bf16.msra.mxu0 %v1163_v41  ;;  %630 = vmatprep.subr.bf16.mxu1 %v1196_v52 }
  0x28   : > { %495 = vmatprep.subr.bf16.mxu0 %v1171_v42  ;;  %525 = vmatprep.mubr.bf16.mxu0 %v1239_v56 }
  0x2a   : > { %631 = vmatpush1.bf16.msra.mxu1 %v1198_v54 }
  0x2b   : > { %496 = vmatpush1.bf16.msra.mxu0 %v1169_v43  ;;  %810 = vmatprep.subr.bf16.mxu1 %v1207_v60 }
  0x2c   : > { %497 = vmatprep.subr.bf16.mxu0 %v1177_v44 }
  0x2f   : > { %498 = vmatpush1.bf16.msra.mxu0 %v1175_v45 }
  0x30   : > { %499 = vmatprep.subr.bf16.mxu0 %v1183_v46 }
  0x33   : > { %500 = vmatpush1.bf16.msra.mxu0 %v1181_v47 }
  0x34   : > { %501 = vmatprep.subr.bf16.mxu0 %v1189_v48 }
  0x37   : > { %502 = vmatpush1.bf16.msra.mxu0 %v1187_v49 }
  0x38   : > { %503 = vmatprep.subr.bf16.mxu0 %v1195_v51 }
  0x3b   : > { %504 = vmatpush1.bf16.msra.mxu0 %v1193_v53 }
  0x3c   : > { %505 = vmatprep.subr.bf16.mxu0 %v1201_v55 }
  0x3f   : > { %506 = vmatpush1.bf16.msra.mxu0 %v1199_v57 }
  0x40   : > { %507 = vmatprep.subr.bf16.mxu0 %v1204_v58 }
  0x43   : > { %508 = vmatpush1.bf16.msra.mxu0 %v1202_v59 }
  0x44   : > { %1140 = vmatprep.subr.bf16.mxu0 %v1237_v1 }
  0xde   : > { %v320_v61 = vpop.f32.mrf.mxu0 }
  0xe0   : > { %v1132_v62 = vpop.f32.mrf.mxu0 }
  0xe2   : > { %v323_v63 = vpop.f32.mrf.mxu0 }
  0xe3   : > { %v327_v2 = vpack.c.bf16 %v323_v63, %v320_v61 }
  0xe4   : > { %v1133_v5 = vpop.f32.mrf.mxu0 }
  0xe5   : > { %649 = vmatmul.mubr.bf16.vlgmr.msra.gmra.mxu1 %v327_v2 }
  0xe6   : > { %v388_v6 = vpop.f32.mrf.mxu0  ;;  %811 = vmatpush1.bf16.msra.mxu1 %v1205_v0  ;;  %842 = vmatprep.mubr.bf16.mxu1 %v1239_v56 }
  0xe7   : > { %812 = vmatprep.subr.bf16.mxu1 %v1210_v4 }
  0xe8   : > { %v1138_v13 = vpop.f32.mrf.mxu0 }
  0xea   : > { %v391_v14 = vpop.f32.mrf.mxu0  ;;  %813 = vmatpush1.bf16.msra.mxu1 %v1208_v8 }
  0xeb   : > { %v395_v15 = vpack.c.bf16 %v391_v14, %v388_v6  ;;  %814 = vmatprep.subr.bf16.mxu1 %v1213_v12 }
  0xec   : > { %v1139_v17 = vpop.f32.mrf.mxu0 }
  0xed   : > { %526 = vmatmul.mubr.bf16.vlgmr.msra.gmra.mxu0 %v395_v15 }
  0xee   : > { %1141 = vmatpush3.bf16.msra.mxu0 %v1333_v31  ;;  %1142 = vmatprep.mubr.msk.bf16.mxu0 %vm1238_vm0, %v1237_v1  ;;  %v1217_v1 = vld [vmem:[%s1491_s3 + $0x130] ss:$8 sps:$4 sm:$0xff]  }
  0xef   : > { %815 = vmatpush1.bf16.msra.mxu1 %v1211_v16 }
  0xf0   : > { %816 = vmatprep.subr.bf16.mxu1 %v1216_v10 }
  0xf3   : > { %817 = vmatpush1.bf16.msra.mxu1 %v1214_v20 }
  0xf4   : > { %818 = vmatprep.subr.bf16.mxu1 %v1219_v21 }
  0xf5   : > { %1143 = vmatmul.mubr.msk.bf16.vlgmr.msra.gmra.mxu0 %vm282_vm5, %v667_v19 }
  0xf7   : > { %819 = vmatpush1.bf16.msra.mxu1 %v1217_v1 }
  0xf8   : > { %820 = vmatprep.subr.bf16.mxu1 %v1222_v22 }
  0xfb   : > { %821 = vmatpush1.bf16.msra.mxu1 %v1220_v23 }
  0xfc   : > { %822 = vmatprep.subr.bf16.mxu1 %v1225_v24 }
  0xff   : > { %823 = vmatpush1.bf16.msra.mxu1 %v1223_v25 }
 0x100   : > { %824 = vmatprep.subr.bf16.mxu1 %v1228_v26 }
 0x103   : > { %825 = vmatpush1.bf16.msra.mxu1 %v1226_v27 }
 0x1a5   : > { %v650_v37 = vpop.f32.mrf.mxu1 }
 0x1a7   : > { %v652_v38 = vpop.f32.mrf.mxu1 }
 0x1a9   : > { %v654_v39 = vpop.f32.mrf.mxu1 }
 0x1ab   : > { %v656_v40 = vpop.f32.mrf.mxu1 }
 0x1ad   : > { %v527_v28 = vpop.f32.mrf.mxu0 }
 0x1ae   : > { %v651_v42 = vadd.f32 %v650_v37, %v527_v28 }
 0x1af   : > { %v529_v29 = vpop.f32.mrf.mxu0 }
 0x1b0   : > { %v653_v43 = vadd.f32 %v652_v38, %v529_v29 }
 0x1b1   : > { %v531_v30 = vpop.f32.mrf.mxu0 }
 0x1b2   : > { %v655_v45 = vadd.f32 %v654_v39, %v531_v30 }
 0x1b3   : > { %v533_v31 = vpop.f32.mrf.mxu0 }
 0x1b4   : > { %v657_v49 = vadd.f32 %v656_v40, %v533_v31 }
 0x1b5   : > { %v705_v32 = vpop.f32.mrf.mxu0 }
 0x1b7   : > { %v1144_v33 = vpop.f32.mrf.mxu0 }
 0x1b9   : > { %v708_v34 = vpop.f32.mrf.mxu0 }
 0x1ba   : > { %v712_v35 = vpack.c.bf16 %v708_v34, %v705_v32 }
 0x1bb   : > { %v1145_v36 = vpop.f32.mrf.mxu0 }
 0x1bc   : > { %843 = vmatmul.mubr.bf16.vlgmr.msra.gmra.mxu1 %v712_v35 }
 0x27c   : > { %v844_v41 = vpop.f32.mrf.mxu1 }
 0x27d   : > { %v853_v46 = vadd.f32 %v844_v41, %v651_v42 }
 0x27e   : > { %v846_v44 = vpop.f32.mrf.mxu1 }
 0x27f   : > { %v854_v47 = vadd.f32 %v846_v44, %v653_v43  ;;  %v885_v53 = vmul.f32 %v853_v46, %v853_v46 }
 0x280   : > { %v848_v48 = vpop.f32.mrf.mxu1 }
 0x281   : > { %v1116_v50 = vpack.c.bf16 %v854_v47, %v853_v46  ;;  %v855_v51 = vadd.f32 %v848_v48, %v655_v45  ;;  %v886_v61 = vmul.f32 %v854_v47, %v854_v47 }
 0x282   : > { %v850_v52 = vpop.f32.mrf.mxu1 }
 0x283   : > { %869 = vst [vmem:[%s232_s10] sm:$0xff] %v1116_v50  ;;  %v871_v54 = vadd.f32 %v855_v51, %v853_v46  ;;  %v887_v55 = vmul.f32 %v855_v51, %v855_v51  ;;  %v856_v56 = vadd.f32 %v850_v52, %v657_v49 }
 0x285   : > { %v872_v57 = vrot.slane %v871_v54, 4  ;;  %v889_v58 = vadd.f32 %v887_v55, %v885_v53  ;;  %v1117_v59 = vpack.c.bf16 %v856_v56, %v855_v51  ;;  %v878_v60 = vadd.f32 %v856_v56, %v854_v47 }
 0x286   : > { %v888_v62 = vmul.f32 %v856_v56, %v856_v56 }
 0x287   : > { %v873_v63 = vadd.f32 %v872_v57, %v871_v54  ;;  %v890_v0 = vrot.slane %v889_v58, 4  ;;  %870 = vst [vmem:[%s232_s10 + $0x8] sm:$0xff] %v1117_v59  ;;  %v879_v2 = vrot.slane %v878_v60, 4 }
 0x288   : > { %v896_v4 = vadd.f32 %v888_v62, %v886_v61 }
 0x289   : > { %v874_v5 = vrot.slane %v873_v63, 2  ;;  %v891_v6 = vadd.f32 %v890_v0, %v889_v58  ;;  %v880_v8 = vadd.f32 %v879_v2, %v878_v60 }
 0x28a   : > { %v897_v9 = vrot.slane %v896_v4, 4 }
 0x28b   : > { %v875_v11 = vadd.f32 %v874_v5, %v873_v63  ;;  %v892_v12 = vrot.slane %v891_v6, 2  ;;  %v881_v13 = vrot.slane %v880_v8, 2 }
 0x28c   : > { %v898_v14 = vadd.f32 %v897_v9, %v896_v4 }
 0x28d   : > { %v876_v15 = vrot.slane %v875_v11, 1  ;;  %v893_v16 = vadd.f32 %v892_v12, %v891_v6  ;;  %v882_v17 = vadd.f32 %v881_v13, %v880_v8 }
 0x28e   : > { %v899_v7 = vrot.slane %v898_v14, 2 }
 0x28f   : > { %v894_v18 = vrot.slane %v893_v16, 1  ;;  %v883_v19 = vrot.slane %v882_v17, 1  ;;  %v877_v20 = vadd.f32 %v876_v15, %v875_v11 }
 0x290   : > { %v900_v10 = vadd.f32 %v899_v7, %v898_v14 }
 0x291   : > { %v895_v21 = vadd.f32 %v894_v18, %v893_v16  ;;  %v884_v23 = vadd.f32 %v883_v19, %v882_v17 }
 0x292   : > { %v901_v1 = vrot.slane %v900_v10, 1 }
 0x293   : > { %v904_v22 = vsel %vm903_vm10, %v877_v20, %v895_v21 }
 0x294   : > { %v902_v24 = vadd.f32 %v901_v1, %v900_v10 }
 0x296   : > { %v905_v25 = vsel %vm903_vm10, %v884_v23, %v902_v24 }
 0x297   : > { %v908_v26 = vcombine.low %v904_v22, %v905_v25 }
 0x299   : > { %1110 = vst.sshfl [vmem:[%s237_s14] sm:$0x33 pattern:$0x76325410] %v908_v26 }
 0x29a PF: > { %s16_s18 = sadd.s32 1, %s1235_s18  }
 0x29b   : > { %p13_p4 = scmp.ge.s32.totalorder %s16_s18, 4  }
 0x29d   :  { %15 = sbr.rel (!%p13_p4) target bundleno = 1 (0x1), region = 80 }

// kernel: forward.11
= control target key start
LH: loop header
LB: loop body
LE: loop exit
PB: predicated region body
PF: predicated region fallthrough
CT: control target
= control target key end

     0   :  { %s698_s18 = smov 0   ;;  %s782_s0 = inlined_call_operand.vmem [shape: bf16[2,16,256], index: 0, kind: input, shape index: {}]   ;;  %s783_s1 = inlined_call_operand.vmem [shape: f32[1,256], index: 1, kind: input, shape index: {}]   ;;  %s784_s2 = inlined_call_operand.vmem [shape: f32[1,256], index: 2, kind: input, shape index: {}]   ;;  %s785_s3 = inlined_call_operand.vmem [shape: bf16[1,256,128], index: 3, kind: input, shape index: {}]   ;;  %s786_s4 = inlined_call_operand.vmem [shape: bf16[2,16,128], index: 4, kind: output, shape index: {0}]   ;;  %s787_s5 = inlined_call_operand.vmem [shape: f32[2,2,128], index: 5, kind: output, shape index: {1}]  }
   0x1 LB: > { %s575_s19 = sadd.s32 4294967295, %s666_s18   ;;  %p579_p0 = scmp.ge.s32.totalorder %s666_s18, 1  ;;  %s666_s18 = sphi %s698_s18, %s16_s18  }
   0x2   : > { %p190_p1 = scmp.lt.s32.totalorder %s666_s18, 3 }
   0x4   : > { %p191_p2 = pnand %p579_p0, %p190_p1 }
   0x5   : > { %p222_p3 = scmp.lt.s32.totalorder (!%p191_p2), %s575_s19, 1 }
   0x6   : > { %194 = sbr.rel (%p191_p2) target bundleno = 263 (0x107), region = 36 }
   0xb   : > { %v644_v0 = vld [vmem:[%s785_s3 + $0x78] sm:$0xff]   ;;  %v646_v2 = vld [vmem:[%s785_s3 + $0x70] sm:$0xff]   ;;  %v648_v4 = vld [vmem:[%s785_s3 + $0x68] sm:$0xff]   ;;  %v245_v5 = vlaneseq  ;;  %s789_s19 = smov (!%p222_p3, %s575_s19), 1 }
   0xc   : > { %v645_v1 = vld [vmem:[%s785_s3 + $0x38] sm:$0xff]   ;;  %614 = vmatprep.subr.bf16.mxu0 %v644_v0  ;;  %v647_v3 = vld [vmem:[%s785_s3 + $0x30] sm:$0xff]   ;;  %v649_v6 = vld [vmem:[%s785_s3 + $0x28] sm:$0xff]   ;;  %s605_s9 = sshll.u32 %s789_s19, 4  ;;  %s606_s12 = sshll.u32 %s789_s19, 3 }
   0xd   : > { %615 = vmatpush3.bf16.msra.mxu0 %v645_v1  ;;  %v650_v7 = vld [vmem:[%s785_s3 + $0x60] sm:$0xff]   ;;  %v729_v8 = vshrl.u32 %v245_v5, 7  ;;  %v652_v10 = vld [vmem:[%s785_s3 + $0x58] sm:$0xff]   ;;  %s226_s16 = scalar_lea.vmem %s782_s0, %s605_s9  ;;  %v654_v14 = vld [vmem:[%s785_s3 + $0x50] sm:$0xff]   ;;  %s231_s15 = scalar_lea.vmem %s786_s4, %s606_s12 }
   0xe   : > { %616 = vmatprep.subr.bf16.mxu0 %v646_v2  ;;  %v651_v9 = vld [vmem:[%s785_s3 + $0x20] sm:$0xff]   ;;  %v653_v12 = vld [vmem:[%s785_s3 + $0x18] sm:$0xff]   ;;  %v238_v16 = vld [vmem:[%s226_s16 + $0x8] sm:$0xff] }
   0xf   : > { %v247_v11 = vsub.s32 0, %v729_v8  ;;  %v251_v13 = vsub.s32 1, %v729_v8  ;;  %v237_v15 = vld [vmem:[%s226_s16] sm:$0xff]  ;;  %v241_v20 = vunpack.c.l.bf16 %v238_v16  ;;  %v242_v21 = vunpack.c.h.bf16 %v238_v16  ;;  %v655_v27 = vld [vmem:[%s785_s3 + $0x10] sm:$0xff]   ;;  %v656_v28 = vld [vmem:[%s785_s3 + $0x48] sm:$0xff]   ;;  %s584_s16 = sshll.u32 %s789_s19, 1 }
  0x10   : > { %v243_v17 = vld [vmem:[%s783_s1] sm:$0x3]  ;;  %v239_v18 = vunpack.c.l.bf16 %v237_v15  ;;  %v240_v19 = vunpack.c.h.bf16 %v237_v15  ;;  %v657_v37 = vld [vmem:[%s785_s3 + $0x8] sm:$0xff]   ;;  %vm486_vm4 = vcmp.eq.s32.totalorder %v729_v8, 0  ;;  %s235_s21 = scalar_lea.vmem %s787_s5, %s584_s16 }
  0x11   : > { %617 = vmatpush3.bf16.msra.mxu0 %v647_v3  ;;  %v259_v22 = vld [vmem:[%s784_s2] sm:$0x3]  ;;  %v248_v23 = vrot.slane %v243_v17, %v247_v11  ;;  %v252_v24 = vrot.slane %v243_v17, %v251_v13 }
  0x12   : > { %618 = vmatprep.subr.bf16.mxu0 %v648_v4  ;;  %v264_v25 = vrot.slane %v259_v22, %v247_v11  ;;  %v268_v26 = vrot.slane %v259_v22, %v251_v13  ;;  %v658_v38 = vld [vmem:[%s785_s3 + $0x40] sm:$0xff]  }
  0x13   : > { %v256_v29 = vmul.f32 %v252_v24, %v240_v19  ;;  %v258_v30 = vmul.f32 %v252_v24, %v242_v21  ;;  %v255_v31 = vmul.f32 %v248_v23, %v239_v18  ;;  %v257_v32 = vmul.f32 %v248_v23, %v241_v20  ;;  %v659_v45 = vld [vmem:[%s785_s3] sm:$0xff]  }
  0x15   : > { %619 = vmatpush3.bf16.msra.mxu0 %v649_v6  ;;  %v272_v33 = vadd.f32 %v268_v26, %v256_v29  ;;  %v274_v34 = vadd.f32 %v268_v26, %v258_v30  ;;  %v271_v35 = vadd.f32 %v264_v25, %v255_v31  ;;  %v273_v36 = vadd.f32 %v264_v25, %v257_v32 }
  0x16   : > { %620 = vmatprep.subr.bf16.mxu0 %v650_v7 }
  0x17   : > { %vm276_vm0 = vcmp.ge.f32.partialorder %v272_v33, 0.0  ;;  %vm278_vm1 = vcmp.ge.f32.partialorder %v274_v34, 0.0  ;;  %v280_v39 = vmul.f32 0.1, %v272_v33  ;;  %v282_v40 = vmul.f32 0.1, %v274_v34 }
  0x18   : > { %vm275_vm2 = vcmp.ge.f32.partialorder %v271_v35, 0.0  ;;  %vm277_vm3 = vcmp.ge.f32.partialorder %v273_v36, 0.0  ;;  %v279_v41 = vmul.f32 0.1, %v271_v35  ;;  %v281_v42 = vmul.f32 0.1, %v273_v36 }
  0x19   : > { %621 = vmatpush3.bf16.msra.mxu0 %v651_v9  ;;  %v284_v43 = vsel %vm276_vm0, %v272_v33, %v280_v39  ;;  %v286_v44 = vsel %vm278_vm1, %v274_v34, %v282_v40 }
  0x1a   : > { %622 = vmatprep.subr.bf16.mxu0 %v652_v10  ;;  %v288_v46 = vpack.c.bf16 %v286_v44, %v284_v43  ;;  %v283_v47 = vsel %vm275_vm2, %v271_v35, %v279_v41  ;;  %v285_v48 = vsel %vm277_vm3, %v273_v36, %v281_v42 }
  0x1b   : > { %v287_v49 = vpack.c.bf16 %v285_v48, %v283_v47 }
  0x1c   : > { %449 = vmatprep.mubr.bf16.mxu0 %v288_v46 }
  0x1d   : > { %623 = vmatpush3.bf16.msra.mxu0 %v653_v12 }
  0x1e   : > { %624 = vmatprep.subr.bf16.mxu0 %v654_v14 }
  0x21   : > { %625 = vmatpush3.bf16.msra.mxu0 %v655_v27 }
  0x22   : > { %626 = vmatprep.subr.bf16.mxu0 %v656_v28 }
  0x25   : > { %627 = vmatpush3.bf16.msra.mxu0 %v657_v37 }
  0x26   : > { %628 = vmatprep.subr.bf16.mxu0 %v658_v38 }
  0x29   : > { %629 = vmatpush3.bf16.msra.mxu0 %v659_v45 }
  0x2c   : > { %450 = vmatmul.mubr.bf16.vlgmr.msra.gmra.mxu0 %v287_v49 }
  0xec   : > { %v630_v50 = vpop.f32.mrf.mxu0 }
  0xee   : > { %v631_v51 = vpop.f32.mrf.mxu0 }
  0xef   : > { %v632_v53 = vadd.f32 %v631_v51, %v630_v50 }
  0xf0   : > { %v633_v52 = vpop.f32.mrf.mxu0 }
  0xf1   : > { %v475_v56 = vmul.f32 %v632_v53, %v632_v53 }
  0xf2   : > { %v634_v54 = vpop.f32.mrf.mxu0 }
  0xf3   : > { %v635_v55 = vadd.f32 %v634_v54, %v633_v52 }
  0xf5   : > { %v612_v57 = vpack.c.bf16 %v635_v55, %v632_v53  ;;  %v468_v58 = vadd.f32 %v635_v55, %v632_v53  ;;  %v476_v59 = vmul.f32 %v635_v55, %v635_v55 }
  0xf7   : > { %613 = vst [vmem:[%s231_s15] sm:$0xff] %v612_v57   ;;  %v469_v60 = vrot.slane %v468_v58, 4  ;;  %v477_v61 = vadd.f32 %v476_v59, %v475_v56 }
  0xf9   : > { %v470_v62 = vadd.f32 %v469_v60, %v468_v58  ;;  %v478_v63 = vrot.slane %v477_v61, 4 }
  0xfb   : > { %v471_v0 = vrot.slane %v470_v62, 2  ;;  %v479_v1 = vadd.f32 %v478_v63, %v477_v61 }
  0xfd   : > { %v472_v2 = vadd.f32 %v471_v0, %v470_v62  ;;  %v480_v3 = vrot.slane %v479_v1, 2 }
  0xff   : > { %v473_v4 = vrot.slane %v472_v2, 1  ;;  %v481_v5 = vadd.f32 %v480_v3, %v479_v1 }
 0x101   : > { %v482_v6 = vrot.slane %v481_v5, 1  ;;  %v474_v7 = vadd.f32 %v473_v4, %v472_v2 }
 0x103   : > { %v483_v9 = vadd.f32 %v482_v6, %v481_v5 }
 0x105   : > { %v487_v10 = vsel %vm486_vm4, %v474_v7, %v483_v9 }
 0x106   : > { %488 = vst [vmem:[%s235_s21] sm:$0x3] %v487_v10 }
 0x107 PF: > { %s16_s18 = sadd.s32 1, %s666_s18  }
 0x108   : > { %p13_p4 = scmp.ge.s32.totalorder %s16_s18, 4  }
 0x10a   :  { %15 = sbr.rel (!%p13_p4) target bundleno = 1 (0x1), region = 78 }

// kernel: forward.13
= control target key start
LH: loop header
LB: loop body
LE: loop exit
PB: predicated region body
PF: predicated region fallthrough
CT: control target
= control target key end

     0   :  { %s1710_s18 = smov 0   ;;  %s2080_s0 = inlined_call_operand.vmem [shape: bf16[2,16,256], index: 0, kind: input, shape index: {}]   ;;  %s2081_s1 = inlined_call_operand.vmem [shape: f32[1,256], index: 1, kind: input, shape index: {}]   ;;  %s2082_s2 = inlined_call_operand.vmem [shape: f32[1,256], index: 2, kind: input, shape index: {}]   ;;  %s2083_s3 = inlined_call_operand.vmem [shape: bf16[3,256,256], index: 3, kind: input, shape index: {}]   ;;  %s2084_s4 = inlined_call_operand.vmem [shape: bf16[2,16,256], index: 4, kind: output, shape index: {0}]   ;;  %s2085_s5 = inlined_call_operand.vmem [shape: f32[2,2,256], index: 5, kind: output, shape index: {1}]  }
   0x1 LB: > { %s1326_s19 = sadd.s32 4294967295, %s1676_s18   ;;  %p1330_p0 = scmp.ge.s32.totalorder %s1676_s18, 1  ;;  %s1676_s18 = sphi %s1710_s18, %s16_s18  }
   0x2   : > { %p190_p1 = scmp.lt.s32.totalorder %s1676_s18, 3 }
   0x4   : > { %p191_p2 = pnand %p1330_p0, %p190_p1 }
   0x5   : > { %p223_p3 = scmp.lt.s32.totalorder (!%p191_p2), %s1326_s19, 1 }
   0x6   : > { %194 = sbr.rel (%p191_p2) target bundleno = 674 (0x2a2), region = 36 }
   0xb   : > { %v247_v0 = vlaneseq  ;;  %v245_v1 = vld [vmem:[%s2081_s1] sm:$0x3]  ;;  %v1678_v3 = vmov 0   ;;  %v1526_v4 = vld [vmem:[%s2083_s3 + $0x74] ss:$8 sps:$4 sm:$0xff]   ;;  %s2087_s19 = smov (!%p223_p3, %s1326_s19), 1 }
   0xc   : > { %v261_v2 = vld [vmem:[%s2082_s2] sm:$0x3]  ;;  %341 = vmatprep.mubr.bf16.mxu0 %v1678_v3  ;;  %v1528_v6 = vld [vmem:[%s2083_s3 + $0x70] ss:$8 sps:$4 sm:$0xff]   ;;  %837 = vmatprep.subr.bf16.mxu1 %v1526_v4  ;;  %v1529_v7 = vld [vmem:[%s2083_s3 + $0x64] ss:$8 sps:$4 sm:$0xff]  }
   0xd   : > { %v1730_v5 = vshrl.u32 %v247_v0, 7  ;;  %v1531_v8 = vld [vmem:[%s2083_s3 + $0x60] ss:$8 sps:$4 sm:$0xff]   ;;  %s1511_s7 = sshll.u32 %s2087_s19, 4  ;;  %838 = vmatpush1.bf16.msra.mxu1 %v1528_v6  ;;  %v1752_v12 = vand.u32 127, %v247_v0  ;;  %v1679_v43 = vmov 0.0  }
   0xe   : > { %s227_s10 = scalar_lea.vmem %s2080_s0, %s1511_s7  ;;  %839 = vmatprep.subr.bf16.mxu1 %v1529_v7  ;;  %v1535_v23 = vld [vmem:[%s2083_s3 + $0x54] ss:$8 sps:$4 sm:$0xff]   ;;  %v1537_v26 = vld [vmem:[%s2083_s3 + $0x50] ss:$8 sps:$4 sm:$0xff]   ;;  %v1541_v31 = vld [vmem:[%s2083_s3 + $0x44] ss:$8 sps:$4 sm:$0xff]   ;;  %s232_s23 = scalar_lea.vmem %s2084_s4, %s1511_s7 }
   0xf   : > { %v253_v9 = vsub.s32 1, %v1730_v5  ;;  %v249_v10 = vsub.s32 0, %v1730_v5  ;;  %v1745_v11 = vadd.s32 8, %v1730_v5  ;;  %v239_v13 = vld [vmem:[%s227_s10] sm:$0xff]  ;;  %v240_v14 = vld [vmem:[%s227_s10 + $0x8] sm:$0xff]  ;;  %v296_v24 = vadd.s32 4294967295, %v1730_v5 }
  0x10   : > { %v242_v19 = vunpack.c.h.bf16 %v239_v13  ;;  %v244_v20 = vunpack.c.h.bf16 %v240_v14  ;;  %v241_v21 = vunpack.c.l.bf16 %v239_v13  ;;  %v243_v22 = vunpack.c.l.bf16 %v240_v14  ;;  %v1543_v36 = vld [vmem:[%s2083_s3 + $0x40] ss:$8 sps:$4 sm:$0xff]   ;;  %v1547_v46 = vld [vmem:[%s2083_s3 + $0x34] ss:$8 sps:$4 sm:$0xff]   ;;  %v1549_v50 = vld [vmem:[%s2083_s3 + $0x30] ss:$8 sps:$4 sm:$0xff]  }
  0x11   : > { %v254_v15 = vrot.slane %v245_v1, %v253_v9  ;;  %v270_v16 = vrot.slane %v261_v2, %v253_v9  ;;  %v250_v17 = vrot.slane %v245_v1, %v249_v10  ;;  %v266_v18 = vrot.slane %v261_v2, %v249_v10  ;;  %840 = vmatpush1.bf16.msra.mxu1 %v1531_v8  ;;  %v1553_v52 = vld [vmem:[%s2083_s3 + $0x24] ss:$8 sps:$4 sm:$0xff]   ;;  %v1534_v54 = vld [vmem:[%s2083_s3 + $0x174] ss:$8 sps:$4 sm:$0xff]   ;;  %v1555_v55 = vld [vmem:[%s2083_s3 + $0x20] ss:$8 sps:$4 sm:$0xff]  }
  0x12   : > { %v297_v25 = vadd.s32 4294967295, %v1745_v11  ;;  %841 = vmatprep.subr.bf16.mxu1 %v1535_v23  ;;  %vm298_vm0 = vcmp.eq.s32.totalorder %v1752_v12, %v296_v24  ;;  %vm305_vm6 = vcmask 130048   ;;  %vm386_vm7 = vcmp.eq.s32.totalorder %v1752_v12, %v1730_v5  ;;  %v1559_v56 = vld [vmem:[%s2083_s3 + $0x14] ss:$8 sps:$4 sm:$0xff]   ;;  %v1561_v59 = vld [vmem:[%s2083_s3 + $0x10] ss:$8 sps:$4 sm:$0xff]  }
  0x13   : > { %v258_v27 = vmul.f32 %v254_v15, %v242_v19  ;;  %v260_v28 = vmul.f32 %v254_v15, %v244_v20  ;;  %v257_v29 = vmul.f32 %v250_v17, %v241_v21  ;;  %v259_v30 = vmul.f32 %v250_v17, %v243_v22  ;;  %v1565_v60 = vld [vmem:[%s2083_s3 + $0x4] ss:$8 sps:$4 sm:$0xff]   ;;  %v1532_v62 = vld [vmem:[%s2083_s3 + $0x170] ss:$8 sps:$4 sm:$0xff]   ;;  %v1567_v0 = vld [vmem:[%s2083_s3] ss:$8 sps:$4 sm:$0xff]  }
  0x14   : > { %vm299_vm1 = vcmp.eq.s32.totalorder %v1752_v12, %v297_v25  ;;  %v1337_v44 = vsel %vm298_vm0, 1.0, %v1679_v43  ;;  %vm387_vm8 = vcmp.eq.s32.totalorder %v1752_v12, %v1745_v11  ;;  %v1340_v57 = vsel %vm386_vm7, 1.0, %v1679_v43  ;;  %v1540_v63 = vld [vmem:[%s2083_s3 + $0x164] ss:$8 sps:$4 sm:$0xff]   ;;  %v1571_v1 = vld [vmem:[%s2083_s3 + $0xf4] ss:$8 sps:$4 sm:$0xff]  }
  0x15   : > { %v274_v32 = vadd.f32 %v270_v16, %v258_v27  ;;  %v276_v33 = vadd.f32 %v270_v16, %v260_v28  ;;  %v273_v34 = vadd.f32 %v266_v18, %v257_v29  ;;  %v275_v35 = vadd.f32 %v266_v18, %v259_v30  ;;  %842 = vmatpush1.bf16.msra.mxu1 %v1537_v26  ;;  %v1538_v2 = vld [vmem:[%s2083_s3 + $0x160] ss:$8 sps:$4 sm:$0xff]   ;;  %v1546_v4 = vld [vmem:[%s2083_s3 + $0x154] ss:$8 sps:$4 sm:$0xff]   ;;  %v1573_v6 = vld [vmem:[%s2083_s3 + $0xf0] ss:$8 sps:$4 sm:$0xff]  }
  0x16   : > { %843 = vmatprep.subr.bf16.mxu1 %v1541_v31  ;;  %v1338_v45 = vsel %vm299_vm1, 1.0, %v1679_v43  ;;  %v1341_v58 = vsel %vm387_vm8, 1.0, %v1679_v43  ;;  %v1577_v7 = vld [vmem:[%s2083_s3 + $0xe4] ss:$8 sps:$4 sm:$0xff]   ;;  %v1544_v8 = vld [vmem:[%s2083_s3 + $0x150] ss:$8 sps:$4 sm:$0xff]  }
  0x17   : > { %vm278_vm2 = vcmp.ge.f32.partialorder %v274_v32, 0.0  ;;  %vm280_vm3 = vcmp.ge.f32.partialorder %v276_v33, 0.0  ;;  %v282_v37 = vmul.f32 0.1, %v274_v32  ;;  %v284_v38 = vmul.f32 0.1, %v276_v33 }
  0x18   : > { %vm277_vm4 = vcmp.ge.f32.partialorder %v273_v34, 0.0  ;;  %vm279_vm5 = vcmp.ge.f32.partialorder %v275_v35, 0.0  ;;  %v281_v39 = vmul.f32 0.1, %v273_v34  ;;  %v283_v40 = vmul.f32 0.1, %v275_v35 }
  0x19   : > { %v286_v41 = vsel %vm278_vm2, %v274_v32, %v282_v37  ;;  %v288_v42 = vsel %vm280_vm3, %v276_v33, %v284_v38  ;;  %844 = vmatpush1.bf16.msra.mxu1 %v1543_v36  ;;  %v304_v53 = vpack.c.bf16 %v1338_v45, %v1337_v44  ;;  %v392_v61 = vpack.c.bf16 %v1341_v58, %v1340_v57  ;;  %v1552_v9 = vld [vmem:[%s2083_s3 + $0x144] ss:$8 sps:$4 sm:$0xff]   ;;  %v1579_v10 = vld [vmem:[%s2083_s3 + $0xe0] ss:$8 sps:$4 sm:$0xff]   ;;  %v1583_v14 = vld [vmem:[%s2083_s3 + $0xd4] ss:$8 sps:$4 sm:$0xff]  }
  0x1a   : > { %v1779_v47 = vpack.c.bf16 %v288_v42, %v286_v41  ;;  %v285_v48 = vsel %vm277_vm4, %v273_v34, %v281_v39  ;;  %v287_v49 = vsel %vm279_vm5, %v275_v35, %v283_v40  ;;  %845 = vmatprep.subr.bf16.mxu1 %v1547_v46  ;;  %v1550_v13 = vld [vmem:[%s2083_s3 + $0x140] ss:$8 sps:$4 sm:$0xff]   ;;  %v1558_v15 = vld [vmem:[%s2083_s3 + $0x134] ss:$8 sps:$4 sm:$0xff]   ;;  %v1585_v16 = vld [vmem:[%s2083_s3 + $0xd0] ss:$8 sps:$4 sm:$0xff]  }
  0x1b   : > { %v1784_v51 = vpack.c.bf16 %v287_v49, %v285_v48  ;;  %v1589_v17 = vld [vmem:[%s2083_s3 + $0xc4] ss:$8 sps:$4 sm:$0xff]   ;;  %v1556_v18 = vld [vmem:[%s2083_s3 + $0x130] ss:$8 sps:$4 sm:$0xff]   ;;  %v1591_v20 = vld [vmem:[%s2083_s3 + $0xc0] ss:$8 sps:$4 sm:$0xff]  }
  0x1c   : > { %323 = vmatprep.subr.bf16.mxu0 %v1779_v47  ;;  %v1564_v19 = vld [vmem:[%s2083_s3 + $0x124] ss:$8 sps:$4 sm:$0xff]   ;;  %v1595_v21 = vld [vmem:[%s2083_s3 + $0xb4] ss:$8 sps:$4 sm:$0xff]   ;;  %v1562_v22 = vld [vmem:[%s2083_s3 + $0x120] ss:$8 sps:$4 sm:$0xff]  }
  0x1d   : > { %324 = vmatpush1.bf16.msra.mxu0 %v1784_v51  ;;  %846 = vmatpush1.bf16.msra.mxu1 %v1549_v50  ;;  %v1570_v23 = vld [vmem:[%s2083_s3 + $0x114] ss:$8 sps:$4 sm:$0xff]   ;;  %v1597_v24 = vld [vmem:[%s2083_s3 + $0xb0] ss:$8 sps:$4 sm:$0xff]   ;;  %v1601_v25 = vld [vmem:[%s2083_s3 + $0xa4] ss:$8 sps:$4 sm:$0xff]  }
  0x1e   : > { %410 = vmatprep.subr.bf16.mxu0 %v1779_v47  ;;  %847 = vmatprep.subr.bf16.mxu1 %v1553_v52  ;;  %v1568_v26 = vld [vmem:[%s2083_s3 + $0x110] ss:$8 sps:$4 sm:$0xff]   ;;  %v1576_v27 = vld [vmem:[%s2083_s3 + $0x104] ss:$8 sps:$4 sm:$0xff]   ;;  %v1603_v28 = vld [vmem:[%s2083_s3 + $0xa0] ss:$8 sps:$4 sm:$0xff]  }
  0x1f   : > { %v1574_v29 = vld [vmem:[%s2083_s3 + $0x100] ss:$8 sps:$4 sm:$0xff]   ;;  %v1582_v30 = vld [vmem:[%s2083_s3 + $0x1f4] ss:$8 sps:$4 sm:$0xff]   ;;  %v1580_v31 = vld [vmem:[%s2083_s3 + $0x1f0] ss:$8 sps:$4 sm:$0xff]  }
  0x20   : > { %1339 = vmatmul.mubr.msk.bf16.vlgmr.msra.gmra.mxu0 %vm305_vm6, %v304_v53  ;;  %v1588_v32 = vld [vmem:[%s2083_s3 + $0x1e4] ss:$8 sps:$4 sm:$0xff]   ;;  %v1586_v33 = vld [vmem:[%s2083_s3 + $0x1e0] ss:$8 sps:$4 sm:$0xff]   ;;  %v1594_v34 = vld [vmem:[%s2083_s3 + $0x1d4] ss:$8 sps:$4 sm:$0xff]  }
  0x21   : > { %411 = vmatpush1.bf16.msra.mxu0 %v1784_v51  ;;  %428 = vmatprep.mubr.bf16.mxu0 %v1678_v3  ;;  %v1592_v35 = vld [vmem:[%s2083_s3 + $0x1d0] ss:$8 sps:$4 sm:$0xff]   ;;  %v1600_v36 = vld [vmem:[%s2083_s3 + $0x1c4] ss:$8 sps:$4 sm:$0xff]   ;;  %v1598_v37 = vld [vmem:[%s2083_s3 + $0x1c0] ss:$8 sps:$4 sm:$0xff]  }
  0x22   : > { %634 = vmatprep.subr.bf16.mxu0 %v1534_v54  ;;  %848 = vmatpush1.bf16.msra.mxu1 %v1555_v55  ;;  %v1606_v38 = vld [vmem:[%s2083_s3 + $0x1b4] ss:$8 sps:$4 sm:$0xff]   ;;  %v1604_v40 = vld [vmem:[%s2083_s3 + $0x1b0] ss:$8 sps:$4 sm:$0xff]   ;;  %v1612_v42 = vld [vmem:[%s2083_s3 + $0x1a4] ss:$8 sps:$4 sm:$0xff]  }
  0x23   : > { %849 = vmatprep.subr.bf16.mxu1 %v1559_v56  ;;  %v1607_v39 = vld [vmem:[%s2083_s3 + $0x94] ss:$8 sps:$4 sm:$0xff]   ;;  %v1609_v41 = vld [vmem:[%s2083_s3 + $0x90] ss:$8 sps:$4 sm:$0xff]   ;;  %v1613_v44 = vld [vmem:[%s2083_s3 + $0x84] ss:$8 sps:$4 sm:$0xff]  }
  0x24   : > { %v1610_v45 = vld [vmem:[%s2083_s3 + $0x1a0] ss:$8 sps:$4 sm:$0xff]   ;;  %v1618_v48 = vld [vmem:[%s2083_s3 + $0x194] ss:$8 sps:$4 sm:$0xff]   ;;  %v1616_v49 = vld [vmem:[%s2083_s3 + $0x190] ss:$8 sps:$4 sm:$0xff]  }
  0x25   : > { %v1615_v46 = vld [vmem:[%s2083_s3 + $0x80] ss:$8 sps:$4 sm:$0xff]   ;;  %v1621_v50 = vld [vmem:[%s2083_s3 + $0x184] ss:$8 sps:$4 sm:$0xff]   ;;  %v1624_v53 = vld [vmem:[%s2083_s3 + $0x274] ss:$8 sps:$4 sm:$0xff]  }
  0x26   : > { %850 = vmatpush1.bf16.msra.mxu1 %v1561_v59  ;;  %v1619_v52 = vld [vmem:[%s2083_s3 + $0x180] ss:$8 sps:$4 sm:$0xff]   ;;  %v1622_v59 = vld [vmem:[%s2083_s3 + $0x270] ss:$8 sps:$4 sm:$0xff]   ;;  %vm1223_vm11 = vcmp.eq.s32.totalorder %v1730_v5, 0  ;;  %s1513_s7 = sshll.u32 %s2087_s19, 2 }
  0x27   : > { %851 = vmatprep.subr.bf16.mxu1 %v1565_v60  ;;  %s237_s26 = scalar_lea.vmem %s2085_s5, %s1513_s7 }
  0x28   : > { %1342 = vmatmul.mubr.msk.bf16.vlgmr.msra.gmra.mxu0 %vm305_vm6, %v392_v61 }
  0x29   : > { %635 = vmatpush1.bf16.msra.mxu0 %v1532_v62 }
  0x2a   : > { %636 = vmatprep.subr.bf16.mxu0 %v1540_v63  ;;  %852 = vmatpush1.bf16.msra.mxu1 %v1567_v0  ;;  %v1625_v63 = vld [vmem:[%s2083_s3 + $0x260] ss:$8 sps:$4 sm:$0xff]  }
  0x2b   : > { %853 = vmatprep.subr.bf16.mxu1 %v1571_v1  ;;  %v880_v1 = vadd.s32 1, %v1730_v5 }
  0x2d   : > { %637 = vmatpush1.bf16.msra.mxu0 %v1538_v2  ;;  %v881_v2 = vadd.s32 1, %v1745_v11  ;;  %vm882_vm9 = vcmp.eq.s32.totalorder %v1752_v12, %v880_v1  ;;  %v1633_v11 = vld [vmem:[%s2083_s3 + $0x244] ss:$8 sps:$4 sm:$0xff]  }
  0x2e   : > { %638 = vmatprep.subr.bf16.mxu0 %v1546_v4  ;;  %854 = vmatpush2.bf16.msra.mxu1 %v1573_v6  ;;  %v1630_v4 = vld [vmem:[%s2083_s3 + $0x254] ss:$8 sps:$4 sm:$0xff]  }
  0x2f   : > { %855 = vmatprep.subr.bf16.mxu1 %v1577_v7  ;;  %vm883_vm10 = vcmp.eq.s32.totalorder %v1752_v12, %v881_v2  ;;  %v1631_v12 = vld [vmem:[%s2083_s3 + $0x240] ss:$8 sps:$4 sm:$0xff]  }
  0x31   : > { %639 = vmatpush1.bf16.msra.mxu0 %v1544_v8 }
  0x32   : > { %640 = vmatprep.subr.bf16.mxu0 %v1552_v9  ;;  %856 = vmatpush2.bf16.msra.mxu1 %v1579_v10  ;;  %v1628_v9 = vld [vmem:[%s2083_s3 + $0x250] ss:$8 sps:$4 sm:$0xff]   ;;  %v1439_v10 = vsel %vm882_vm9, 1.0, %v1679_v43 }
  0x33   : > { %857 = vmatprep.subr.bf16.mxu1 %v1583_v14  ;;  %v1636_v14 = vld [vmem:[%s2083_s3 + $0x234] ss:$8 sps:$4 sm:$0xff]  }
  0x35   : > { %641 = vmatpush1.bf16.msra.mxu0 %v1550_v13  ;;  %v1440_v13 = vsel %vm883_vm10, 1.0, %v1679_v43  ;;  %v1639_v43 = vld [vmem:[%s2083_s3 + $0x224] ss:$8 sps:$4 sm:$0xff]  }
  0x36   : > { %642 = vmatprep.subr.bf16.mxu0 %v1558_v15  ;;  %858 = vmatpush2.bf16.msra.mxu1 %v1585_v16  ;;  %v888_v15 = vpack.c.bf16 %v1440_v13, %v1439_v10  ;;  %v1642_v16 = vld [vmem:[%s2083_s3 + $0x214] ss:$8 sps:$4 sm:$0xff]  }
  0x37   : > { %859 = vmatprep.subr.bf16.mxu1 %v1589_v17  ;;  %v1640_v17 = vld [vmem:[%s2083_s3 + $0x210] ss:$8 sps:$4 sm:$0xff]  }
  0x39   : > { %643 = vmatpush1.bf16.msra.mxu0 %v1556_v18  ;;  %v1645_v18 = vld [vmem:[%s2083_s3 + $0x204] ss:$8 sps:$4 sm:$0xff]  }
  0x3a   : > { %644 = vmatprep.subr.bf16.mxu0 %v1564_v19  ;;  %860 = vmatpush2.bf16.msra.mxu1 %v1591_v20  ;;  %v1643_v19 = vld [vmem:[%s2083_s3 + $0x200] ss:$8 sps:$4 sm:$0xff]   ;;  %v1648_v20 = vld [vmem:[%s2083_s3 + $0x2f4] ss:$8 sps:$4 sm:$0xff]  }
  0x3b   : > { %861 = vmatprep.subr.bf16.mxu1 %v1595_v21  ;;  %v1646_v21 = vld [vmem:[%s2083_s3 + $0x2f0] ss:$8 sps:$4 sm:$0xff]  }
  0x3d   : > { %645 = vmatpush1.bf16.msra.mxu0 %v1562_v22  ;;  %v1651_v22 = vld [vmem:[%s2083_s3 + $0x2e4] ss:$8 sps:$4 sm:$0xff]  }
  0x3e   : > { %646 = vmatprep.subr.bf16.mxu0 %v1570_v23  ;;  %862 = vmatpush2.bf16.msra.mxu1 %v1597_v24  ;;  %v1649_v23 = vld [vmem:[%s2083_s3 + $0x2e0] ss:$8 sps:$4 sm:$0xff]   ;;  %v1654_v24 = vld [vmem:[%s2083_s3 + $0x2d4] ss:$8 sps:$4 sm:$0xff]  }
  0x3f   : > { %863 = vmatprep.subr.bf16.mxu1 %v1601_v25  ;;  %v1652_v25 = vld [vmem:[%s2083_s3 + $0x2d0] ss:$8 sps:$4 sm:$0xff]  }
  0x41   : > { %647 = vmatpush1.bf16.msra.mxu0 %v1568_v26  ;;  %v1657_v26 = vld [vmem:[%s2083_s3 + $0x2c4] ss:$8 sps:$4 sm:$0xff]  }
  0x42   : > { %648 = vmatprep.subr.bf16.mxu0 %v1576_v27  ;;  %864 = vmatpush2.bf16.msra.mxu1 %v1603_v28  ;;  %v1655_v27 = vld [vmem:[%s2083_s3 + $0x2c0] ss:$8 sps:$4 sm:$0xff]   ;;  %v1660_v28 = vld [vmem:[%s2083_s3 + $0x2b4] ss:$8 sps:$4 sm:$0xff]  }
  0x43   : > { %865 = vmatprep.subr.bf16.mxu1 %v1607_v39 }
  0x45   : > { %649 = vmatpush1.bf16.msra.mxu0 %v1574_v29  ;;  %v1658_v29 = vld [vmem:[%s2083_s3 + $0x2b0] ss:$8 sps:$4 sm:$0xff]  }
  0x46   : > { %650 = vmatprep.subr.bf16.mxu0 %v1582_v30  ;;  %866 = vmatpush2.bf16.msra.mxu1 %v1609_v41  ;;  %v1663_v30 = vld [vmem:[%s2083_s3 + $0x2a4] ss:$8 sps:$4 sm:$0xff]  }
  0x47   : > { %867 = vmatprep.subr.bf16.mxu1 %v1613_v44 }
  0x49   : > { %651 = vmatpush2.bf16.msra.mxu0 %v1580_v31  ;;  %v1661_v31 = vld [vmem:[%s2083_s3 + $0x2a0] ss:$8 sps:$4 sm:$0xff]  }
  0x4a   : > { %652 = vmatprep.subr.bf16.mxu0 %v1588_v32  ;;  %868 = vmatpush2.bf16.msra.mxu1 %v1615_v46  ;;  %v1666_v32 = vld [vmem:[%s2083_s3 + $0x294] ss:$8 sps:$4 sm:$0xff]  }
  0x4b   : > { %1130 = vmatprep.subr.bf16.mxu1 %v1624_v53 }
  0x4d   : > { %653 = vmatpush2.bf16.msra.mxu0 %v1586_v33  ;;  %v1664_v33 = vld [vmem:[%s2083_s3 + $0x290] ss:$8 sps:$4 sm:$0xff]  }
  0x4e   : > { %654 = vmatprep.subr.bf16.mxu0 %v1594_v34  ;;  %v1669_v34 = vld [vmem:[%s2083_s3 + $0x284] ss:$8 sps:$4 sm:$0xff]  }
  0x51   : > { %655 = vmatpush2.bf16.msra.mxu0 %v1592_v35  ;;  %v1667_v35 = vld [vmem:[%s2083_s3 + $0x280] ss:$8 sps:$4 sm:$0xff]  }
  0x52   : > { %656 = vmatprep.subr.bf16.mxu0 %v1600_v36 }
  0x55   : > { %657 = vmatpush2.bf16.msra.mxu0 %v1598_v37 }
  0x56   : > { %658 = vmatprep.subr.bf16.mxu0 %v1606_v38 }
  0x59   : > { %659 = vmatpush2.bf16.msra.mxu0 %v1604_v40 }
  0x5a   : > { %660 = vmatprep.subr.bf16.mxu0 %v1612_v42 }
  0x5d   : > { %661 = vmatpush2.bf16.msra.mxu0 %v1610_v45 }
  0x5e   : > { %662 = vmatprep.subr.bf16.mxu0 %v1618_v48 }
  0x61   : > { %663 = vmatpush2.bf16.msra.mxu0 %v1616_v49 }
  0x62   : > { %664 = vmatprep.subr.bf16.mxu0 %v1621_v50 }
  0x65   : > { %665 = vmatpush2.bf16.msra.mxu0 %v1619_v52 }
  0x66   : > { %906 = vmatprep.subr.bf16.mxu0 %v1779_v47  ;;  %v1627_v47 = vld [vmem:[%s2083_s3 + $0x264] ss:$8 sps:$4 sm:$0xff]  }
  0xe0   : > { %v343_v54 = vpop.f32.mrf.mxu0 }
  0xe2   : > { %v345_v55 = vpop.f32.mrf.mxu0 }
  0xe4   : > { %v347_v56 = vpop.f32.mrf.mxu0 }
  0xe5   : > { %v352_v60 = vpack.c.bf16 %v347_v56, %v343_v54 }
  0xe6   : > { %v349_v57 = vpop.f32.mrf.mxu0 }
  0xe7   : > { %v353_v58 = vpack.c.bf16 %v349_v57, %v345_v55 }
  0xe8   : > { %v430_v61 = vpop.f32.mrf.mxu0 }
  0xe9   : > { %869 = vmatprep.mubr.bf16.mxu1 %v353_v58 }
  0xea   : > { %v432_v62 = vpop.f32.mrf.mxu0  ;;  %870 = vmatmul.mubr.bf16.vlgmr.msra.gmra.mxu1 %v352_v60 }
  0xeb   : > { %1131 = vmatpush1.bf16.msra.mxu1 %v1622_v59 }
  0xec   : > { %v434_v0 = vpop.f32.mrf.mxu0  ;;  %1132 = vmatprep.subr.bf16.mxu1 %v1627_v47 }
  0xed   : > { %v439_v8 = vpack.c.bf16 %v434_v0, %v430_v61 }
  0xee   : > { %v436_v6 = vpop.f32.mrf.mxu0 }
  0xef   : > { %v440_v7 = vpack.c.bf16 %v436_v6, %v432_v62  ;;  %1133 = vmatpush1.bf16.msra.mxu1 %v1625_v63 }
  0xf0   : > { %1134 = vmatprep.subr.bf16.mxu1 %v1630_v4 }
  0xf1   : > { %666 = vmatprep.mubr.bf16.mxu0 %v440_v7 }
  0xf2   : > { %667 = vmatmul.mubr.bf16.vlgmr.msra.gmra.mxu0 %v439_v8 }
  0xf3   : > { %907 = vmatpush1.bf16.msra.mxu0 %v1784_v51  ;;  %924 = vmatprep.mubr.bf16.mxu0 %v1678_v3  ;;  %v1634_v3 = vld [vmem:[%s2083_s3 + $0x230] ss:$8 sps:$4 sm:$0xff]   ;;  %v1637_v51 = vld [vmem:[%s2083_s3 + $0x220] ss:$8 sps:$4 sm:$0xff]  }
  0xf4   : > { %1135 = vmatpush1.bf16.msra.mxu1 %v1628_v9 }
  0xf5   : > { %1136 = vmatprep.subr.bf16.mxu1 %v1633_v11 }
  0xf8   : > { %1137 = vmatpush1.bf16.msra.mxu1 %v1631_v12 }
  0xf9   : > { %1138 = vmatprep.subr.bf16.mxu1 %v1636_v14 }
  0xfa   : > { %1441 = vmatmul.mubr.msk.bf16.vlgmr.msra.gmra.mxu0 %vm305_vm6, %v888_v15 }
  0xfc   : > { %1139 = vmatpush1.bf16.msra.mxu1 %v1634_v3 }
  0xfd   : > { %1140 = vmatprep.subr.bf16.mxu1 %v1639_v43 }
 0x100   : > { %1141 = vmatpush1.bf16.msra.mxu1 %v1637_v51 }
 0x101   : > { %1142 = vmatprep.subr.bf16.mxu1 %v1642_v16 }
 0x104   : > { %1143 = vmatpush1.bf16.msra.mxu1 %v1640_v17 }
 0x105   : > { %1144 = vmatprep.subr.bf16.mxu1 %v1645_v18 }
 0x108   : > { %1145 = vmatpush1.bf16.msra.mxu1 %v1643_v19 }
 0x109   : > { %1146 = vmatprep.subr.bf16.mxu1 %v1648_v20 }
 0x10c   : > { %1147 = vmatpush2.bf16.msra.mxu1 %v1646_v21 }
 0x10d   : > { %1148 = vmatprep.subr.bf16.mxu1 %v1651_v22 }
 0x110   : > { %1149 = vmatpush2.bf16.msra.mxu1 %v1649_v23 }
 0x111   : > { %1150 = vmatprep.subr.bf16.mxu1 %v1654_v24 }
 0x114   : > { %1151 = vmatpush2.bf16.msra.mxu1 %v1652_v25 }
 0x115   : > { %1152 = vmatprep.subr.bf16.mxu1 %v1657_v26 }
 0x118   : > { %1153 = vmatpush2.bf16.msra.mxu1 %v1655_v27 }
 0x119   : > { %1154 = vmatprep.subr.bf16.mxu1 %v1660_v28 }
 0x11c   : > { %1155 = vmatpush2.bf16.msra.mxu1 %v1658_v29 }
 0x11d   : > { %1156 = vmatprep.subr.bf16.mxu1 %v1663_v30 }
 0x120   : > { %1157 = vmatpush2.bf16.msra.mxu1 %v1661_v31 }
 0x121   : > { %1158 = vmatprep.subr.bf16.mxu1 %v1666_v32 }
 0x124   : > { %1159 = vmatpush2.bf16.msra.mxu1 %v1664_v33 }
 0x125   : > { %1160 = vmatprep.subr.bf16.mxu1 %v1669_v34 }
 0x128   : > { %1161 = vmatpush2.bf16.msra.mxu1 %v1667_v35 }
 0x1aa   : > { %v871_v48 = vpop.f32.mrf.mxu1 }
 0x1ac   : > { %v873_v49 = vpop.f32.mrf.mxu1 }
 0x1ae   : > { %v875_v50 = vpop.f32.mrf.mxu1 }
 0x1b0   : > { %v877_v52 = vpop.f32.mrf.mxu1 }
 0x1b2   : > { %v668_v36 = vpop.f32.mrf.mxu0 }
 0x1b3   : > { %v872_v54 = vadd.f32 %v871_v48, %v668_v36 }
 0x1b4   : > { %v670_v37 = vpop.f32.mrf.mxu0 }
 0x1b5   : > { %v874_v55 = vadd.f32 %v873_v49, %v670_v37 }
 0x1b6   : > { %v672_v38 = vpop.f32.mrf.mxu0 }
 0x1b7   : > { %v876_v57 = vadd.f32 %v875_v50, %v672_v38 }
 0x1b8   : > { %v674_v39 = vpop.f32.mrf.mxu0 }
 0x1b9   : > { %v878_v61 = vadd.f32 %v877_v52, %v674_v39 }
 0x1ba   : > { %v926_v40 = vpop.f32.mrf.mxu0 }
 0x1bc   : > { %v928_v41 = vpop.f32.mrf.mxu0 }
 0x1be   : > { %v930_v42 = vpop.f32.mrf.mxu0 }
 0x1bf   : > { %v935_v46 = vpack.c.bf16 %v930_v42, %v926_v40 }
 0x1c0   : > { %v932_v44 = vpop.f32.mrf.mxu0 }
 0x1c1   : > { %v936_v45 = vpack.c.bf16 %v932_v44, %v928_v41 }
 0x1c3   : > { %1162 = vmatprep.mubr.bf16.mxu1 %v936_v45 }
 0x1c4   : > { %1163 = vmatmul.mubr.bf16.vlgmr.msra.gmra.mxu1 %v935_v46 }
 0x284   : > { %v1164_v53 = vpop.f32.mrf.mxu1 }
 0x285   : > { %v1173_v58 = vadd.f32 %v1164_v53, %v872_v54 }
 0x286   : > { %v1166_v56 = vpop.f32.mrf.mxu1 }
 0x287   : > { %v1174_v59 = vadd.f32 %v1166_v56, %v874_v55  ;;  %v1205_v0 = vmul.f32 %v1173_v58, %v1173_v58 }
 0x288   : > { %v1168_v60 = vpop.f32.mrf.mxu1 }
 0x289   : > { %v1514_v47 = vpack.c.bf16 %v1174_v59, %v1173_v58  ;;  %v1175_v62 = vadd.f32 %v1168_v60, %v876_v57  ;;  %v1206_v11 = vmul.f32 %v1174_v59, %v1174_v59 }
 0x28a   : > { %v1170_v63 = vpop.f32.mrf.mxu1 }
 0x28b   : > { %1189 = vst [vmem:[%s232_s23] sm:$0xff] %v1514_v47  ;;  %v1191_v1 = vadd.f32 %v1175_v62, %v1173_v58  ;;  %v1207_v2 = vmul.f32 %v1175_v62, %v1175_v62  ;;  %v1176_v4 = vadd.f32 %v1170_v63, %v878_v61 }
 0x28d   : > { %v1192_v6 = vrot.slane %v1191_v1, 4  ;;  %v1209_v7 = vadd.f32 %v1207_v2, %v1205_v0  ;;  %v1515_v8 = vpack.c.bf16 %v1176_v4, %v1175_v62  ;;  %v1198_v9 = vadd.f32 %v1176_v4, %v1174_v59 }
 0x28e   : > { %v1208_v10 = vmul.f32 %v1176_v4, %v1176_v4 }
 0x28f   : > { %v1193_v13 = vadd.f32 %v1192_v6, %v1191_v1  ;;  %v1210_v12 = vrot.slane %v1209_v7, 4  ;;  %1190 = vst [vmem:[%s232_s23 + $0x8] sm:$0xff] %v1515_v8  ;;  %v1199_v14 = vrot.slane %v1198_v9, 4 }
 0x290   : > { %v1216_v15 = vadd.f32 %v1208_v10, %v1206_v11 }
 0x291   : > { %v1194_v3 = vrot.slane %v1193_v13, 2  ;;  %v1211_v43 = vadd.f32 %v1210_v12, %v1209_v7  ;;  %v1200_v51 = vadd.f32 %v1199_v14, %v1198_v9 }
 0x292   : > { %v1217_v16 = vrot.slane %v1216_v15, 4 }
 0x293   : > { %v1195_v17 = vadd.f32 %v1194_v3, %v1193_v13  ;;  %v1212_v18 = vrot.slane %v1211_v43, 2  ;;  %v1201_v19 = vrot.slane %v1200_v51, 2 }
 0x294   : > { %v1218_v20 = vadd.f32 %v1217_v16, %v1216_v15 }
 0x295   : > { %v1196_v21 = vrot.slane %v1195_v17, 1  ;;  %v1213_v22 = vadd.f32 %v1212_v18, %v1211_v43  ;;  %v1202_v23 = vadd.f32 %v1201_v19, %v1200_v51 }
 0x296   : > { %v1219_v24 = vrot.slane %v1218_v20, 2 }
 0x297   : > { %v1214_v25 = vrot.slane %v1213_v22, 1  ;;  %v1203_v26 = vrot.slane %v1202_v23, 1  ;;  %v1197_v28 = vadd.f32 %v1196_v21, %v1195_v17 }
 0x298   : > { %v1220_v27 = vadd.f32 %v1219_v24, %v1218_v20 }
 0x299   : > { %v1215_v29 = vadd.f32 %v1214_v25, %v1213_v22  ;;  %v1204_v32 = vadd.f32 %v1203_v26, %v1202_v23 }
 0x29a   : > { %v1221_v30 = vrot.slane %v1220_v27, 1 }
 0x29b   : > { %v1224_v31 = vsel %vm1223_vm11, %v1197_v28, %v1215_v29 }
 0x29c   : > { %v1222_v33 = vadd.f32 %v1221_v30, %v1220_v27 }
 0x29e   : > { %v1225_v34 = vsel %vm1223_vm11, %v1204_v32, %v1222_v33 }
 0x29f   : > { %v1228_v35 = vcombine.low %v1224_v31, %v1225_v34 }
 0x2a1   : > { %1508 = vst.sshfl [vmem:[%s237_s26] sm:$0x33 pattern:$0x76325410] %v1228_v35 }
 0x2a2 PF: > { %s16_s18 = sadd.s32 1, %s1676_s18  }
 0x2a3   : > { %p13_p4 = scmp.ge.s32.totalorder %s16_s18, 4  }
 0x2a5   :  { %15 = sbr.rel (!%p13_p4) target bundleno = 1 (0x1), region = 80 }

// kernel: tile.133
= control target key start
LH: loop header
LB: loop body
LE: loop exit
PB: predicated region body
PF: predicated region fallthrough
CT: control target
= control target key end

     0   :  { %s22_s0 = inlined_call_operand.vmem [shape: f32[16], index: 0, kind: input, shape index: {}]   ;;  %s23_s1 = inlined_call_operand.vmem [shape: f32[8,16], index: 1, kind: output, shape index: {}]  }
   0x1   :  { %v4_v0 = vld [vmem:[%s22_s0] ss:$0 sm:$0xff] }
   0x2   :  { %5 = vst [vmem:[%s23_s1] sm:$0xff] %v4_v0 }

// kernel: tile.134
= control target key start
LH: loop header
LB: loop body
LE: loop exit
PB: predicated region body
PF: predicated region fallthrough
CT: control target
= control target key end

     0   :  { %s69_s10 = smov 112   ;;  %s70_s11 = smov 80   ;;  %vm3_vm0 = vcmask 130048   ;;  %vm9_vm1 = vcmask 1048448   ;;  %vm15_vm2 = vcmask 917248   ;;  %vm21_vm3 = vcmask 786048   ;;  %s113_s0 = inlined_call_operand.vmem [shape: f32[8,16], index: 0, kind: input, shape index: {}]   ;;  %s114_s1 = inlined_call_operand.vmem [shape: f32[1,128], index: 1, kind: output, shape index: {}]  }
   0x1   :  { %v55_v0 = vld [vmem:[%s113_s0 + $0x7] sm:$0x1]   ;;  %v57_v1 = vld [vmem:[%s113_s0 + $0x5] sm:$0x1]   ;;  %v56_v2 = vld [vmem:[%s113_s0 + $0x6] sm:$0x1]  }
   0x2   :  { %7 = vrot.lane.b32.xlu0 %v55_v0, %s69_s10  ;;  %19 = vrot.lane.b32.xlu1 %v57_v1, %s70_s11  ;;  %v58_v3 = vld [vmem:[%s113_s0 + $0x4] sm:$0x1]   ;;  %v2_v4 = vld [vmem:[%s113_s0] sm:$0x1]   ;;  %s71_s18 = smov 96   ;;  %s72_s19 = smov 64  }
   0x3   :  { %4 = vst.msk [vmem:[#allocation0] sm:$0x1] %vm3_vm0, %v2_v4   ;;  %v59_v5 = vld [vmem:[%s113_s0 + $0x3] sm:$0x1]   ;;  %v60_v6 = vld [vmem:[%s113_s0 + $0x2] sm:$0x1]  }
   0x4   :  { %s73_s24 = smov 48   ;;  %s74_s25 = smov 32   ;;  %v61_v7 = vld [vmem:[%s113_s0 + $0x1] sm:$0x1]   ;;  %vm27_vm4 = vcmask 654848   ;;  %vm33_vm5 = vcmask 523648  }
   0x5   :  { %s75_s0 = smov 16   ;;  %vm39_vm6 = vcmask 392448   ;;  %vm45_vm7 = vcmask 261248  }
   0x6   :  { %13 = vrot.lane.b32.xlu0 %v56_v2, %s71_s18  ;;  %25 = vrot.lane.b32.xlu1 %v58_v3, %s72_s19 }
   0xa   :  { %31 = vrot.lane.b32.xlu0 %v59_v5, %s73_s24  ;;  %37 = vrot.lane.b32.xlu1 %v60_v6, %s74_s25 }
   0xe   :  { %43 = vrot.lane.b32.xlu0 %v61_v7, %s75_s0 }
  0x74   :  { %v8_v8 = vpop.permute.xlu0 %7   ;;  %v20_v9 = vpop.permute.xlu1 %19  }
  0x75   :  { %10 = vst.msk [vmem:[#allocation0] sm:$0x1] %vm9_vm1, %v8_v8  }
  0x78   :  { %v14_v10 = vpop.permute.xlu0 %13   ;;  %v26_v11 = vpop.permute.xlu1 %25  }
  0x79   :  { %16 = vst.msk [vmem:[#allocation0] sm:$0x1] %vm15_vm2, %v14_v10  }
  0x7a   :  { %22 = vst.msk [vmem:[#allocation0] sm:$0x1] %vm21_vm3, %v20_v9  }
  0x7b   :  { %28 = vst.msk [vmem:[#allocation0] sm:$0x1] %vm27_vm4, %v26_v11  }
  0x7c   :  { %v32_v12 = vpop.permute.xlu0 %31   ;;  %v38_v13 = vpop.permute.xlu1 %37  }
  0x7d   :  { %34 = vst.msk [vmem:[#allocation0] sm:$0x1] %vm33_vm5, %v32_v12  }
  0x7e   :  { %40 = vst.msk [vmem:[#allocation0] sm:$0x1] %vm39_vm6, %v38_v13  }
  0x80   :  { %v44_v14 = vpop.permute.xlu0 %43  }
  0x81   :  { %46 = vst.msk [vmem:[#allocation0] sm:$0x1] %vm45_vm7, %v44_v14  }
  0x88   :  { %v51_v15 = vld [vmem:[#allocation0] sm:$0x1] }
  0x89   :  { %54 = vst [vmem:[%s114_s1] sm:$0x1] %v51_v15 }

// kernel: forward.14
= control target key start
LH: loop header
LB: loop body
LE: loop exit
PB: predicated region body
PF: predicated region fallthrough
CT: control target
= control target key end

     0   :  { %s1348_s18 = smov 0   ;;  %s1558_s0 = inlined_call_operand.vmem [shape: bf16[2,16,256], index: 0, kind: input, shape index: {}]   ;;  %s1559_s1 = inlined_call_operand.vmem [shape: f32[1,256], index: 1, kind: input, shape index: {}]   ;;  %s1560_s2 = inlined_call_operand.vmem [shape: f32[1,256], index: 2, kind: input, shape index: {}]   ;;  %s1561_s3 = inlined_call_operand.vmem [shape: bf16[3,256,128], index: 3, kind: input, shape index: {}]   ;;  %s1562_s4 = inlined_call_operand.vmem [shape: bf16[2,8,128], index: 4, kind: output, shape index: {0}]   ;;  %s1563_s5 = inlined_call_operand.vmem [shape: f32[2,2,128], index: 5, kind: output, shape index: {1}]  }
   0x1 LB: > { %s1054_s19 = sadd.s32 4294967295, %s1314_s18   ;;  %p1058_p0 = scmp.ge.s32.totalorder %s1314_s18, 1  ;;  %s1314_s18 = sphi %s1348_s18, %s16_s18  }
   0x2   : > { %p190_p1 = scmp.lt.s32.totalorder %s1314_s18, 3 }
   0x4   : > { %p191_p2 = pnand %p1058_p0, %p190_p1 }
   0x5   : > { %p221_p3 = scmp.lt.s32.totalorder (!%p191_p2), %s1054_s19, 1 }
   0x6   : > { %194 = sbr.rel (%p191_p2) target bundleno = 659 (0x293), region = 36 }
   0xb   : > { %v243_v0 = vlaneseq  ;;  %v241_v1 = vld [vmem:[%s1559_s1] sm:$0x3]  ;;  %v1316_v3 = vmov 0   ;;  %s1565_s19 = smov (!%p221_p3, %s1054_s19), 1  ;;  %v1260_v5 = vld [vmem:[%s1561_s3 + $0x78] sm:$0xff]   ;;  %v1262_v11 = vld [vmem:[%s1561_s3 + $0x70] sm:$0xff]  }
   0xc   : > { %v257_v2 = vld [vmem:[%s1560_s2] sm:$0x3]  ;;  %333 = vmatprep.mubr.bf16.mxu0 %v1316_v3  ;;  %v1261_v6 = vld [vmem:[%s1561_s3 + $0x38] sm:$0xff]   ;;  %s1183_s28 = sshll.u32 %s1565_s19, 4  ;;  %1206 = vmatprep.subr.bf16.mxu1 %v1260_v5  ;;  %v1263_v18 = vld [vmem:[%s1561_s3 + $0x30] sm:$0xff]   ;;  %v1317_v41 = vmov 0.0  }
   0xd   : > { %v1365_v4 = vshrl.u32 %v243_v0, 7  ;;  %s225_s6 = scalar_lea.vmem %s1558_s0, %s1183_s28  ;;  %v1382_v10 = vand.u32 127, %v243_v0  ;;  %1207 = vmatpush3.bf16.msra.mxu1 %v1261_v6  ;;  %v1265_v24 = vld [vmem:[%s1561_s3 + $0x68] sm:$0xff]   ;;  %v1269_v34 = vld [vmem:[%s1561_s3 + $0x60] sm:$0xff]   ;;  %v1273_v49 = vld [vmem:[%s1561_s3 + $0x58] sm:$0xff]   ;;  %vm297_vm5 = vcmask 130048  }
   0xe   : > { %v235_v12 = vld [vmem:[%s225_s6] sm:$0xff]  ;;  %v236_v13 = vld [vmem:[%s225_s6 + $0x8] sm:$0xff]  ;;  %1208 = vmatprep.subr.bf16.mxu1 %v1262_v11  ;;  %v1264_v50 = vld [vmem:[%s1561_s3 + $0xf8] sm:$0xff]   ;;  %s1061_s7 = sshll.u32 %s1565_s19, 2  ;;  %s1062_s11 = sshll.u32 %s1565_s19, 1 }
   0xf   : > { %v249_v7 = vsub.s32 1, %v1365_v4  ;;  %v245_v8 = vsub.s32 0, %v1365_v4  ;;  %v1377_v9 = vmul.u32 2, %v1365_v4  ;;  %v238_v19 = vunpack.c.h.bf16 %v235_v12  ;;  %v1267_v29 = vld [vmem:[%s1561_s3 + $0x28] sm:$0xff]   ;;  %v1271_v46 = vld [vmem:[%s1561_s3 + $0x20] sm:$0xff]   ;;  %v1275_v51 = vld [vmem:[%s1561_s3 + $0x18] sm:$0xff]   ;;  %s229_s10 = scalar_lea.vmem %s1562_s4, %s1061_s7  ;;  %s233_s14 = scalar_lea.vmem %s1563_s5, %s1062_s11 }
  0x10   : > { %v240_v20 = vunpack.c.h.bf16 %v236_v13  ;;  %v237_v21 = vunpack.c.l.bf16 %v235_v12  ;;  %v239_v22 = vunpack.c.l.bf16 %v236_v13  ;;  %v1277_v52 = vld [vmem:[%s1561_s3 + $0x50] sm:$0xff]   ;;  %v1266_v55 = vld [vmem:[%s1561_s3 + $0xb8] sm:$0xff]   ;;  %v1281_v57 = vld [vmem:[%s1561_s3 + $0x48] sm:$0xff]   ;;  %vm967_vm8 = vcmp.eq.s32.totalorder %v1365_v4, 0 }
  0x11   : > { %v250_v14 = vrot.slane %v241_v1, %v249_v7  ;;  %v266_v15 = vrot.slane %v257_v2, %v249_v7  ;;  %v246_v16 = vrot.slane %v241_v1, %v245_v8  ;;  %v262_v17 = vrot.slane %v257_v2, %v245_v8  ;;  %1209 = vmatpush3.bf16.msra.mxu1 %v1263_v18  ;;  %v1279_v54 = vld [vmem:[%s1561_s3 + $0x10] sm:$0xff]   ;;  %v1283_v59 = vld [vmem:[%s1561_s3 + $0x8] sm:$0xff]   ;;  %v1276_v63 = vld [vmem:[%s1561_s3 + $0xe0] sm:$0xff]  }
  0x12   : > { %v292_v23 = vadd.s32 4294967295, %v1377_v9  ;;  %1210 = vmatprep.subr.bf16.mxu1 %v1265_v24  ;;  %vm376_vm6 = vcmp.eq.s32.totalorder %v1382_v10, %v1377_v9  ;;  %v1268_v58 = vld [vmem:[%s1561_s3 + $0xf0] sm:$0xff]   ;;  %v1272_v61 = vld [vmem:[%s1561_s3 + $0xe8] sm:$0xff]   ;;  %v1278_v0 = vld [vmem:[%s1561_s3 + $0xa0] sm:$0xff]  }
  0x13   : > { %v254_v25 = vmul.f32 %v250_v14, %v238_v19  ;;  %v256_v26 = vmul.f32 %v250_v14, %v240_v20  ;;  %v253_v27 = vmul.f32 %v246_v16, %v237_v21  ;;  %v255_v28 = vmul.f32 %v246_v16, %v239_v22  ;;  %v1270_v60 = vld [vmem:[%s1561_s3 + $0xb0] sm:$0xff]   ;;  %v1274_v62 = vld [vmem:[%s1561_s3 + $0xa8] sm:$0xff]   ;;  %v1280_v1 = vld [vmem:[%s1561_s3 + $0xd8] sm:$0xff]  }
  0x14   : > { %vm293_vm0 = vcmp.eq.s32.totalorder %v1382_v10, %v292_v23  ;;  %v1065_v53 = vsel %vm376_vm6, 1.0, %v1317_v41  ;;  %v1282_v2 = vld [vmem:[%s1561_s3 + $0x98] sm:$0xff]   ;;  %v1284_v5 = vld [vmem:[%s1561_s3 + $0xd0] sm:$0xff]   ;;  %v1285_v6 = vld [vmem:[%s1561_s3 + $0x40] sm:$0xff]  }
  0x15   : > { %v270_v30 = vadd.f32 %v266_v15, %v254_v25  ;;  %v272_v31 = vadd.f32 %v266_v15, %v256_v26  ;;  %v269_v32 = vadd.f32 %v262_v17, %v253_v27  ;;  %v271_v33 = vadd.f32 %v262_v17, %v255_v28  ;;  %1211 = vmatpush3.bf16.msra.mxu1 %v1267_v29  ;;  %v1286_v7 = vld [vmem:[%s1561_s3 + $0x90] sm:$0xff]   ;;  %v1287_v8 = vld [vmem:[%s1561_s3] sm:$0xff]   ;;  %v1288_v11 = vld [vmem:[%s1561_s3 + $0xc8] sm:$0xff]  }
  0x16   : > { %1212 = vmatprep.subr.bf16.mxu1 %v1269_v34  ;;  %v1063_v42 = vsel %vm293_vm0, 1.0, %v1317_v41  ;;  %v379_v56 = vpack.c.bf16 %v1065_v53, %v1065_v53  ;;  %v1289_v12 = vld [vmem:[%s1561_s3 + $0x88] sm:$0xff]   ;;  %v1290_v13 = vld [vmem:[%s1561_s3 + $0xc0] sm:$0xff]   ;;  %v1292_v15 = vld [vmem:[%s1561_s3 + $0x178] sm:$0xff]   ;;  %v731_v26 = vadd.s32 1, %v1377_v9 }
  0x17   : > { %vm274_vm1 = vcmp.ge.f32.partialorder %v270_v30, 0.0  ;;  %vm276_vm2 = vcmp.ge.f32.partialorder %v272_v31, 0.0  ;;  %v278_v35 = vmul.f32 0.1, %v270_v30  ;;  %v280_v36 = vmul.f32 0.1, %v272_v31 }
  0x18   : > { %vm273_vm3 = vcmp.ge.f32.partialorder %v269_v32, 0.0  ;;  %vm275_vm4 = vcmp.ge.f32.partialorder %v271_v33, 0.0  ;;  %v277_v37 = vmul.f32 0.1, %v269_v32  ;;  %v279_v38 = vmul.f32 0.1, %v271_v33 }
  0x19   : > { %v282_v39 = vsel %vm274_vm1, %v270_v30, %v278_v35  ;;  %v284_v40 = vsel %vm276_vm2, %v272_v31, %v280_v36  ;;  %v296_v48 = vpack.c.bf16 %v1063_v42, %v1063_v42  ;;  %1213 = vmatpush3.bf16.msra.mxu1 %v1271_v46  ;;  %v1291_v14 = vld [vmem:[%s1561_s3 + $0x80] sm:$0xff]   ;;  %v1293_v19 = vld [vmem:[%s1561_s3 + $0x138] sm:$0xff]   ;;  %v1294_v22 = vld [vmem:[%s1561_s3 + $0x170] sm:$0xff]   ;;  %vm732_vm7 = vcmp.eq.s32.totalorder %v1382_v10, %v731_v26 }
  0x1a   : > { %v1402_v43 = vpack.c.bf16 %v284_v40, %v282_v39  ;;  %v281_v44 = vsel %vm273_vm3, %v269_v32, %v277_v37  ;;  %v283_v45 = vsel %vm275_vm4, %v271_v33, %v279_v38  ;;  %1214 = vmatprep.subr.bf16.mxu1 %v1273_v49  ;;  %v1295_v24 = vld [vmem:[%s1561_s3 + $0x130] sm:$0xff]   ;;  %v1296_v27 = vld [vmem:[%s1561_s3 + $0x168] sm:$0xff]   ;;  %v1131_v9 = vsel %vm732_vm7, 1.0, %v1317_v41  ;;  %v1298_v10 = vld [vmem:[%s1561_s3 + $0x160] sm:$0xff]  }
  0x1b   : > { %v1407_v47 = vpack.c.bf16 %v283_v45, %v281_v44  ;;  %v1297_v32 = vld [vmem:[%s1561_s3 + $0x128] sm:$0xff]   ;;  %v735_v34 = vpack.c.bf16 %v1131_v9, %v1131_v9  ;;  %v1299_v35 = vld [vmem:[%s1561_s3 + $0x120] sm:$0xff]   ;;  %v1301_v36 = vld [vmem:[%s1561_s3 + $0x118] sm:$0xff]  }
  0x1c   : > { %315 = vmatprep.subr.bf16.mxu0 %v1402_v43  ;;  %v1302_v37 = vld [vmem:[%s1561_s3 + $0x150] sm:$0xff]   ;;  %v1304_v39 = vld [vmem:[%s1561_s3 + $0x148] sm:$0xff]   ;;  %v1306_v41 = vld [vmem:[%s1561_s3 + $0x140] sm:$0xff]  }
  0x1d   : > { %316 = vmatpush1.bf16.msra.mxu0 %v1407_v47  ;;  %1215 = vmatpush3.bf16.msra.mxu1 %v1275_v51  ;;  %v1303_v38 = vld [vmem:[%s1561_s3 + $0x110] sm:$0xff]   ;;  %v1305_v40 = vld [vmem:[%s1561_s3 + $0x108] sm:$0xff]   ;;  %v1307_v42 = vld [vmem:[%s1561_s3 + $0x100] sm:$0xff]  }
  0x1e   : > { %397 = vmatprep.subr.bf16.mxu0 %v1402_v43  ;;  %1216 = vmatprep.subr.bf16.mxu1 %v1277_v52 }
  0x20   : > { %1064 = vmatmul.mubr.msk.bf16.vlgmr.msra.gmra.mxu0 %vm297_vm5, %v296_v48 }
  0x21   : > { %398 = vmatpush1.bf16.msra.mxu0 %v1407_v47  ;;  %415 = vmatprep.mubr.bf16.mxu0 %v1316_v3 }
  0x22   : > { %1184 = vmatprep.subr.bf16.mxu0 %v1264_v50  ;;  %1217 = vmatpush3.bf16.msra.mxu1 %v1279_v54 }
  0x23   : > { %1218 = vmatprep.subr.bf16.mxu1 %v1281_v57 }
  0x26   : > { %1219 = vmatpush3.bf16.msra.mxu1 %v1283_v59 }
  0x27   : > { %1220 = vmatprep.subr.bf16.mxu1 %v1285_v6 }
  0x28   : > { %1066 = vmatmul.mubr.msk.bf16.vlgmr.msra.gmra.mxu0 %vm297_vm5, %v379_v56 }
  0x29   : > { %1185 = vmatpush3.bf16.msra.mxu0 %v1266_v55 }
  0x2a   : > { %1186 = vmatprep.subr.bf16.mxu0 %v1268_v58  ;;  %1221 = vmatpush3.bf16.msra.mxu1 %v1287_v8 }
  0x2b   : > { %1228 = vmatprep.subr.bf16.mxu1 %v1292_v15 }
  0x2d   : > { %1187 = vmatpush3.bf16.msra.mxu0 %v1270_v60 }
  0x2e   : > { %1188 = vmatprep.subr.bf16.mxu0 %v1272_v61 }
  0x31   : > { %1189 = vmatpush3.bf16.msra.mxu0 %v1274_v62 }
  0x32   : > { %1190 = vmatprep.subr.bf16.mxu0 %v1276_v63 }
  0x35   : > { %1191 = vmatpush3.bf16.msra.mxu0 %v1278_v0 }
  0x36   : > { %1192 = vmatprep.subr.bf16.mxu0 %v1280_v1 }
  0x39   : > { %1193 = vmatpush3.bf16.msra.mxu0 %v1282_v2 }
  0x3a   : > { %1194 = vmatprep.subr.bf16.mxu0 %v1284_v5 }
  0x3d   : > { %1195 = vmatpush3.bf16.msra.mxu0 %v1286_v7 }
  0x3e   : > { %1196 = vmatprep.subr.bf16.mxu0 %v1288_v11 }
  0x41   : > { %1197 = vmatpush3.bf16.msra.mxu0 %v1289_v12 }
  0x42   : > { %1198 = vmatprep.subr.bf16.mxu0 %v1290_v13 }
  0x45   : > { %1199 = vmatpush3.bf16.msra.mxu0 %v1291_v14 }
  0x46   : > { %753 = vmatprep.subr.bf16.mxu0 %v1402_v43 }
  0xe0   : > { %v335_v16 = vpop.f32.mrf.mxu0 }
  0xe1   : > { %v342_v20 = vpack.c.bf16 %v335_v16, %v335_v16 }
  0xe2   : > { %v337_v17 = vpop.f32.mrf.mxu0 }
  0xe3   : > { %v343_v18 = vpack.c.bf16 %v337_v17, %v337_v17 }
  0xe4   : > { %v339_v21 = vpop.f32.mrf.mxu0 }
  0xe5   : > { %723 = vmatprep.mubr.bf16.mxu1 %v343_v18 }
  0xe6   : > { %v340_v23 = vpop.f32.mrf.mxu0  ;;  %724 = vmatmul.mubr.bf16.vlgmr.msra.gmra.mxu1 %v342_v20 }
  0xe7   : > { %1229 = vmatpush3.bf16.msra.mxu1 %v1293_v19 }
  0xe8   : > { %v417_v25 = vpop.f32.mrf.mxu0  ;;  %1230 = vmatprep.subr.bf16.mxu1 %v1294_v22 }
  0xe9   : > { %v424_v30 = vpack.c.bf16 %v417_v25, %v417_v25 }
  0xea   : > { %v419_v28 = vpop.f32.mrf.mxu0 }
  0xeb   : > { %v425_v29 = vpack.c.bf16 %v419_v28, %v419_v28  ;;  %1231 = vmatpush3.bf16.msra.mxu1 %v1295_v24 }
  0xec   : > { %v421_v31 = vpop.f32.mrf.mxu0  ;;  %1232 = vmatprep.subr.bf16.mxu1 %v1296_v27 }
  0xed   : > { %587 = vmatprep.mubr.bf16.mxu0 %v425_v29 }
  0xee   : > { %v422_v33 = vpop.f32.mrf.mxu0  ;;  %588 = vmatmul.mubr.bf16.vlgmr.msra.gmra.mxu0 %v424_v30 }
  0xef   : > { %754 = vmatpush1.bf16.msra.mxu0 %v1407_v47  ;;  %771 = vmatprep.mubr.bf16.mxu0 %v1316_v3  ;;  %v1300_v3 = vld [vmem:[%s1561_s3 + $0x158] sm:$0xff]  }
  0xf0   : > { %1233 = vmatpush3.bf16.msra.mxu1 %v1297_v32 }
  0xf1   : > { %1234 = vmatprep.subr.bf16.mxu1 %v1298_v10 }
  0xf4   : > { %1235 = vmatpush3.bf16.msra.mxu1 %v1299_v35 }
  0xf5   : > { %1236 = vmatprep.subr.bf16.mxu1 %v1300_v3 }
  0xf6   : > { %1132 = vmatmul.mubr.msk.bf16.vlgmr.msra.gmra.mxu0 %vm297_vm5, %v735_v34 }
  0xf8   : > { %1237 = vmatpush3.bf16.msra.mxu1 %v1301_v36 }
  0xf9   : > { %1238 = vmatprep.subr.bf16.mxu1 %v1302_v37 }
  0xfc   : > { %1239 = vmatpush3.bf16.msra.mxu1 %v1303_v38 }
  0xfd   : > { %1240 = vmatprep.subr.bf16.mxu1 %v1304_v39 }
 0x100   : > { %1241 = vmatpush3.bf16.msra.mxu1 %v1305_v40 }
 0x101   : > { %1242 = vmatprep.subr.bf16.mxu1 %v1306_v41 }
 0x104   : > { %1243 = vmatpush3.bf16.msra.mxu1 %v1307_v42 }
 0x1a6   : > { %v1222_v43 = vpop.f32.mrf.mxu1 }
 0x1a8   : > { %v1223_v44 = vpop.f32.mrf.mxu1 }
 0x1a9   : > { %v1224_v45 = vadd.f32 %v1223_v44, %v1222_v43 }
 0x1aa   : > { %v1225_v46 = vpop.f32.mrf.mxu1 }
 0x1ac   : > { %v1226_v47 = vpop.f32.mrf.mxu1 }
 0x1ae   : > { %v1200_v48 = vpop.f32.mrf.mxu0 }
 0x1b0   : > { %v1201_v49 = vpop.f32.mrf.mxu0 }
 0x1b1   : > { %v1202_v50 = vadd.f32 %v1201_v49, %v1200_v48 }
 0x1b2   : > { %v1203_v51 = vpop.f32.mrf.mxu0 }
 0x1b3   : > { %v726_v52 = vadd.f32 %v1224_v45, %v1202_v50 }
 0x1b4   : > { %v1204_v53 = vpop.f32.mrf.mxu0 }
 0x1b6   : > { %v773_v54 = vpop.f32.mrf.mxu0 }
 0x1b7   : > { %v780_v57 = vpack.c.bf16 %v773_v54, %v773_v54 }
 0x1b8   : > { %v775_v55 = vpop.f32.mrf.mxu0 }
 0x1b9   : > { %v781_v56 = vpack.c.bf16 %v775_v55, %v775_v55 }
 0x1ba   : > { %v777_v58 = vpop.f32.mrf.mxu0 }
 0x1bb   : > { %943 = vmatprep.mubr.bf16.mxu1 %v781_v56 }
 0x1bc   : > { %v778_v59 = vpop.f32.mrf.mxu0  ;;  %944 = vmatmul.mubr.bf16.vlgmr.msra.gmra.mxu1 %v780_v57 }
 0x27c   : > { %v1244_v60 = vpop.f32.mrf.mxu1 }
 0x27e   : > { %v1245_v61 = vpop.f32.mrf.mxu1 }
 0x27f   : > { %v1246_v62 = vadd.f32 %v1245_v61, %v1244_v60 }
 0x280   : > { %v1247_v63 = vpop.f32.mrf.mxu1 }
 0x281   : > { %v951_v0 = vadd.f32 %v1246_v62, %v726_v52 }
 0x282   : > { %v1248_v1 = vpop.f32.mrf.mxu1 }
 0x283   : > { %v952_v2 = vpack.c.bf16 %v951_v0, %v951_v0  ;;  %v954_v5 = vrot.slane %v951_v0, 4  ;;  %v960_v6 = vmul.f32 %v951_v0, %v951_v0 }
 0x285   : > { %953 = vst [vmem:[%s229_s10] sm:$0xf] %v952_v2  ;;  %v955_v7 = vadd.f32 %v954_v5, %v951_v0  ;;  %v961_v8 = vrot.slane %v960_v6, 4 }
 0x287   : > { %v956_v11 = vrot.slane %v955_v7, 2  ;;  %v962_v12 = vadd.f32 %v961_v8, %v960_v6 }
 0x289   : > { %v957_v13 = vadd.f32 %v956_v11, %v955_v7  ;;  %v963_v14 = vrot.slane %v962_v12, 2 }
 0x28b   : > { %v958_v15 = vrot.slane %v957_v13, 1  ;;  %v964_v16 = vadd.f32 %v963_v14, %v962_v12 }
 0x28d   : > { %v965_v17 = vrot.slane %v964_v16, 1  ;;  %v959_v18 = vadd.f32 %v958_v15, %v957_v13 }
 0x28f   : > { %v966_v19 = vadd.f32 %v965_v17, %v964_v16 }
 0x291   : > { %v968_v20 = vsel %vm967_vm8, %v959_v18, %v966_v19 }
 0x292   : > { %969 = vst [vmem:[%s233_s14] sm:$0x3] %v968_v20 }
 0x293 PF: > { %s16_s18 = sadd.s32 1, %s1314_s18  }
 0x294   : > { %p13_p4 = scmp.ge.s32.totalorder %s16_s18, 4  }
 0x296   :  { %15 = sbr.rel (!%p13_p4) target bundleno = 1 (0x1), region = 80 }

// kernel: forward.17
= control target key start
LH: loop header
LB: loop body
LE: loop exit
PB: predicated region body
PF: predicated region fallthrough
CT: control target
= control target key end

     0   :  { %s264_s12 = smov 0   ;;  %s300_s0 = inlined_call_operand.vmem [shape: bf16[2,8,128], index: 0, kind: input, shape index: {}]   ;;  %s301_s1 = inlined_call_operand.vmem [shape: f32[1,128], index: 1, kind: input, shape index: {}]   ;;  %s302_s2 = inlined_call_operand.vmem [shape: f32[1,128], index: 2, kind: input, shape index: {}]   ;;  %s303_s3 = inlined_call_operand.vmem [shape: f32[2,8,128], index: 3, kind: output, shape index: {}]  }
   0x1 LB: > { %s241_s13 = sadd.s32 4294967295, %s266_s12   ;;  %p245_p0 = scmp.ge.s32.totalorder %s266_s12, 1  ;;  %s266_s12 = sphi %s264_s12, %s13_s12  }
   0x2   : > { %p136_p1 = scmp.lt.s32.totalorder %s266_s12, 3 }
   0x4   : > { %p137_p2 = pnand %p245_p0, %p136_p1 }
   0x5   : > { %p158_p3 = scmp.lt.s32.totalorder (!%p137_p2), %s241_s13, 1 }
   0x6   : > { %140 = sbr.rel (%p137_p2) target bundleno = 25 (0x19), region = 32 }
   0xb   : > { %s305_s13 = smov (!%p158_p3, %s241_s13), 1  ;;  %v248_v1 = vld [vmem:[%s301_s1] ss:$0 sm:$0xff] }
   0xc   : > { %s246_s14 = sshll.u32 %s305_s13, 2  ;;  %v249_v3 = vld [vmem:[%s302_s2] ss:$0 sm:$0xff]  ;;  %s247_s22 = sshll.u32 %s305_s13, 3 }
   0xd   : > { %s161_s17 = scalar_lea.vmem %s300_s0, %s246_s14  ;;  %s165_s25 = scalar_lea.vmem %s303_s3, %s247_s22 }
   0xe   : > { %v166_v0 = vld [vmem:[%s161_s17] sm:$0xf] }
   0xf   : > { %v167_v2 = vunpack.c.l.bf16 %v166_v0 }
  0x11   : > { %v175_v4 = vmul.f32 %v248_v1, %v167_v2 }
  0x13   : > { %v183_v5 = vadd.f32 %v249_v3, %v175_v4 }
  0x15   : > { %vm184_vm0 = vcmp.ge.f32.partialorder %v183_v5, 0.0  ;;  %v185_v6 = vmul.f32 0.1, %v183_v5 }
  0x17   : > { %v186_v7 = vsel %vm184_vm0, %v183_v5, %v185_v6 }
  0x18   : > { %187 = vst [vmem:[%s165_s25] sm:$0xff] %v186_v7 }
  0x19 PF: > { %s13_s12 = sadd.s32 1, %s266_s12  }
  0x1a   : > { %p10_p4 = scmp.ge.s32.totalorder %s13_s12, 4  }
  0x1c   :  { %12 = sbr.rel (!%p10_p4) target bundleno = 1 (0x1), region = 62 }

// kernel: forward.15
= control target key start
LH: loop header
LB: loop body
LE: loop exit
PB: predicated region body
PF: predicated region fallthrough
CT: control target
= control target key end

     0   :  { %s1085_s18 = smov 0   ;;  %s1252_s0 = inlined_call_operand.vmem [shape: bf16[2,8,128], index: 0, kind: input, shape index: {}]   ;;  %s1253_s1 = inlined_call_operand.vmem [shape: f32[1,128], index: 1, kind: input, shape index: {}]   ;;  %s1254_s2 = inlined_call_operand.vmem [shape: f32[1,128], index: 2, kind: input, shape index: {}]   ;;  %s1255_s3 = inlined_call_operand.vmem [shape: bf16[3,128,128], index: 3, kind: input, shape index: {}]   ;;  %s1256_s4 = inlined_call_operand.vmem [shape: bf16[2,8,128], index: 4, kind: output, shape index: {0}]   ;;  %s1257_s5 = inlined_call_operand.vmem [shape: f32[2,2,128], index: 5, kind: output, shape index: {1}]  }
   0x1 LB: > { %s826_s19 = sadd.s32 4294967295, %s1051_s18   ;;  %p830_p0 = scmp.ge.s32.totalorder %s1051_s18, 1  ;;  %s1051_s18 = sphi %s1085_s18, %s16_s18  }
   0x2   : > { %p189_p1 = scmp.lt.s32.totalorder %s1051_s18, 3 }
   0x4   : > { %p190_p2 = pnand %p830_p0, %p189_p1 }
   0x5   : > { %p219_p3 = scmp.lt.s32.totalorder (!%p190_p2), %s826_s19, 1 }
   0x6   : > { %193 = sbr.rel (%p190_p2) target bundleno = 647 (0x287), region = 36 }
   0xb   : > { %v254_v0 = vlaneseq  ;;  %v1053_v1 = vmov 0.0   ;;  %v1021_v2 = vld [vmem:[%s1255_s3 + $0x38] sm:$0xff]   ;;  %s1259_s19 = smov (!%p219_p3, %s826_s19), 1  ;;  %vm1054_vm0 = vmmov 0   ;;  %v1022_v4 = vld [vmem:[%s1255_s3 + $0x30] sm:$0xff]   ;;  %v1024_v10 = vld [vmem:[%s1255_s3 + $0x28] sm:$0xff]  }
   0xc   : > { %933 = vmatprep.subr.bf16.mxu0 %v1053_v1  ;;  %965 = vmatprep.subr.bf16.mxu1 %v1053_v1  ;;  %s831_s24 = sshll.u32 %s1259_s19, 2  ;;  %v834_v5 = vld [vmem:[%s1253_s1] ss:$0 sm:$0xff]  ;;  %vm267_vm2 = vcmask 1043456   ;;  %vm263_vm4 = vcmask 64512   ;;  %v1028_v17 = vld [vmem:[%s1255_s3 + $0x18] sm:$0xff]  }
   0xd   : > { %935 = vmatprep.mubr.msk.bf16.mxu0 %vm1054_vm0, %v1053_v1  ;;  %v1102_v3 = vshrl.u32 %v254_v0, 7  ;;  %981 = vmatprep.mubr.msk.bf16.mxu1 %vm1054_vm0, %v1053_v1  ;;  %s222_s29 = scalar_lea.vmem %s1252_s0, %s831_s24  ;;  %v1119_v6 = vand.u32 127, %v254_v0  ;;  %v835_v11 = vld [vmem:[%s1254_s2] ss:$0 sm:$0xff]  ;;  %v1030_v22 = vld [vmem:[%s1255_s3 + $0x10] sm:$0xff]   ;;  %v1032_v24 = vld [vmem:[%s1255_s3 + $0x8] sm:$0xff]   ;;  %s226_s9 = scalar_lea.vmem %s1256_s4, %s831_s24 }
   0xe   : > { %966 = vmatpush3.bf16.msra.mxu1 %v1021_v2  ;;  %v232_v7 = vld [vmem:[%s222_s29] sm:$0xf]  ;;  %v1023_v26 = vld [vmem:[%s1255_s3 + $0x78] sm:$0xff]   ;;  %v1025_v27 = vld [vmem:[%s1255_s3 + $0x70] sm:$0xff]   ;;  %s833_s10 = sshll.u32 %s1259_s19, 1 }
   0xf   : > { %967 = vmatprep.subr.bf16.mxu1 %v1053_v1  ;;  %v233_v8 = vunpack.c.l.bf16 %v232_v7  ;;  %v258_v9 = vadd.s32 4294967295, %v1102_v3  ;;  %v1026_v14 = vld [vmem:[%s1255_s3 + $0x20] sm:$0xff]   ;;  %vm328_vm5 = vcmp.eq.s32.totalorder %v1119_v6, %v1102_v3  ;;  %v1027_v28 = vld [vmem:[%s1255_s3 + $0x68] sm:$0xff]   ;;  %v1031_v30 = vld [vmem:[%s1255_s3 + $0x58] sm:$0xff]   ;;  %v569_v41 = vadd.s32 1, %v1102_v3  ;;  %s230_s12 = scalar_lea.vmem %s1257_s5, %s833_s10 }
  0x10   : > { %v838_v23 = vsel %vm328_vm5, 1.0, %v1053_v1  ;;  %v1029_v29 = vld [vmem:[%s1255_s3 + $0x60] sm:$0xff]   ;;  %v1033_v31 = vld [vmem:[%s1255_s3 + $0x50] sm:$0xff]   ;;  %v1035_v33 = vld [vmem:[%s1255_s3 + $0x48] sm:$0xff]   ;;  %vm739_vm7 = vcmp.eq.s32.totalorder %v1102_v3, 0 }
  0x11   : > { %v241_v12 = vmul.f32 %v834_v5, %v233_v8  ;;  %vm259_vm1 = vcmp.eq.s32.totalorder %v1119_v6, %v258_v9  ;;  %v331_v25 = vpack.c.bf16 %v838_v23, %v838_v23  ;;  %v1034_v32 = vld [vmem:[%s1255_s3] sm:$0xff]   ;;  %v1037_v36 = vld [vmem:[%s1255_s3 + $0xb8] sm:$0xff]   ;;  %v1038_v40 = vld [vmem:[%s1255_s3 + $0xb0] sm:$0xff]   ;;  %vm570_vm6 = vcmp.eq.s32.totalorder %v1119_v6, %v569_v41 }
  0x12   : > { %968 = vmatpush3.bf16.msra.mxu1 %v1022_v4  ;;  %v836_v16 = vsel %vm259_vm1, 1.0, %v1053_v1  ;;  %v1036_v34 = vld [vmem:[%s1255_s3 + $0x40] sm:$0xff]   ;;  %v1039_v45 = vld [vmem:[%s1255_s3 + $0xa8] sm:$0xff]   ;;  %v872_v48 = vsel %vm570_vm6, 1.0, %v1053_v1  ;;  %v1041_v52 = vld [vmem:[%s1255_s3 + $0x98] sm:$0xff]  }
  0x13   : > { %969 = vmatprep.subr.bf16.mxu1 %v1053_v1  ;;  %v249_v13 = vadd.f32 %v835_v11, %v241_v12  ;;  %v262_v21 = vpack.c.bf16 %v836_v16, %v836_v16  ;;  %v573_v50 = vpack.c.bf16 %v872_v48, %v872_v48  ;;  %v1040_v51 = vld [vmem:[%s1255_s3 + $0xa0] sm:$0xff]   ;;  %v1042_v53 = vld [vmem:[%s1255_s3 + $0x90] sm:$0xff]   ;;  %v1043_v54 = vld [vmem:[%s1255_s3 + $0x88] sm:$0xff]  }
  0x14   : > { %v1044_v55 = vld [vmem:[%s1255_s3 + $0x80] sm:$0xff]  }
  0x15   : > { %vm250_vm3 = vcmp.ge.f32.partialorder %v249_v13, 0.0  ;;  %v251_v15 = vmul.f32 0.1, %v249_v13 }
  0x16   : > { %970 = vmatpush3.bf16.msra.mxu1 %v1024_v10 }
  0x17   : > { %971 = vmatprep.subr.bf16.mxu1 %v1053_v1  ;;  %v252_v18 = vsel %vm250_vm3, %v249_v13, %v251_v15 }
  0x18   : > { %v253_v19 = vpack.c.bf16 %v252_v18, %v252_v18 }
  0x1a   : > { %972 = vmatpush3.bf16.msra.mxu1 %v1026_v14  ;;  %v1139_v20 = vsel %vm267_vm2, %v253_v19, 0 }
  0x1b   : > { %973 = vmatprep.subr.bf16.mxu1 %v1053_v1  ;;  %934 = vmatpush3.bf16.msra.mxu0 %v1139_v20 }
  0x1c   : > { %939 = vmatprep.subr.bf16.mxu0 %v1053_v1 }
  0x1e   : > { %974 = vmatpush3.bf16.msra.mxu1 %v1028_v17  ;;  %936 = vmatmul.mubr.msk.bf16.vlgmr.msra.gmra.mxu0 %vm263_vm4, %v262_v21 }
  0x1f   : > { %975 = vmatprep.subr.bf16.mxu1 %v1053_v1  ;;  %940 = vmatpush3.bf16.msra.mxu0 %v1139_v20 }
  0x20   : > { %941 = vmatprep.mubr.msk.bf16.mxu0 %vm1054_vm0, %v1053_v1  ;;  %945 = vmatprep.subr.bf16.mxu0 %v1053_v1 }
  0x22   : > { %976 = vmatpush3.bf16.msra.mxu1 %v1030_v22 }
  0x23   : > { %977 = vmatprep.subr.bf16.mxu1 %v1053_v1 }
  0x26   : > { %978 = vmatpush3.bf16.msra.mxu1 %v1032_v24  ;;  %942 = vmatmul.mubr.msk.bf16.vlgmr.msra.gmra.mxu0 %vm263_vm4, %v331_v25 }
  0x27   : > { %979 = vmatprep.subr.bf16.mxu1 %v1053_v1  ;;  %946 = vmatpush3.bf16.msra.mxu0 %v1023_v26 }
  0x28   : > { %961 = vmatprep.mubr.msk.bf16.mxu0 %vm1054_vm0, %v1053_v1  ;;  %947 = vmatprep.subr.bf16.mxu0 %v1053_v1 }
  0x2a   : > { %980 = vmatpush3.bf16.msra.mxu1 %v1034_v32 }
  0x2b   : > { %948 = vmatpush3.bf16.msra.mxu0 %v1025_v27  ;;  %991 = vmatprep.subr.bf16.mxu1 %v1053_v1 }
  0x2c   : > { %949 = vmatprep.subr.bf16.mxu0 %v1053_v1 }
  0x2f   : > { %950 = vmatpush3.bf16.msra.mxu0 %v1027_v28 }
  0x30   : > { %951 = vmatprep.subr.bf16.mxu0 %v1053_v1 }
  0x33   : > { %952 = vmatpush3.bf16.msra.mxu0 %v1029_v29 }
  0x34   : > { %953 = vmatprep.subr.bf16.mxu0 %v1053_v1 }
  0x37   : > { %954 = vmatpush3.bf16.msra.mxu0 %v1031_v30 }
  0x38   : > { %955 = vmatprep.subr.bf16.mxu0 %v1053_v1 }
  0x3b   : > { %956 = vmatpush3.bf16.msra.mxu0 %v1033_v31 }
  0x3c   : > { %957 = vmatprep.subr.bf16.mxu0 %v1053_v1 }
  0x3f   : > { %958 = vmatpush3.bf16.msra.mxu0 %v1035_v33 }
  0x40   : > { %959 = vmatprep.subr.bf16.mxu0 %v1053_v1 }
  0x43   : > { %960 = vmatpush3.bf16.msra.mxu0 %v1036_v34 }
  0x44   : > { %985 = vmatprep.subr.bf16.mxu0 %v1053_v1 }
  0xde   : > { %v305_v35 = vpop.f32.mrf.mxu0 }
  0xdf   : > { %v311_v37 = vpack.c.bf16 %v305_v35, %v305_v35 }
  0xe0   : > { %v937_v38 = vpop.f32.mrf.mxu0 }
  0xe1   : > { %982 = vmatmul.mubr.bf16.vlgmr.msra.gmra.mxu1 %v311_v37 }
  0xe2   : > { %v308_v39 = vpop.f32.mrf.mxu0  ;;  %992 = vmatpush3.bf16.msra.mxu1 %v1037_v36  ;;  %1007 = vmatprep.mubr.msk.bf16.mxu1 %vm1054_vm0, %v1053_v1 }
  0xe3   : > { %993 = vmatprep.subr.bf16.mxu1 %v1053_v1 }
  0xe4   : > { %v938_v42 = vpop.f32.mrf.mxu0 }
  0xe6   : > { %v369_v43 = vpop.f32.mrf.mxu0  ;;  %994 = vmatpush3.bf16.msra.mxu1 %v1038_v40 }
  0xe7   : > { %v375_v44 = vpack.c.bf16 %v369_v43, %v369_v43  ;;  %995 = vmatprep.subr.bf16.mxu1 %v1053_v1 }
  0xe8   : > { %v943_v46 = vpop.f32.mrf.mxu0 }
  0xe9   : > { %962 = vmatmul.mubr.bf16.vlgmr.msra.gmra.mxu0 %v375_v44 }
  0xea   : > { %v372_v47 = vpop.f32.mrf.mxu0  ;;  %986 = vmatpush3.bf16.msra.mxu0 %v1139_v20  ;;  %987 = vmatprep.mubr.msk.bf16.mxu0 %vm1054_vm0, %v1053_v1 }
  0xeb   : > { %996 = vmatpush3.bf16.msra.mxu1 %v1039_v45 }
  0xec   : > { %v944_v49 = vpop.f32.mrf.mxu0  ;;  %997 = vmatprep.subr.bf16.mxu1 %v1053_v1 }
  0xef   : > { %998 = vmatpush3.bf16.msra.mxu1 %v1040_v51 }
  0xf0   : > { %999 = vmatprep.subr.bf16.mxu1 %v1053_v1 }
  0xf1   : > { %988 = vmatmul.mubr.msk.bf16.vlgmr.msra.gmra.mxu0 %vm263_vm4, %v573_v50 }
  0xf3   : > { %1000 = vmatpush3.bf16.msra.mxu1 %v1041_v52 }
  0xf4   : > { %1001 = vmatprep.subr.bf16.mxu1 %v1053_v1 }
  0xf7   : > { %1002 = vmatpush3.bf16.msra.mxu1 %v1042_v53 }
  0xf8   : > { %1003 = vmatprep.subr.bf16.mxu1 %v1053_v1 }
  0xfb   : > { %1004 = vmatpush3.bf16.msra.mxu1 %v1043_v54 }
  0xfc   : > { %1005 = vmatprep.subr.bf16.mxu1 %v1053_v1 }
  0xff   : > { %1006 = vmatpush3.bf16.msra.mxu1 %v1044_v55 }
 0x1a1   : > { %v563_v56 = vpop.f32.mrf.mxu1 }
 0x1a3   : > { %v983_v57 = vpop.f32.mrf.mxu1 }
 0x1a5   : > { %v566_v58 = vpop.f32.mrf.mxu1 }
 0x1a7   : > { %v984_v59 = vpop.f32.mrf.mxu1 }
 0x1a9   : > { %v475_v60 = vpop.f32.mrf.mxu0 }
 0x1aa   : > { %v564_v61 = vadd.f32 %v563_v56, %v475_v60 }
 0x1ab   : > { %v963_v62 = vpop.f32.mrf.mxu0 }
 0x1ad   : > { %v478_v63 = vpop.f32.mrf.mxu0 }
 0x1af   : > { %v964_v0 = vpop.f32.mrf.mxu0 }
 0x1b1   : > { %v611_v2 = vpop.f32.mrf.mxu0 }
 0x1b2   : > { %v617_v4 = vpack.c.bf16 %v611_v2, %v611_v2 }
 0x1b3   : > { %v989_v5 = vpop.f32.mrf.mxu0 }
 0x1b4   : > { %1008 = vmatmul.mubr.bf16.vlgmr.msra.gmra.mxu1 %v617_v4 }
 0x1b5   : > { %v614_v1 = vpop.f32.mrf.mxu0 }
 0x1b7   : > { %v990_v6 = vpop.f32.mrf.mxu0 }
 0x274   : > { %v717_v7 = vpop.f32.mrf.mxu1 }
 0x275   : > { %v723_v8 = vadd.f32 %v717_v7, %v564_v61 }
 0x276   : > { %v1009_v9 = vpop.f32.mrf.mxu1 }
 0x277   : > { %v724_v10 = vpack.c.bf16 %v723_v8, %v723_v8  ;;  %v726_v11 = vrot.slane %v723_v8, 4  ;;  %v732_v12 = vmul.f32 %v723_v8, %v723_v8 }
 0x278   : > { %v720_v13 = vpop.f32.mrf.mxu1 }
 0x279   : > { %725 = vst [vmem:[%s226_s9] sm:$0xf] %v724_v10  ;;  %v727_v14 = vadd.f32 %v726_v11, %v723_v8  ;;  %v733_v15 = vrot.slane %v732_v12, 4 }
 0x27a   : > { %v1010_v16 = vpop.f32.mrf.mxu1 }
 0x27b   : > { %v728_v17 = vrot.slane %v727_v14, 2  ;;  %v734_v18 = vadd.f32 %v733_v15, %v732_v12 }
 0x27d   : > { %v729_v19 = vadd.f32 %v728_v17, %v727_v14  ;;  %v735_v20 = vrot.slane %v734_v18, 2 }
 0x27f   : > { %v730_v21 = vrot.slane %v729_v19, 1  ;;  %v736_v22 = vadd.f32 %v735_v20, %v734_v18 }
 0x281   : > { %v737_v23 = vrot.slane %v736_v22, 1  ;;  %v731_v24 = vadd.f32 %v730_v21, %v729_v19 }
 0x283   : > { %v738_v25 = vadd.f32 %v737_v23, %v736_v22 }
 0x285   : > { %v740_v26 = vsel %vm739_vm7, %v731_v24, %v738_v25 }
 0x286   : > { %741 = vst [vmem:[%s230_s12] sm:$0x3] %v740_v26 }
 0x287 PF: > { %s16_s18 = sadd.s32 1, %s1051_s18  }
 0x288   : > { %p13_p4 = scmp.ge.s32.totalorder %s16_s18, 4  }
 0x28a   :  { %15 = sbr.rel (!%p13_p4) target bundleno = 1 (0x1), region = 80 }

</bundles_post_ra>
